<compile_context>
chip_gen: v7x
topology: tpu7x:2x2x1
jax: 0.10.0
libtpu: 0.0.40
codegen_flags: <defaults>
</compile_context>

<pallas_src>
import functools
import math

import jax
import jax.numpy as jnp
from jax.experimental import pallas as pl
from jax.experimental.pallas import tpu as pltpu

NUM_HEADS = 8


def _temporal_attention_kernel(hidden_ref, bseq_ref, kbias_ref, pw_ref,
                               wqkv_ref, wof_ref, bof_ref,
                               logits_ref, probs_ref, attnw_ref):
    x = hidden_ref[...]                                        # [Bt,Sp,H] bf16
    bt, sp, hidden = x.shape
    n_heads, hd, n_cls = wof_ref.shape
    inv_heads = 1.0 / n_heads

    # Fused (temporal_proj ∘ in_proj) QKV projection; pos_emb and biases are
    # pre-folded (and Q pre-scaled by 1/sqrt(hd)) into bseq_ref ([Sp,3H]).
    qkv = (jnp.einsum('bsh,hk->bsk', x, wqkv_ref[...],
                      preferred_element_type=jnp.float32)
           + bseq_ref[...].astype(jnp.float32)[None, :, :]
           ).astype(jnp.bfloat16)                              # [Bt,Sp,3H]

    # Hoisted broadcasts (JAX does not CSE broadcast_in_dim across head iters).
    kbias = jnp.broadcast_to(kbias_ref[...], (bt, sp, sp))     # [Bt,Sp,Sp] f32
    poolw = jnp.broadcast_to(pw_ref[...][:, :, None], (bt, sp, sp))

    logits_acc = jnp.zeros((bt, 1, n_cls), jnp.float32)

    for h in range(n_heads):
        qh = qkv[..., h * hd:(h + 1) * hd]                     # [Bt,Sp,hd] bf16
        kh = qkv[..., hidden + h * hd:hidden + (h + 1) * hd]
        vh = qkv[..., 2 * hidden + h * hd:2 * hidden + (h + 1) * hd]

        s = jnp.einsum('bsd,btd->bst', qh, kh,
                       preferred_element_type=jnp.float32) + kbias
        m = jnp.max(s, axis=-1, keepdims=True)
        e = jnp.exp(s - m)
        attn = e * pl.reciprocal(jnp.sum(e, axis=-1, keepdims=True), approx=True)

        # average_attn_weights=True: accumulate directly into the output ref;
        # the 1/num_heads scale is folded into the last head's update.
        if h == 0:
            attnw_ref[...] = attn
        elif h == n_heads - 1:
            attnw_ref[...] = (attnw_ref[...] + attn) * inv_heads
        else:
            attnw_ref[...] = attnw_ref[...] + attn

        # mean over valid query rows commuted past the value matmul:
        #   mean_s(attn @ v) = (pw @ attn) @ v,  pw = 1/S on rows < S else 0.
        pa = jnp.sum(attn * poolw, axis=1, keepdims=True)       # [Bt,1,Sp] f32
        pooled = jnp.einsum('bzt,btd->bzd', pa.astype(jnp.bfloat16), vh,
                            preferred_element_type=jnp.float32)  # [Bt,1,hd]
        logits_acc = logits_acc + jnp.einsum(
            'bzd,dc->bzc', pooled, wof_ref[h],
            preferred_element_type=jnp.float32)

    logits = logits_acc + bof_ref[...][None, :, :]               # [Bt,1,C]
    logits_ref[...] = logits
    ml = jnp.max(logits, axis=-1, keepdims=True)
    el = jnp.exp(logits - ml)
    probs_ref[...] = el / jnp.sum(el, axis=-1, keepdims=True)    # exact recip


def _round_up(x, m):
    return ((x + m - 1) // m) * m


def _vmem_limit_bytes():
    cap = None
    try:
        info_fn = getattr(pltpu, "get_tpu_info", None)
        if info_fn is not None:
            cap = getattr(info_fn(), "vmem_capacity_bytes", None)
    except Exception:
        cap = None
    if not cap:
        cap = 64 * 1024 * 1024            # assume smallest per-core VMEM (v7x)
    return int(min(40 * 1024 * 1024, (int(cap) * 3) // 5))


def _pick_block_b(batch, sp, hidden, vmem_budget):
    """Largest batch tile fitting the budget, targeting >=256 matmul rows,
    while keeping >=2 grid steps so 'parallel' can use both v7x cores."""
    per_b = (sp * hidden * 2 * 2          # hidden bf16 block, double-buffered
             + sp * sp * 4 * 2            # attnw f32 block, double-buffered
             + sp * 3 * hidden * 6        # qkv slab (f32 accum + bf16 copy)
             + sp * sp * 4 * 5)           # kbias/pool broadcasts + s/e/attn temps
    fits = max(1, vmem_budget // max(1, per_b))
    want = max(1, -(-256 // sp))          # ceil(256 / sp) examples
    bb = max(1, min(batch, fits, want))
    if bb == batch and batch >= 2:
        bb = (batch + 1) // 2             # keep >= 2 grid steps (megacore)
    return bb


def build_params(key, *, vocab_size, hidden_size, num_classes, max_pos=100):
    ks = jax.random.split(key, 10)
    s = 0.02
    p = {
        # TODO(synk): stand-in token-embedding table replaces the pretrained BERT encoder.
        'tok_emb': jax.random.normal(ks[0], (vocab_size, hidden_size), jnp.float32) * s,
        'pos_emb': jax.random.normal(ks[1], (max_pos, hidden_size), jnp.float32) * s,
        # PyTorch-style [out, in] weights
        'w_proj': jax.random.normal(ks[2], (hidden_size, hidden_size), jnp.float32) * s,
        'b_proj': jax.random.normal(ks[3], (hidden_size,), jnp.float32) * s,
        'w_in':   jax.random.normal(ks[4], (3 * hidden_size, hidden_size), jnp.float32) * s,
        'b_in':   jax.random.normal(ks[5], (3 * hidden_size,), jnp.float32) * s,
        'w_out':  jax.random.normal(ks[6], (hidden_size, hidden_size), jnp.float32) * s,
        'b_out':  jax.random.normal(ks[7], (hidden_size,), jnp.float32) * s,
        'w_fc':   jax.random.normal(ks[8], (num_classes, hidden_size), jnp.float32) * s,
        'b_fc':   jax.random.normal(ks[9], (num_classes,), jnp.float32) * s,
    }
    return p


@functools.partial(jax.jit, static_argnames=('num_classes', 'block_b'))
def temporal_attention_forward(context, mask, params, *, num_classes, block_b=None):
    """Returns (logits, probabilities, attn_weights) like the PyTorch module."""
    B, S = context.shape
    H = params['tok_emb'].shape[1]
    hd = H // NUM_HEADS

    # TODO(synk): the real model runs a pretrained BERT here; we use a lookup.
    last_hidden = jnp.take(params['tok_emb'], context, axis=0)          # [B,S,H]
    pos_emb = params['pos_emb'][:S].astype(jnp.float32)                 # [S,H]

    # ---- exact algebraic weight fusion (wrapper-side glue) -----------------
    # temporal_proj folded into the MHA in-projection, Q pre-scaled by 1/sqrt(hd):
    #   qkv = (x+p) (Wp^T Win^T) + (bp Win^T + bin)
    scale = 1.0 / math.sqrt(hd)
    col_scale = jnp.concatenate([jnp.full((H,), scale, jnp.float32),
                                 jnp.ones((2 * H,), jnp.float32)])
    w_qkv = (params['w_proj'].T @ params['w_in'].T) * col_scale[None, :]   # [H,3H]
    b_qkv = (params['b_proj'] @ params['w_in'].T + params['b_in']) * col_scale
    # pos_emb folded into a per-position qkv bias (drops the in-kernel add).
    b_seq = pos_emb @ w_qkv + b_qkv[None, :]                               # [S,3H]

    # out_proj hoisted past the mean-pool and folded into fc:
    #   logits = mean_s(ctx) (Wout^T Wfc^T) + (bout Wfc^T + bfc)
    w_of = (params['w_out'].T @ params['w_fc'].T).reshape(NUM_HEADS, hd, num_classes)
    b_of = (params['b_out'] @ params['w_fc'].T + params['b_fc'])[None, :]  # [1,C]

    # ---- lane-dense sequence padding (S -> multiple of 128) ----------------
    Sp = _round_up(S, 128)
    pad_s = Sp - S
    hidden_p = jnp.pad(last_hidden, ((0, 0), (0, pad_s), (0, 0)))
    b_seq_p = jnp.pad(b_seq, ((0, pad_s), (0, 0)))
    # key_padding_mask bias; finite -1e30 (NaN-safe); padded keys also masked.
    kbias = jnp.where(mask.astype(bool), 0.0, -1e30).astype(jnp.float32)
    kbias = jnp.pad(kbias, ((0, 0), (0, pad_s)), constant_values=-1e30)[:, None, :]
    # mean-pool weights over query rows (only the real S rows contribute).
    poolw = jnp.pad(jnp.full((1, S), 1.0 / S, jnp.float32), ((0, 0), (0, pad_s)))

    hidden_bf16 = hidden_p.astype(jnp.bfloat16)
    b_seq_bf16 = b_seq_p.astype(jnp.bfloat16)
    w_qkv_bf16 = w_qkv.astype(jnp.bfloat16)

    vmem_limit = _vmem_limit_bytes()
    bt = block_b if block_b is not None else _pick_block_b(B, Sp, H, vmem_limit // 2)
    bt = max(1, min(int(bt), B))
    grid = (pl.cdiv(B, bt),)

    def full_spec(shape):
        return pl.BlockSpec(shape, lambda i, _n=len(shape): (0,) * _n)

    def batch_spec(shape):
        return pl.BlockSpec(shape, lambda i, _n=len(shape): (i,) + (0,) * (_n - 1))

    logits3, probs3, attnw = pl.pallas_call(
        _temporal_attention_kernel,
        grid=grid,
        in_specs=[
            batch_spec((bt, Sp, H)),                   # hidden (bf16)
            full_spec((Sp, 3 * H)),                    # pos-folded qkv bias (bf16)
            batch_spec((bt, 1, Sp)),                   # key-padding bias (f32)
            full_spec((1, Sp)),                        # query mean-pool weights
            full_spec((H, 3 * H)),                     # fused QKV weight (bf16)
            full_spec((NUM_HEADS, hd, num_classes)),   # fused out_proj∘fc weight
            full_spec((1, num_classes)),               # fused out_proj∘fc bias
        ],
        out_specs=(
            batch_spec((bt, 1, num_classes)),
            batch_spec((bt, 1, num_classes)),
            batch_spec((bt, Sp, Sp)),
        ),
        out_shape=(
            jax.ShapeDtypeStruct((B, 1, num_classes), jnp.float32),
            jax.ShapeDtypeStruct((B, 1, num_classes), jnp.float32),
            jax.ShapeDtypeStruct((B, Sp, Sp), jnp.float32),
        ),
        compiler_params=pltpu.CompilerParams(
            dimension_semantics=("parallel",),          # megacore-shard batch tiles
            vmem_limit_bytes=vmem_limit,
        ),
    )(hidden_bf16, b_seq_bf16, kbias, poolw, w_qkv_bf16,
      w_of.astype(jnp.float32), b_of.astype(jnp.float32))

    return logits3[:, 0, :], probs3[:, 0, :], attnw[:, :S, :S]


def reference_forward(context, mask, params, num_classes):
    """Pure-JAX f32 reference mirroring the PyTorch semantics (unfused math)."""
    B, S = context.shape
    H = params['tok_emb'].shape[1]
    hd = H // NUM_HEADS
    last_hidden = jnp.take(params['tok_emb'], context, axis=0)
    x = last_hidden + params['pos_emb'][:S][None]
    proj = x @ params['w_proj'].T + params['b_proj']
    qkv = proj @ params['w_in'].T + params['b_in']
    q, k, v = qkv[..., :H], qkv[..., H:2 * H], qkv[..., 2 * H:]
    qh = q.reshape(B, S, NUM_HEADS, hd)
    kh = k.reshape(B, S, NUM_HEADS, hd)
    vh = v.reshape(B, S, NUM_HEADS, hd)
    scores = jnp.einsum('bsnd,btnd->bnst', qh, kh) / jnp.sqrt(hd)
    bias = jnp.where(mask.astype(bool), 0.0, -jnp.inf)[:, None, None, :]
    attn = jax.nn.softmax(scores + bias, axis=-1)
    ctx = jnp.einsum('bnst,btnd->bsnd', attn, vh).reshape(B, S, H)
    out = ctx @ params['w_out'].T + params['b_out']
    pooled = jnp.mean(out, axis=1)
    logits = pooled @ params['w_fc'].T + params['b_fc']
    return logits, jax.nn.softmax(logits, axis=-1), jnp.mean(attn, axis=1)


if __name__ == "__main__":
    B, S, H, C, V = 2, 8, 32, 5, 30

    key = jax.random.PRNGKey(0)
    k_ctx, k_par = jax.random.split(key)
    params = build_params(k_par, vocab_size=V, hidden_size=H, num_classes=C)

    # context token ids (x[0]) and attention mask (x[2]); second example padded.
    context = jax.random.randint(k_ctx, (B, S), 0, V, dtype=jnp.int32)
    mask = jnp.array([[1] * S, [1] * (S - 3) + [0] * 3], dtype=jnp.int32)

    logits, probs, attnw = temporal_attention_forward(
        context, mask, params, num_classes=C)
    jax.block_until_ready((logits, probs, attnw))

    ref_logits, ref_probs, ref_attnw = reference_forward(context, mask, params, C)
    assert logits.shape == (B, C) and probs.shape == (B, C) and attnw.shape == (B, S, S)
    # bf16 MXU operands + approx reciprocal in the attention softmax -> loose tol
    assert jnp.allclose(logits, ref_logits, atol=2e-3, rtol=2e-2)
    assert jnp.allclose(probs, ref_probs, atol=2e-3, rtol=2e-2)
    assert jnp.allclose(attnw, ref_attnw, atol=2e-3, rtol=2e-2)

    print("KERNEL_OK")
</pallas_src>

<mosaic_0001>
module attributes {stable_mosaic.version = 11 : i64} {
  func.func @_temporal_attention_kernel(%arg0: i32, %arg1: memref<1x128x32xbf16, #tpu.memory_space<vmem>>, %arg2: memref<128x96xbf16, #tpu.memory_space<vmem>>, %arg3: memref<1x1x128xf32, #tpu.memory_space<vmem>>, %arg4: memref<1x128xf32, #tpu.memory_space<vmem>>, %arg5: memref<32x96xbf16, #tpu.memory_space<vmem>>, %arg6: memref<8x4x5xf32, #tpu.memory_space<vmem>>, %arg7: memref<1x5xf32, #tpu.memory_space<vmem>>, %arg8: memref<1x1x5xf32, #tpu.memory_space<vmem>>, %arg9: memref<1x1x5xf32, #tpu.memory_space<vmem>>, %arg10: memref<1x128x128xf32, #tpu.memory_space<vmem>>) attributes {dimension_semantics = [#tpu.dimension_semantics<parallel>], iteration_bounds = array<i64: 2>, scalar_prefetch = 0 : i64, scratch_operands = 0 : i64, tpu.core_type = #tpu.core_type<tc>, window_params = [{transform_indices = @transform_0, window_bounds = array<i64: 1, 128, 32>}, {pipeline_mode = #tpu.pipeline_mode<synchronous>, transform_indices = @transform_1, window_bounds = array<i64: 128, 96>}, {transform_indices = @transform_2, window_bounds = array<i64: 1, 1, 128>}, {pipeline_mode = #tpu.pipeline_mode<synchronous>, transform_indices = @transform_3, window_bounds = array<i64: 1, 128>}, {pipeline_mode = #tpu.pipeline_mode<synchronous>, transform_indices = @transform_4, window_bounds = array<i64: 32, 96>}, {pipeline_mode = #tpu.pipeline_mode<synchronous>, transform_indices = @transform_5, window_bounds = array<i64: 8, 4, 5>}, {pipeline_mode = #tpu.pipeline_mode<synchronous>, transform_indices = @transform_6, window_bounds = array<i64: 1, 5>}, {transform_indices = @transform_7, window_bounds = array<i64: 1, 1, 5>}, {transform_indices = @transform_8, window_bounds = array<i64: 1, 1, 5>}, {transform_indices = @transform_9, window_bounds = array<i64: 1, 128, 128>}]} {
    %c0 = arith.constant 0 : index
    %c0_0 = arith.constant 0 : index
    %c0_1 = arith.constant 0 : index
    %0 = vector.load %arg1[%c0, %c0_0, %c0_1] : memref<1x128x32xbf16, #tpu.memory_space<vmem>>, vector<1x128x32xbf16>
    %c0_2 = arith.constant 0 : index
    %c0_3 = arith.constant 0 : index
    %1 = vector.load %arg5[%c0_2, %c0_3] : memref<32x96xbf16, #tpu.memory_space<vmem>>, vector<32x96xbf16>
    "tpu.trace_start"() <{level = 10 : i32, message = "bsh,hk->bsk"}> : () -> ()
    %cst = arith.constant dense<0.000000e+00> : vector<1x128x96xf32>
    %2 = tpu.matmul %0, %1, %cst {dimension_numbers = #tpu.dot_dimension_numbers<[2], [0], [0, 1], [1], [0, 0, 0, 1, 1, 1], [], []>} : vector<1x128x32xbf16>, vector<32x96xbf16>, vector<1x128x96xf32> -> vector<1x128x96xf32>
    "tpu.trace_stop"() : () -> ()
    %c0_4 = arith.constant 0 : index
    %c0_5 = arith.constant 0 : index
    %3 = vector.load %arg2[%c0_4, %c0_5] : memref<128x96xbf16, #tpu.memory_space<vmem>>, vector<128x96xbf16>
    %4 = arith.extf %3 : vector<128x96xbf16> to vector<128x96xf32>
    %5 = vector.shape_cast %4 : vector<128x96xf32> to vector<1x128x96xf32>
    %6 = arith.addf %2, %5 : vector<1x128x96xf32>
    %7 = arith.truncf %6 : vector<1x128x96xf32> to vector<1x128x96xbf16>
    %c0_6 = arith.constant 0 : index
    %c0_7 = arith.constant 0 : index
    %c0_8 = arith.constant 0 : index
    %8 = vector.load %arg3[%c0_6, %c0_7, %c0_8] : memref<1x1x128xf32, #tpu.memory_space<vmem>>, vector<1x1x128xf32>
    %9 = vector.shape_cast %8 : vector<1x1x128xf32> to vector<1x1x128xf32>
    %10 = vector.broadcast %9 : vector<1x1x128xf32> to vector<1x128x128xf32>
    %c0_9 = arith.constant 0 : index
    %c0_10 = arith.constant 0 : index
    %11 = vector.load %arg4[%c0_9, %c0_10] : memref<1x128xf32, #tpu.memory_space<vmem>>, vector<1x128xf32>
    %12 = vector.shape_cast %11 : vector<1x128xf32> to vector<1x128x1xf32>
    %13 = vector.shape_cast %12 : vector<1x128x1xf32> to vector<1x128x1xf32>
    %14 = vector.broadcast %13 : vector<1x128x1xf32> to vector<1x128x128xf32>
    %cst_11 = arith.constant 0.000000e+00 : f32
    %15 = vector.broadcast %cst_11 : f32 to vector<1x1x5xf32>
    %16 = vector.extract_strided_slice %7 {offsets = [0, 0, 0], sizes = [1, 128, 4], strides = [1, 1, 1]} : vector<1x128x96xbf16> to vector<1x128x4xbf16>
    %17 = vector.extract_strided_slice %7 {offsets = [0, 0, 32], sizes = [1, 128, 4], strides = [1, 1, 1]} : vector<1x128x96xbf16> to vector<1x128x4xbf16>
    %18 = vector.extract_strided_slice %7 {offsets = [0, 0, 64], sizes = [1, 128, 4], strides = [1, 1, 1]} : vector<1x128x96xbf16> to vector<1x128x4xbf16>
    "tpu.trace_start"() <{level = 10 : i32, message = "bsd,btd->bst"}> : () -> ()
    %cst_12 = arith.constant dense<0.000000e+00> : vector<1x128x128xf32>
    %19 = tpu.matmul %16, %17, %cst_12 {dimension_numbers = #tpu.dot_dimension_numbers<[2], [2], [1], [1], [0, 0, 0, 1, 1, 1], [0], [0]>} : vector<1x128x4xbf16>, vector<1x128x4xbf16>, vector<1x128x128xf32> -> vector<1x128x128xf32>
    "tpu.trace_stop"() : () -> ()
    %20 = arith.addf %19, %10 : vector<1x128x128xf32>
    %cst_13 = arith.constant dense<0xFF800000> : vector<1x128xf32>
    %21 = vector.multi_reduction <maximumf>, %20, %cst_13 [2] : vector<1x128x128xf32> to vector<1x128xf32>
    %22 = vector.shape_cast %21 : vector<1x128xf32> to vector<1x128x1xf32>
    %23 = vector.broadcast %22 : vector<1x128x1xf32> to vector<1x128x128xf32>
    %24 = arith.subf %20, %23 : vector<1x128x128xf32>
    %25 = math.exp %24 : vector<1x128x128xf32>
    %cst_14 = arith.constant dense<0.000000e+00> : vector<1x128xf32>
    %26 = vector.multi_reduction <add>, %25, %cst_14 [2] : vector<1x128x128xf32> to vector<1x128xf32>
    %27 = vector.shape_cast %26 : vector<1x128xf32> to vector<1x128x1xf32>
    %28 = tpu.reciprocal %27 {approx = true} : vector<1x128x1xf32> -> vector<1x128x1xf32>
    %29 = vector.broadcast %28 : vector<1x128x1xf32> to vector<1x128x128xf32>
    %30 = arith.mulf %25, %29 : vector<1x128x128xf32>
    %c0_15 = arith.constant 0 : index
    %c0_16 = arith.constant 0 : index
    %c0_17 = arith.constant 0 : index
    %31 = vector.load %arg10[%c0_15, %c0_16, %c0_17] : memref<1x128x128xf32, #tpu.memory_space<vmem>>, vector<1x128x128xf32>
    tpu.vector_store %arg10[%c0_15, %c0_16, %c0_17], %30 {strides = array<i32>} : memref<1x128x128xf32, #tpu.memory_space<vmem>>, vector<1x128x128xf32>,
    %32 = arith.mulf %30, %14 : vector<1x128x128xf32>
    %cst_18 = arith.constant dense<0.000000e+00> : vector<1x128xf32>
    %33 = vector.multi_reduction <add>, %32, %cst_18 [1] : vector<1x128x128xf32> to vector<1x128xf32>
    %34 = vector.shape_cast %33 : vector<1x128xf32> to vector<1x1x128xf32>
    %35 = arith.truncf %34 : vector<1x1x128xf32> to vector<1x1x128xbf16>
    "tpu.trace_start"() <{level = 10 : i32, message = "bzt,btd->bzd"}> : () -> ()
    %cst_19 = arith.constant dense<0.000000e+00> : vector<1x1x4xf32>
    %36 = tpu.matmul %35, %18, %cst_19 {dimension_numbers = #tpu.dot_dimension_numbers<[2], [1], [1], [2], [0, 0, 0, 1, 1, 2], [0], [0]>} : vector<1x1x128xbf16>, vector<1x128x4xbf16>, vector<1x1x4xf32> -> vector<1x1x4xf32>
    "tpu.trace_stop"() : () -> ()
    %c0_20 = arith.constant 0 : index
    %c0_21 = arith.constant 0 : index
    %c0_22 = arith.constant 0 : index
    %37 = vector.load %arg6[%c0_20, %c0_21, %c0_22] : memref<8x4x5xf32, #tpu.memory_space<vmem>>, vector<1x4x5xf32>
    %38 = vector.shape_cast %37 : vector<1x4x5xf32> to vector<4x5xf32>
    "tpu.trace_start"() <{level = 10 : i32, message = "bzd,dc->bzc"}> : () -> ()
    %cst_23 = arith.constant dense<0.000000e+00> : vector<1x1x5xf32>
    %39 = tpu.matmul %36, %38, %cst_23 {dimension_numbers = #tpu.dot_dimension_numbers<[2], [0], [0, 1], [1], [0, 0, 0, 1, 1, 1], [], []>} : vector<1x1x4xf32>, vector<4x5xf32>, vector<1x1x5xf32> -> vector<1x1x5xf32>
    "tpu.trace_stop"() : () -> ()
    %40 = arith.addf %15, %39 : vector<1x1x5xf32>
    %41 = vector.extract_strided_slice %7 {offsets = [0, 0, 4], sizes = [1, 128, 4], strides = [1, 1, 1]} : vector<1x128x96xbf16> to vector<1x128x4xbf16>
    %42 = vector.extract_strided_slice %7 {offsets = [0, 0, 36], sizes = [1, 128, 4], strides = [1, 1, 1]} : vector<1x128x96xbf16> to vector<1x128x4xbf16>
    %43 = vector.extract_strided_slice %7 {offsets = [0, 0, 68], sizes = [1, 128, 4], strides = [1, 1, 1]} : vector<1x128x96xbf16> to vector<1x128x4xbf16>
    "tpu.trace_start"() <{level = 10 : i32, message = "bsd,btd->bst"}> : () -> ()
    %cst_24 = arith.constant dense<0.000000e+00> : vector<1x128x128xf32>
    %44 = tpu.matmul %41, %42, %cst_24 {dimension_numbers = #tpu.dot_dimension_numbers<[2], [2], [1], [1], [0, 0, 0, 1, 1, 1], [0], [0]>} : vector<1x128x4xbf16>, vector<1x128x4xbf16>, vector<1x128x128xf32> -> vector<1x128x128xf32>
    "tpu.trace_stop"() : () -> ()
    %45 = arith.addf %44, %10 : vector<1x128x128xf32>
    %cst_25 = arith.constant dense<0xFF800000> : vector<1x128xf32>
    %46 = vector.multi_reduction <maximumf>, %45, %cst_25 [2] : vector<1x128x128xf32> to vector<1x128xf32>
    %47 = vector.shape_cast %46 : vector<1x128xf32> to vector<1x128x1xf32>
    %48 = vector.broadcast %47 : vector<1x128x1xf32> to vector<1x128x128xf32>
    %49 = arith.subf %45, %48 : vector<1x128x128xf32>
    %50 = math.exp %49 : vector<1x128x128xf32>
    %cst_26 = arith.constant dense<0.000000e+00> : vector<1x128xf32>
    %51 = vector.multi_reduction <add>, %50, %cst_26 [2] : vector<1x128x128xf32> to vector<1x128xf32>
    %52 = vector.shape_cast %51 : vector<1x128xf32> to vector<1x128x1xf32>
    %53 = tpu.reciprocal %52 {approx = true} : vector<1x128x1xf32> -> vector<1x128x1xf32>
    %54 = vector.broadcast %53 : vector<1x128x1xf32> to vector<1x128x128xf32>
    %55 = arith.mulf %50, %54 : vector<1x128x128xf32>
    %c0_27 = arith.constant 0 : index
    %c0_28 = arith.constant 0 : index
    %c0_29 = arith.constant 0 : index
    %56 = vector.load %arg10[%c0_27, %c0_28, %c0_29] : memref<1x128x128xf32, #tpu.memory_space<vmem>>, vector<1x128x128xf32>
    %57 = arith.addf %56, %55 : vector<1x128x128xf32>
    %c0_30 = arith.constant 0 : index
    %c0_31 = arith.constant 0 : index
    %c0_32 = arith.constant 0 : index
    %58 = vector.load %arg10[%c0_30, %c0_31, %c0_32] : memref<1x128x128xf32, #tpu.memory_space<vmem>>, vector<1x128x128xf32>
    tpu.vector_store %arg10[%c0_30, %c0_31, %c0_32], %57 {strides = array<i32>} : memref<1x128x128xf32, #tpu.memory_space<vmem>>, vector<1x128x128xf32>,
    %59 = arith.mulf %55, %14 : vector<1x128x128xf32>
    %cst_33 = arith.constant dense<0.000000e+00> : vector<1x128xf32>
    %60 = vector.multi_reduction <add>, %59, %cst_33 [1] : vector<1x128x128xf32> to vector<1x128xf32>
    %61 = vector.shape_cast %60 : vector<1x128xf32> to vector<1x1x128xf32>
    %62 = arith.truncf %61 : vector<1x1x128xf32> to vector<1x1x128xbf16>
    "tpu.trace_start"() <{level = 10 : i32, message = "bzt,btd->bzd"}> : () -> ()
    %cst_34 = arith.constant dense<0.000000e+00> : vector<1x1x4xf32>
    %63 = tpu.matmul %62, %43, %cst_34 {dimension_numbers = #tpu.dot_dimension_numbers<[2], [1], [1], [2], [0, 0, 0, 1, 1, 2], [0], [0]>} : vector<1x1x128xbf16>, vector<1x128x4xbf16>, vector<1x1x4xf32> -> vector<1x1x4xf32>
    "tpu.trace_stop"() : () -> ()
    %c1 = arith.constant 1 : index
    %c0_35 = arith.constant 0 : index
    %c0_36 = arith.constant 0 : index
    %64 = vector.load %arg6[%c1, %c0_35, %c0_36] : memref<8x4x5xf32, #tpu.memory_space<vmem>>, vector<1x4x5xf32>
    %65 = vector.shape_cast %64 : vector<1x4x5xf32> to vector<4x5xf32>
    "tpu.trace_start"() <{level = 10 : i32, message = "bzd,dc->bzc"}> : () -> ()
    %cst_37 = arith.constant dense<0.000000e+00> : vector<1x1x5xf32>
    %66 = tpu.matmul %63, %65, %cst_37 {dimension_numbers = #tpu.dot_dimension_numbers<[2], [0], [0, 1], [1], [0, 0, 0, 1, 1, 1], [], []>} : vector<1x1x4xf32>, vector<4x5xf32>, vector<1x1x5xf32> -> vector<1x1x5xf32>
    "tpu.trace_stop"() : () -> ()
    %67 = arith.addf %40, %66 : vector<1x1x5xf32>
    %68 = vector.extract_strided_slice %7 {offsets = [0, 0, 8], sizes = [1, 128, 4], strides = [1, 1, 1]} : vector<1x128x96xbf16> to vector<1x128x4xbf16>
    %69 = vector.extract_strided_slice %7 {offsets = [0, 0, 40], sizes = [1, 128, 4], strides = [1, 1, 1]} : vector<1x128x96xbf16> to vector<1x128x4xbf16>
    %70 = vector.extract_strided_slice %7 {offsets = [0, 0, 72], sizes = [1, 128, 4], strides = [1, 1, 1]} : vector<1x128x96xbf16> to vector<1x128x4xbf16>
    "tpu.trace_start"() <{level = 10 : i32, message = "bsd,btd->bst"}> : () -> ()
    %cst_38 = arith.constant dense<0.000000e+00> : vector<1x128x128xf32>
    %71 = tpu.matmul %68, %69, %cst_38 {dimension_numbers = #tpu.dot_dimension_numbers<[2], [2], [1], [1], [0, 0, 0, 1, 1, 1], [0], [0]>} : vector<1x128x4xbf16>, vector<1x128x4xbf16>, vector<1x128x128xf32> -> vector<1x128x128xf32>
    "tpu.trace_stop"() : () -> ()
    %72 = arith.addf %71, %10 : vector<1x128x128xf32>
    %cst_39 = arith.constant dense<0xFF800000> : vector<1x128xf32>
    %73 = vector.multi_reduction <maximumf>, %72, %cst_39 [2] : vector<1x128x128xf32> to vector<1x128xf32>
    %74 = vector.shape_cast %73 : vector<1x128xf32> to vector<1x128x1xf32>
    %75 = vector.broadcast %74 : vector<1x128x1xf32> to vector<1x128x128xf32>
    %76 = arith.subf %72, %75 : vector<1x128x128xf32>
    %77 = math.exp %76 : vector<1x128x128xf32>
    %cst_40 = arith.constant dense<0.000000e+00> : vector<1x128xf32>
    %78 = vector.multi_reduction <add>, %77, %cst_40 [2] : vector<1x128x128xf32> to vector<1x128xf32>
    %79 = vector.shape_cast %78 : vector<1x128xf32> to vector<1x128x1xf32>
    %80 = tpu.reciprocal %79 {approx = true} : vector<1x128x1xf32> -> vector<1x128x1xf32>
    %81 = vector.broadcast %80 : vector<1x128x1xf32> to vector<1x128x128xf32>
    %82 = arith.mulf %77, %81 : vector<1x128x128xf32>
    %c0_41 = arith.constant 0 : index
    %c0_42 = arith.constant 0 : index
    %c0_43 = arith.constant 0 : index
    %83 = vector.load %arg10[%c0_41, %c0_42, %c0_43] : memref<1x128x128xf32, #tpu.memory_space<vmem>>, vector<1x128x128xf32>
    %84 = arith.addf %83, %82 : vector<1x128x128xf32>
    %c0_44 = arith.constant 0 : index
    %c0_45 = arith.constant 0 : index
    %c0_46 = arith.constant 0 : index
    %85 = vector.load %arg10[%c0_44, %c0_45, %c0_46] : memref<1x128x128xf32, #tpu.memory_space<vmem>>, vector<1x128x128xf32>
    tpu.vector_store %arg10[%c0_44, %c0_45, %c0_46], %84 {strides = array<i32>} : memref<1x128x128xf32, #tpu.memory_space<vmem>>, vector<1x128x128xf32>,
    %86 = arith.mulf %82, %14 : vector<1x128x128xf32>
    %cst_47 = arith.constant dense<0.000000e+00> : vector<1x128xf32>
    %87 = vector.multi_reduction <add>, %86, %cst_47 [1] : vector<1x128x128xf32> to vector<1x128xf32>
    %88 = vector.shape_cast %87 : vector<1x128xf32> to vector<1x1x128xf32>
    %89 = arith.truncf %88 : vector<1x1x128xf32> to vector<1x1x128xbf16>
    "tpu.trace_start"() <{level = 10 : i32, message = "bzt,btd->bzd"}> : () -> ()
    %cst_48 = arith.constant dense<0.000000e+00> : vector<1x1x4xf32>
    %90 = tpu.matmul %89, %70, %cst_48 {dimension_numbers = #tpu.dot_dimension_numbers<[2], [1], [1], [2], [0, 0, 0, 1, 1, 2], [0], [0]>} : vector<1x1x128xbf16>, vector<1x128x4xbf16>, vector<1x1x4xf32> -> vector<1x1x4xf32>
    "tpu.trace_stop"() : () -> ()
    %c2 = arith.constant 2 : index
    %c0_49 = arith.constant 0 : index
    %c0_50 = arith.constant 0 : index
    %91 = vector.load %arg6[%c2, %c0_49, %c0_50] : memref<8x4x5xf32, #tpu.memory_space<vmem>>, vector<1x4x5xf32>
    %92 = vector.shape_cast %91 : vector<1x4x5xf32> to vector<4x5xf32>
    "tpu.trace_start"() <{level = 10 : i32, message = "bzd,dc->bzc"}> : () -> ()
    %cst_51 = arith.constant dense<0.000000e+00> : vector<1x1x5xf32>
    %93 = tpu.matmul %90, %92, %cst_51 {dimension_numbers = #tpu.dot_dimension_numbers<[2], [0], [0, 1], [1], [0, 0, 0, 1, 1, 1], [], []>} : vector<1x1x4xf32>, vector<4x5xf32>, vector<1x1x5xf32> -> vector<1x1x5xf32>
    "tpu.trace_stop"() : () -> ()
    %94 = arith.addf %67, %93 : vector<1x1x5xf32>
    %95 = vector.extract_strided_slice %7 {offsets = [0, 0, 12], sizes = [1, 128, 4], strides = [1, 1, 1]} : vector<1x128x96xbf16> to vector<1x128x4xbf16>
    %96 = vector.extract_strided_slice %7 {offsets = [0, 0, 44], sizes = [1, 128, 4], strides = [1, 1, 1]} : vector<1x128x96xbf16> to vector<1x128x4xbf16>
    %97 = vector.extract_strided_slice %7 {offsets = [0, 0, 76], sizes = [1, 128, 4], strides = [1, 1, 1]} : vector<1x128x96xbf16> to vector<1x128x4xbf16>
    "tpu.trace_start"() <{level = 10 : i32, message = "bsd,btd->bst"}> : () -> ()
    %cst_52 = arith.constant dense<0.000000e+00> : vector<1x128x128xf32>
    %98 = tpu.matmul %95, %96, %cst_52 {dimension_numbers = #tpu.dot_dimension_numbers<[2], [2], [1], [1], [0, 0, 0, 1, 1, 1], [0], [0]>} : vector<1x128x4xbf16>, vector<1x128x4xbf16>, vector<1x128x128xf32> -> vector<1x128x128xf32>
    "tpu.trace_stop"() : () -> ()
    %99 = arith.addf %98, %10 : vector<1x128x128xf32>
    %cst_53 = arith.constant dense<0xFF800000> : vector<1x128xf32>
    %100 = vector.multi_reduction <maximumf>, %99, %cst_53 [2] : vector<1x128x128xf32> to vector<1x128xf32>
    %101 = vector.shape_cast %100 : vector<1x128xf32> to vector<1x128x1xf32>
    %102 = vector.broadcast %101 : vector<1x128x1xf32> to vector<1x128x128xf32>
    %103 = arith.subf %99, %102 : vector<1x128x128xf32>
    %104 = math.exp %103 : vector<1x128x128xf32>
    %cst_54 = arith.constant dense<0.000000e+00> : vector<1x128xf32>
    %105 = vector.multi_reduction <add>, %104, %cst_54 [2] : vector<1x128x128xf32> to vector<1x128xf32>
    %106 = vector.shape_cast %105 : vector<1x128xf32> to vector<1x128x1xf32>
    %107 = tpu.reciprocal %106 {approx = true} : vector<1x128x1xf32> -> vector<1x128x1xf32>
    %108 = vector.broadcast %107 : vector<1x128x1xf32> to vector<1x128x128xf32>
    %109 = arith.mulf %104, %108 : vector<1x128x128xf32>
    %c0_55 = arith.constant 0 : index
    %c0_56 = arith.constant 0 : index
    %c0_57 = arith.constant 0 : index
    %110 = vector.load %arg10[%c0_55, %c0_56, %c0_57] : memref<1x128x128xf32, #tpu.memory_space<vmem>>, vector<1x128x128xf32>
    %111 = arith.addf %110, %109 : vector<1x128x128xf32>
    %c0_58 = arith.constant 0 : index
    %c0_59 = arith.constant 0 : index
    %c0_60 = arith.constant 0 : index
    %112 = vector.load %arg10[%c0_58, %c0_59, %c0_60] : memref<1x128x128xf32, #tpu.memory_space<vmem>>, vector<1x128x128xf32>
    tpu.vector_store %arg10[%c0_58, %c0_59, %c0_60], %111 {strides = array<i32>} : memref<1x128x128xf32, #tpu.memory_space<vmem>>, vector<1x128x128xf32>,
    %113 = arith.mulf %109, %14 : vector<1x128x128xf32>
    %cst_61 = arith.constant dense<0.000000e+00> : vector<1x128xf32>
    %114 = vector.multi_reduction <add>, %113, %cst_61 [1] : vector<1x128x128xf32> to vector<1x128xf32>
    %115 = vector.shape_cast %114 : vector<1x128xf32> to vector<1x1x128xf32>
    %116 = arith.truncf %115 : vector<1x1x128xf32> to vector<1x1x128xbf16>
    "tpu.trace_start"() <{level = 10 : i32, message = "bzt,btd->bzd"}> : () -> ()
    %cst_62 = arith.constant dense<0.000000e+00> : vector<1x1x4xf32>
    %117 = tpu.matmul %116, %97, %cst_62 {dimension_numbers = #tpu.dot_dimension_numbers<[2], [1], [1], [2], [0, 0, 0, 1, 1, 2], [0], [0]>} : vector<1x1x128xbf16>, vector<1x128x4xbf16>, vector<1x1x4xf32> -> vector<1x1x4xf32>
    "tpu.trace_stop"() : () -> ()
    %c3 = arith.constant 3 : index
    %c0_63 = arith.constant 0 : index
    %c0_64 = arith.constant 0 : index
    %118 = vector.load %arg6[%c3, %c0_63, %c0_64] : memref<8x4x5xf32, #tpu.memory_space<vmem>>, vector<1x4x5xf32>
    %119 = vector.shape_cast %118 : vector<1x4x5xf32> to vector<4x5xf32>
    "tpu.trace_start"() <{level = 10 : i32, message = "bzd,dc->bzc"}> : () -> ()
    %cst_65 = arith.constant dense<0.000000e+00> : vector<1x1x5xf32>
    %120 = tpu.matmul %117, %119, %cst_65 {dimension_numbers = #tpu.dot_dimension_numbers<[2], [0], [0, 1], [1], [0, 0, 0, 1, 1, 1], [], []>} : vector<1x1x4xf32>, vector<4x5xf32>, vector<1x1x5xf32> -> vector<1x1x5xf32>
    "tpu.trace_stop"() : () -> ()
    %121 = arith.addf %94, %120 : vector<1x1x5xf32>
    %122 = vector.extract_strided_slice %7 {offsets = [0, 0, 16], sizes = [1, 128, 4], strides = [1, 1, 1]} : vector<1x128x96xbf16> to vector<1x128x4xbf16>
    %123 = vector.extract_strided_slice %7 {offsets = [0, 0, 48], sizes = [1, 128, 4], strides = [1, 1, 1]} : vector<1x128x96xbf16> to vector<1x128x4xbf16>
    %124 = vector.extract_strided_slice %7 {offsets = [0, 0, 80], sizes = [1, 128, 4], strides = [1, 1, 1]} : vector<1x128x96xbf16> to vector<1x128x4xbf16>
    "tpu.trace_start"() <{level = 10 : i32, message = "bsd,btd->bst"}> : () -> ()
    %cst_66 = arith.constant dense<0.000000e+00> : vector<1x128x128xf32>
    %125 = tpu.matmul %122, %123, %cst_66 {dimension_numbers = #tpu.dot_dimension_numbers<[2], [2], [1], [1], [0, 0, 0, 1, 1, 1], [0], [0]>} : vector<1x128x4xbf16>, vector<1x128x4xbf16>, vector<1x128x128xf32> -> vector<1x128x128xf32>
    "tpu.trace_stop"() : () -> ()
    %126 = arith.addf %125, %10 : vector<1x128x128xf32>
    %cst_67 = arith.constant dense<0xFF800000> : vector<1x128xf32>
    %127 = vector.multi_reduction <maximumf>, %126, %cst_67 [2] : vector<1x128x128xf32> to vector<1x128xf32>
    %128 = vector.shape_cast %127 : vector<1x128xf32> to vector<1x128x1xf32>
    %129 = vector.broadcast %128 : vector<1x128x1xf32> to vector<1x128x128xf32>
    %130 = arith.subf %126, %129 : vector<1x128x128xf32>
    %131 = math.exp %130 : vector<1x128x128xf32>
    %cst_68 = arith.constant dense<0.000000e+00> : vector<1x128xf32>
    %132 = vector.multi_reduction <add>, %131, %cst_68 [2] : vector<1x128x128xf32> to vector<1x128xf32>
    %133 = vector.shape_cast %132 : vector<1x128xf32> to vector<1x128x1xf32>
    %134 = tpu.reciprocal %133 {approx = true} : vector<1x128x1xf32> -> vector<1x128x1xf32>
    %135 = vector.broadcast %134 : vector<1x128x1xf32> to vector<1x128x128xf32>
    %136 = arith.mulf %131, %135 : vector<1x128x128xf32>
    %c0_69 = arith.constant 0 : index
    %c0_70 = arith.constant 0 : index
    %c0_71 = arith.constant 0 : index
    %137 = vector.load %arg10[%c0_69, %c0_70, %c0_71] : memref<1x128x128xf32, #tpu.memory_space<vmem>>, vector<1x128x128xf32>
    %138 = arith.addf %137, %136 : vector<1x128x128xf32>
    %c0_72 = arith.constant 0 : index
    %c0_73 = arith.constant 0 : index
    %c0_74 = arith.constant 0 : index
    %139 = vector.load %arg10[%c0_72, %c0_73, %c0_74] : memref<1x128x128xf32, #tpu.memory_space<vmem>>, vector<1x128x128xf32>
    tpu.vector_store %arg10[%c0_72, %c0_73, %c0_74], %138 {strides = array<i32>} : memref<1x128x128xf32, #tpu.memory_space<vmem>>, vector<1x128x128xf32>,
    %140 = arith.mulf %136, %14 : vector<1x128x128xf32>
    %cst_75 = arith.constant dense<0.000000e+00> : vector<1x128xf32>
    %141 = vector.multi_reduction <add>, %140, %cst_75 [1] : vector<1x128x128xf32> to vector<1x128xf32>
    %142 = vector.shape_cast %141 : vector<1x128xf32> to vector<1x1x128xf32>
    %143 = arith.truncf %142 : vector<1x1x128xf32> to vector<1x1x128xbf16>
    "tpu.trace_start"() <{level = 10 : i32, message = "bzt,btd->bzd"}> : () -> ()
    %cst_76 = arith.constant dense<0.000000e+00> : vector<1x1x4xf32>
    %144 = tpu.matmul %143, %124, %cst_76 {dimension_numbers = #tpu.dot_dimension_numbers<[2], [1], [1], [2], [0, 0, 0, 1, 1, 2], [0], [0]>} : vector<1x1x128xbf16>, vector<1x128x4xbf16>, vector<1x1x4xf32> -> vector<1x1x4xf32>
    "tpu.trace_stop"() : () -> ()
    %c4 = arith.constant 4 : index
    %c0_77 = arith.constant 0 : index
    %c0_78 = arith.constant 0 : index
    %145 = vector.load %arg6[%c4, %c0_77, %c0_78] : memref<8x4x5xf32, #tpu.memory_space<vmem>>, vector<1x4x5xf32>
    %146 = vector.shape_cast %145 : vector<1x4x5xf32> to vector<4x5xf32>
    "tpu.trace_start"() <{level = 10 : i32, message = "bzd,dc->bzc"}> : () -> ()
    %cst_79 = arith.constant dense<0.000000e+00> : vector<1x1x5xf32>
    %147 = tpu.matmul %144, %146, %cst_79 {dimension_numbers = #tpu.dot_dimension_numbers<[2], [0], [0, 1], [1], [0, 0, 0, 1, 1, 1], [], []>} : vector<1x1x4xf32>, vector<4x5xf32>, vector<1x1x5xf32> -> vector<1x1x5xf32>
    "tpu.trace_stop"() : () -> ()
    %148 = arith.addf %121, %147 : vector<1x1x5xf32>
    %149 = vector.extract_strided_slice %7 {offsets = [0, 0, 20], sizes = [1, 128, 4], strides = [1, 1, 1]} : vector<1x128x96xbf16> to vector<1x128x4xbf16>
    %150 = vector.extract_strided_slice %7 {offsets = [0, 0, 52], sizes = [1, 128, 4], strides = [1, 1, 1]} : vector<1x128x96xbf16> to vector<1x128x4xbf16>
    %151 = vector.extract_strided_slice %7 {offsets = [0, 0, 84], sizes = [1, 128, 4], strides = [1, 1, 1]} : vector<1x128x96xbf16> to vector<1x128x4xbf16>
    "tpu.trace_start"() <{level = 10 : i32, message = "bsd,btd->bst"}> : () -> ()
    %cst_80 = arith.constant dense<0.000000e+00> : vector<1x128x128xf32>
    %152 = tpu.matmul %149, %150, %cst_80 {dimension_numbers = #tpu.dot_dimension_numbers<[2], [2], [1], [1], [0, 0, 0, 1, 1, 1], [0], [0]>} : vector<1x128x4xbf16>, vector<1x128x4xbf16>, vector<1x128x128xf32> -> vector<1x128x128xf32>
    "tpu.trace_stop"() : () -> ()
    %153 = arith.addf %152, %10 : vector<1x128x128xf32>
    %cst_81 = arith.constant dense<0xFF800000> : vector<1x128xf32>
    %154 = vector.multi_reduction <maximumf>, %153, %cst_81 [2] : vector<1x128x128xf32> to vector<1x128xf32>
    %155 = vector.shape_cast %154 : vector<1x128xf32> to vector<1x128x1xf32>
    %156 = vector.broadcast %155 : vector<1x128x1xf32> to vector<1x128x128xf32>
    %157 = arith.subf %153, %156 : vector<1x128x128xf32>
    %158 = math.exp %157 : vector<1x128x128xf32>
    %cst_82 = arith.constant dense<0.000000e+00> : vector<1x128xf32>
    %159 = vector.multi_reduction <add>, %158, %cst_82 [2] : vector<1x128x128xf32> to vector<1x128xf32>
    %160 = vector.shape_cast %159 : vector<1x128xf32> to vector<1x128x1xf32>
    %161 = tpu.reciprocal %160 {approx = true} : vector<1x128x1xf32> -> vector<1x128x1xf32>
    %162 = vector.broadcast %161 : vector<1x128x1xf32> to vector<1x128x128xf32>
    %163 = arith.mulf %158, %162 : vector<1x128x128xf32>
    %c0_83 = arith.constant 0 : index
    %c0_84 = arith.constant 0 : index
    %c0_85 = arith.constant 0 : index
    %164 = vector.load %arg10[%c0_83, %c0_84, %c0_85] : memref<1x128x128xf32, #tpu.memory_space<vmem>>, vector<1x128x128xf32>
    %165 = arith.addf %164, %163 : vector<1x128x128xf32>
    %c0_86 = arith.constant 0 : index
    %c0_87 = arith.constant 0 : index
    %c0_88 = arith.constant 0 : index
    %166 = vector.load %arg10[%c0_86, %c0_87, %c0_88] : memref<1x128x128xf32, #tpu.memory_space<vmem>>, vector<1x128x128xf32>
    tpu.vector_store %arg10[%c0_86, %c0_87, %c0_88], %165 {strides = array<i32>} : memref<1x128x128xf32, #tpu.memory_space<vmem>>, vector<1x128x128xf32>,
    %167 = arith.mulf %163, %14 : vector<1x128x128xf32>
    %cst_89 = arith.constant dense<0.000000e+00> : vector<1x128xf32>
    %168 = vector.multi_reduction <add>, %167, %cst_89 [1] : vector<1x128x128xf32> to vector<1x128xf32>
    %169 = vector.shape_cast %168 : vector<1x128xf32> to vector<1x1x128xf32>
    %170 = arith.truncf %169 : vector<1x1x128xf32> to vector<1x1x128xbf16>
    "tpu.trace_start"() <{level = 10 : i32, message = "bzt,btd->bzd"}> : () -> ()
    %cst_90 = arith.constant dense<0.000000e+00> : vector<1x1x4xf32>
    %171 = tpu.matmul %170, %151, %cst_90 {dimension_numbers = #tpu.dot_dimension_numbers<[2], [1], [1], [2], [0, 0, 0, 1, 1, 2], [0], [0]>} : vector<1x1x128xbf16>, vector<1x128x4xbf16>, vector<1x1x4xf32> -> vector<1x1x4xf32>
    "tpu.trace_stop"() : () -> ()
    %c5 = arith.constant 5 : index
    %c0_91 = arith.constant 0 : index
    %c0_92 = arith.constant 0 : index
    %172 = vector.load %arg6[%c5, %c0_91, %c0_92] : memref<8x4x5xf32, #tpu.memory_space<vmem>>, vector<1x4x5xf32>
    %173 = vector.shape_cast %172 : vector<1x4x5xf32> to vector<4x5xf32>
    "tpu.trace_start"() <{level = 10 : i32, message = "bzd,dc->bzc"}> : () -> ()
    %cst_93 = arith.constant dense<0.000000e+00> : vector<1x1x5xf32>
    %174 = tpu.matmul %171, %173, %cst_93 {dimension_numbers = #tpu.dot_dimension_numbers<[2], [0], [0, 1], [1], [0, 0, 0, 1, 1, 1], [], []>} : vector<1x1x4xf32>, vector<4x5xf32>, vector<1x1x5xf32> -> vector<1x1x5xf32>
    "tpu.trace_stop"() : () -> ()
    %175 = arith.addf %148, %174 : vector<1x1x5xf32>
    %176 = vector.extract_strided_slice %7 {offsets = [0, 0, 24], sizes = [1, 128, 4], strides = [1, 1, 1]} : vector<1x128x96xbf16> to vector<1x128x4xbf16>
    %177 = vector.extract_strided_slice %7 {offsets = [0, 0, 56], sizes = [1, 128, 4], strides = [1, 1, 1]} : vector<1x128x96xbf16> to vector<1x128x4xbf16>
    %178 = vector.extract_strided_slice %7 {offsets = [0, 0, 88], sizes = [1, 128, 4], strides = [1, 1, 1]} : vector<1x128x96xbf16> to vector<1x128x4xbf16>
    "tpu.trace_start"() <{level = 10 : i32, message = "bsd,btd->bst"}> : () -> ()
    %cst_94 = arith.constant dense<0.000000e+00> : vector<1x128x128xf32>
    %179 = tpu.matmul %176, %177, %cst_94 {dimension_numbers = #tpu.dot_dimension_numbers<[2], [2], [1], [1], [0, 0, 0, 1, 1, 1], [0], [0]>} : vector<1x128x4xbf16>, vector<1x128x4xbf16>, vector<1x128x128xf32> -> vector<1x128x128xf32>
    "tpu.trace_stop"() : () -> ()
    %180 = arith.addf %179, %10 : vector<1x128x128xf32>
    %cst_95 = arith.constant dense<0xFF800000> : vector<1x128xf32>
    %181 = vector.multi_reduction <maximumf>, %180, %cst_95 [2] : vector<1x128x128xf32> to vector<1x128xf32>
    %182 = vector.shape_cast %181 : vector<1x128xf32> to vector<1x128x1xf32>
    %183 = vector.broadcast %182 : vector<1x128x1xf32> to vector<1x128x128xf32>
    %184 = arith.subf %180, %183 : vector<1x128x128xf32>
    %185 = math.exp %184 : vector<1x128x128xf32>
    %cst_96 = arith.constant dense<0.000000e+00> : vector<1x128xf32>
    %186 = vector.multi_reduction <add>, %185, %cst_96 [2] : vector<1x128x128xf32> to vector<1x128xf32>
    %187 = vector.shape_cast %186 : vector<1x128xf32> to vector<1x128x1xf32>
    %188 = tpu.reciprocal %187 {approx = true} : vector<1x128x1xf32> -> vector<1x128x1xf32>
    %189 = vector.broadcast %188 : vector<1x128x1xf32> to vector<1x128x128xf32>
    %190 = arith.mulf %185, %189 : vector<1x128x128xf32>
    %c0_97 = arith.constant 0 : index
    %c0_98 = arith.constant 0 : index
    %c0_99 = arith.constant 0 : index
    %191 = vector.load %arg10[%c0_97, %c0_98, %c0_99] : memref<1x128x128xf32, #tpu.memory_space<vmem>>, vector<1x128x128xf32>
    %192 = arith.addf %191, %190 : vector<1x128x128xf32>
    %c0_100 = arith.constant 0 : index
    %c0_101 = arith.constant 0 : index
    %c0_102 = arith.constant 0 : index
    %193 = vector.load %arg10[%c0_100, %c0_101, %c0_102] : memref<1x128x128xf32, #tpu.memory_space<vmem>>, vector<1x128x128xf32>
    tpu.vector_store %arg10[%c0_100, %c0_101, %c0_102], %192 {strides = array<i32>} : memref<1x128x128xf32, #tpu.memory_space<vmem>>, vector<1x128x128xf32>,
    %194 = arith.mulf %190, %14 : vector<1x128x128xf32>
    %cst_103 = arith.constant dense<0.000000e+00> : vector<1x128xf32>
    %195 = vector.multi_reduction <add>, %194, %cst_103 [1] : vector<1x128x128xf32> to vector<1x128xf32>
    %196 = vector.shape_cast %195 : vector<1x128xf32> to vector<1x1x128xf32>
    %197 = arith.truncf %196 : vector<1x1x128xf32> to vector<1x1x128xbf16>
    "tpu.trace_start"() <{level = 10 : i32, message = "bzt,btd->bzd"}> : () -> ()
    %cst_104 = arith.constant dense<0.000000e+00> : vector<1x1x4xf32>
    %198 = tpu.matmul %197, %178, %cst_104 {dimension_numbers = #tpu.dot_dimension_numbers<[2], [1], [1], [2], [0, 0, 0, 1, 1, 2], [0], [0]>} : vector<1x1x128xbf16>, vector<1x128x4xbf16>, vector<1x1x4xf32> -> vector<1x1x4xf32>
    "tpu.trace_stop"() : () -> ()
    %c6 = arith.constant 6 : index
    %c0_105 = arith.constant 0 : index
    %c0_106 = arith.constant 0 : index
    %199 = vector.load %arg6[%c6, %c0_105, %c0_106] : memref<8x4x5xf32, #tpu.memory_space<vmem>>, vector<1x4x5xf32>
    %200 = vector.shape_cast %199 : vector<1x4x5xf32> to vector<4x5xf32>
    "tpu.trace_start"() <{level = 10 : i32, message = "bzd,dc->bzc"}> : () -> ()
    %cst_107 = arith.constant dense<0.000000e+00> : vector<1x1x5xf32>
    %201 = tpu.matmul %198, %200, %cst_107 {dimension_numbers = #tpu.dot_dimension_numbers<[2], [0], [0, 1], [1], [0, 0, 0, 1, 1, 1], [], []>} : vector<1x1x4xf32>, vector<4x5xf32>, vector<1x1x5xf32> -> vector<1x1x5xf32>
    "tpu.trace_stop"() : () -> ()
    %202 = arith.addf %175, %201 : vector<1x1x5xf32>
    %203 = vector.extract_strided_slice %7 {offsets = [0, 0, 28], sizes = [1, 128, 4], strides = [1, 1, 1]} : vector<1x128x96xbf16> to vector<1x128x4xbf16>
    %204 = vector.extract_strided_slice %7 {offsets = [0, 0, 60], sizes = [1, 128, 4], strides = [1, 1, 1]} : vector<1x128x96xbf16> to vector<1x128x4xbf16>
    %205 = vector.extract_strided_slice %7 {offsets = [0, 0, 92], sizes = [1, 128, 4], strides = [1, 1, 1]} : vector<1x128x96xbf16> to vector<1x128x4xbf16>
    "tpu.trace_start"() <{level = 10 : i32, message = "bsd,btd->bst"}> : () -> ()
    %cst_108 = arith.constant dense<0.000000e+00> : vector<1x128x128xf32>
    %206 = tpu.matmul %203, %204, %cst_108 {dimension_numbers = #tpu.dot_dimension_numbers<[2], [2], [1], [1], [0, 0, 0, 1, 1, 1], [0], [0]>} : vector<1x128x4xbf16>, vector<1x128x4xbf16>, vector<1x128x128xf32> -> vector<1x128x128xf32>
    "tpu.trace_stop"() : () -> ()
    %207 = arith.addf %206, %10 : vector<1x128x128xf32>
    %cst_109 = arith.constant dense<0xFF800000> : vector<1x128xf32>
    %208 = vector.multi_reduction <maximumf>, %207, %cst_109 [2] : vector<1x128x128xf32> to vector<1x128xf32>
    %209 = vector.shape_cast %208 : vector<1x128xf32> to vector<1x128x1xf32>
    %210 = vector.broadcast %209 : vector<1x128x1xf32> to vector<1x128x128xf32>
    %211 = arith.subf %207, %210 : vector<1x128x128xf32>
    %212 = math.exp %211 : vector<1x128x128xf32>
    %cst_110 = arith.constant dense<0.000000e+00> : vector<1x128xf32>
    %213 = vector.multi_reduction <add>, %212, %cst_110 [2] : vector<1x128x128xf32> to vector<1x128xf32>
    %214 = vector.shape_cast %213 : vector<1x128xf32> to vector<1x128x1xf32>
    %215 = tpu.reciprocal %214 {approx = true} : vector<1x128x1xf32> -> vector<1x128x1xf32>
    %216 = vector.broadcast %215 : vector<1x128x1xf32> to vector<1x128x128xf32>
    %217 = arith.mulf %212, %216 : vector<1x128x128xf32>
    %c0_111 = arith.constant 0 : index
    %c0_112 = arith.constant 0 : index
    %c0_113 = arith.constant 0 : index
    %218 = vector.load %arg10[%c0_111, %c0_112, %c0_113] : memref<1x128x128xf32, #tpu.memory_space<vmem>>, vector<1x128x128xf32>
    %219 = arith.addf %218, %217 : vector<1x128x128xf32>
    %cst_114 = arith.constant 1.250000e-01 : f32
    %220 = vector.broadcast %cst_114 : f32 to vector<1x128x128xf32>
    %221 = arith.mulf %219, %220 : vector<1x128x128xf32>
    %c0_115 = arith.constant 0 : index
    %c0_116 = arith.constant 0 : index
    %c0_117 = arith.constant 0 : index
    %222 = vector.load %arg10[%c0_115, %c0_116, %c0_117] : memref<1x128x128xf32, #tpu.memory_space<vmem>>, vector<1x128x128xf32>
    tpu.vector_store %arg10[%c0_115, %c0_116, %c0_117], %221 {strides = array<i32>} : memref<1x128x128xf32, #tpu.memory_space<vmem>>, vector<1x128x128xf32>,
    %223 = arith.mulf %217, %14 : vector<1x128x128xf32>
    %cst_118 = arith.constant dense<0.000000e+00> : vector<1x128xf32>
    %224 = vector.multi_reduction <add>, %223, %cst_118 [1] : vector<1x128x128xf32> to vector<1x128xf32>
    %225 = vector.shape_cast %224 : vector<1x128xf32> to vector<1x1x128xf32>
    %226 = arith.truncf %225 : vector<1x1x128xf32> to vector<1x1x128xbf16>
    "tpu.trace_start"() <{level = 10 : i32, message = "bzt,btd->bzd"}> : () -> ()
    %cst_119 = arith.constant dense<0.000000e+00> : vector<1x1x4xf32>
    %227 = tpu.matmul %226, %205, %cst_119 {dimension_numbers = #tpu.dot_dimension_numbers<[2], [1], [1], [2], [0, 0, 0, 1, 1, 2], [0], [0]>} : vector<1x1x128xbf16>, vector<1x128x4xbf16>, vector<1x1x4xf32> -> vector<1x1x4xf32>
    "tpu.trace_stop"() : () -> ()
    %c7 = arith.constant 7 : index
    %c0_120 = arith.constant 0 : index
    %c0_121 = arith.constant 0 : index
    %228 = vector.load %arg6[%c7, %c0_120, %c0_121] : memref<8x4x5xf32, #tpu.memory_space<vmem>>, vector<1x4x5xf32>
    %229 = vector.shape_cast %228 : vector<1x4x5xf32> to vector<4x5xf32>
    "tpu.trace_start"() <{level = 10 : i32, message = "bzd,dc->bzc"}> : () -> ()
    %cst_122 = arith.constant dense<0.000000e+00> : vector<1x1x5xf32>
    %230 = tpu.matmul %227, %229, %cst_122 {dimension_numbers = #tpu.dot_dimension_numbers<[2], [0], [0, 1], [1], [0, 0, 0, 1, 1, 1], [], []>} : vector<1x1x4xf32>, vector<4x5xf32>, vector<1x1x5xf32> -> vector<1x1x5xf32>
    "tpu.trace_stop"() : () -> ()
    %231 = arith.addf %202, %230 : vector<1x1x5xf32>
    %c0_123 = arith.constant 0 : index
    %c0_124 = arith.constant 0 : index
    %232 = vector.load %arg7[%c0_123, %c0_124] : memref<1x5xf32, #tpu.memory_space<vmem>>, vector<1x5xf32>
    %233 = vector.shape_cast %232 : vector<1x5xf32> to vector<1x1x5xf32>
    %234 = arith.addf %231, %233 : vector<1x1x5xf32>
    %c0_125 = arith.constant 0 : index
    %c0_126 = arith.constant 0 : index
    %c0_127 = arith.constant 0 : index
    %235 = vector.load %arg8[%c0_125, %c0_126, %c0_127] : memref<1x1x5xf32, #tpu.memory_space<vmem>>, vector<1x1x5xf32>
    tpu.vector_store %arg8[%c0_125, %c0_126, %c0_127], %234 {strides = array<i32>} : memref<1x1x5xf32, #tpu.memory_space<vmem>>, vector<1x1x5xf32>,
    %cst_128 = arith.constant dense<0xFF800000> : vector<1x1xf32>
    %236 = vector.multi_reduction <maximumf>, %234, %cst_128 [2] : vector<1x1x5xf32> to vector<1x1xf32>
    %237 = vector.shape_cast %236 : vector<1x1xf32> to vector<1x1x1xf32>
    %238 = vector.broadcast %237 : vector<1x1x1xf32> to vector<1x1x5xf32>
    %239 = arith.subf %234, %238 : vector<1x1x5xf32>
    %240 = math.exp %239 : vector<1x1x5xf32>
    %cst_129 = arith.constant dense<0.000000e+00> : vector<1x1xf32>
    %241 = vector.multi_reduction <add>, %240, %cst_129 [2] : vector<1x1x5xf32> to vector<1x1xf32>
    %242 = vector.shape_cast %241 : vector<1x1xf32> to vector<1x1x1xf32>
    %243 = vector.broadcast %242 : vector<1x1x1xf32> to vector<1x1x5xf32>
    %244 = arith.divf %240, %243 : vector<1x1x5xf32>
    %c0_130 = arith.constant 0 : index
    %c0_131 = arith.constant 0 : index
    %c0_132 = arith.constant 0 : index
    %245 = vector.load %arg9[%c0_130, %c0_131, %c0_132] : memref<1x1x5xf32, #tpu.memory_space<vmem>>, vector<1x1x5xf32>
    tpu.vector_store %arg9[%c0_130, %c0_131, %c0_132], %244 {strides = array<i32>} : memref<1x1x5xf32, #tpu.memory_space<vmem>>, vector<1x1x5xf32>,
    return
  }
  func.func @transform_0(%arg0: i32) -> (i32, i32, i32) {
    %c0_i32 = arith.constant 0 : i32
    %c0_i32_0 = arith.constant 0 : i32
    %c0_i32_1 = arith.constant 0 : i32
    return %arg0, %c0_i32, %c0_i32_0 : i32, i32, i32
  }
  func.func @transform_1(%arg0: i32) -> (i32, i32) {
    %c0_i32 = arith.constant 0 : i32
    %c0_i32_0 = arith.constant 0 : i32
    %c0_i32_1 = arith.constant 0 : i32
    return %c0_i32, %c0_i32_0 : i32, i32
  }
  func.func @transform_2(%arg0: i32) -> (i32, i32, i32) {
    %c0_i32 = arith.constant 0 : i32
    %c0_i32_0 = arith.constant 0 : i32
    %c0_i32_1 = arith.constant 0 : i32
    return %arg0, %c0_i32, %c0_i32_0 : i32, i32, i32
  }
  func.func @transform_3(%arg0: i32) -> (i32, i32) {
    %c0_i32 = arith.constant 0 : i32
    %c0_i32_0 = arith.constant 0 : i32
    %c0_i32_1 = arith.constant 0 : i32
    return %c0_i32, %c0_i32_0 : i32, i32
  }
  func.func @transform_4(%arg0: i32) -> (i32, i32) {
    %c0_i32 = arith.constant 0 : i32
    %c0_i32_0 = arith.constant 0 : i32
    %c0_i32_1 = arith.constant 0 : i32
    return %c0_i32, %c0_i32_0 : i32, i32
  }
  func.func @transform_5(%arg0: i32) -> (i32, i32, i32) {
    %c0_i32 = arith.constant 0 : i32
    %c0_i32_0 = arith.constant 0 : i32
    %c0_i32_1 = arith.constant 0 : i32
    %c0_i32_2 = arith.constant 0 : i32
    return %c0_i32, %c0_i32_0, %c0_i32_1 : i32, i32, i32
  }
  func.func @transform_6(%arg0: i32) -> (i32, i32) {
    %c0_i32 = arith.constant 0 : i32
    %c0_i32_0 = arith.constant 0 : i32
    %c0_i32_1 = arith.constant 0 : i32
    return %c0_i32, %c0_i32_0 : i32, i32
  }
  func.func @transform_7(%arg0: i32) -> (i32, i32, i32) {
    %c0_i32 = arith.constant 0 : i32
    %c0_i32_0 = arith.constant 0 : i32
    %c0_i32_1 = arith.constant 0 : i32
    return %arg0, %c0_i32, %c0_i32_0 : i32, i32, i32
  }
  func.func @transform_8(%arg0: i32) -> (i32, i32, i32) {
    %c0_i32 = arith.constant 0 : i32
    %c0_i32_0 = arith.constant 0 : i32
    %c0_i32_1 = arith.constant 0 : i32
    return %arg0, %c0_i32, %c0_i32_0 : i32, i32, i32
  }
  func.func @transform_9(%arg0: i32) -> (i32, i32, i32) {
    %c0_i32 = arith.constant 0 : i32
    %c0_i32_0 = arith.constant 0 : i32
    %c0_i32_1 = arith.constant 0 : i32
    return %arg0, %c0_i32, %c0_i32_0 : i32, i32, i32
  }
}

</mosaic_0001>

<bundles_post_ra>
// kernel: temporal_attention_forward.1
= control target key start
LH: loop header
LB: loop body
LE: loop exit
PB: predicated region body
PF: predicated region fallthrough
CT: control target
= control target key end

     0   :  { %15 = vsyncpa [#allocation3], 0  ;;  %s9373_s0 = inlined_call_operand.vmem [shape: bf16[2,128,32], index: 0, kind: input, shape index: {}]   ;;  %s9374_s1 = inlined_call_operand.vmem [shape: bf16[128,96], index: 1, kind: input, shape index: {}]   ;;  %s9375_s2 = inlined_call_operand.vmem [shape: f32[2,1,128], index: 2, kind: input, shape index: {}]   ;;  %s9376_s3 = inlined_call_operand.vmem [shape: f32[1,128], index: 3, kind: input, shape index: {}]   ;;  %s9377_s4 = inlined_call_operand.vmem [shape: bf16[32,96], index: 4, kind: input, shape index: {}]   ;;  %s9378_s5 = inlined_call_operand.vmem [shape: f32[8,4,5], index: 5, kind: input, shape index: {}]   ;;  %s9379_s6 = inlined_call_operand.vmem [shape: f32[1,5], index: 6, kind: input, shape index: {}]   ;;  %s9380_s7 = inlined_call_operand.hbm [shape: f32[2,1,5], index: 7, kind: output, shape index: {0}]   ;;  %s9381_s8 = inlined_call_operand.hbm [shape: f32[2,1,5], index: 8, kind: output, shape index: {1}]   ;;  %s9382_s9 = inlined_call_operand.vmem [shape: f32[2,128,128], index: 9, kind: output, shape index: {2}]  }
   0x1   :  { %17 = vsyncpa [#allocation3 + $0x1], 0 }
   0x2   :  { %18 = vsyncpa [#allocation5], 0 }
   0x3   :  { %20 = vsyncpa [#allocation5 + $0x1], 0  ;;  %s6920_s30 = smov 0   ;;  %s6922_s10 = smov 0  }
   0x4   :  { %s6924_s11 = smov 0   ;;  %s6926_s12 = smov 0  }
   0x5 LB: > { %s6941_s13 = sadd.s32 4294967295, %s6841_s12   ;;  %s5222_s14 = sadd.s32 4294967294, %s6841_s12   ;;  %s6841_s12 = sphi %s6926_s12, %s9600_s12   ;;  %s6837_s11 = sphi %s6924_s11, %s9599_s11   ;;  %s6833_s10 = sphi %s6922_s10, %s9598_s10   ;;  %s6829_s30 = sphi %s6920_s30, %s9597_s30  }
   0x6   : > { %s6945_s15 = sadd.s32 1, %s6841_s12   ;;  %s190_s16 = sadd.s32 1, %s6837_s11 }
   0x7   : > { %s187_s17 = ssub.s32 %s6841_s12, %s6945_s15  ;;  %p200_p0 = scmp.ne.s32.totalorder %s6837_s11, %s6833_s10 }
   0x8   : > { %p188_p1 = scmp.eq.s32.totalorder %s187_s17, 0  ;;  %p201_p2 = scmp.eq.s32.totalorder %s6941_s13, 1 }
   0x9   : > { %p206_p3 = scmp.ne.s32.totalorder %s6833_s10, %s6829_s30  ;;  %p207_p4 = scmp.eq.s32.totalorder %s5222_s14, 1 }
   0xa   : > { %s6956_s18 = scalar_select %p188_p1, %s6837_s11, %s190_s16  }
   0xb   : > { %p6958_p5 = por %p201_p2, %p200_p0  ;;  %p6962_p6 = por %p207_p4, %p206_p3 }
   0xc   : > { %p5225_p7 = scmp.ge.s32.totalorder %s6841_s12, 1  ;;  %p306_p8 = scmp.lt.s32.totalorder %s6841_s12, 3 }
   0xe   : > { %p307_p9 = pnand %p5225_p7, %p306_p8 }
  0x10   : > { %310 = sbr.rel (%p307_p9) target bundleno = 7363 (0x1cc3), region = 48 }
  0x17   : > { %v6217_v0 = vld [vmem:[%s9377_s4] sm:$0xff]   ;;  %p353_p10 = scmp.lt.s32.totalorder %s6941_s13, 1  ;;  %v6218_v1 = vld [vmem:[%s9377_s4 + $0x8] sm:$0xff]   ;;  %vm471_vm0 = vcmask 261120   ;;  %v5377_v19 = vld [vmem:[%s9374_s1 + $0x18] sm:$0xff]   ;;  %vm700_vm1 = vcmask 31744  }
  0x18   : > { %5608 = vmatprep.subr.bf16.mxu0 %v6217_v0  ;;  %v5375_v10 = vld [vmem:[%s9374_s1 + $0x8] sm:$0xff]   ;;  %v5344_v11 = vld [vmem:[%s9374_s1] sm:$0xff]   ;;  %v5376_v23 = vld [vmem:[%s9374_s1 + $0x10] sm:$0xff]   ;;  %v5357_v27 = vunpack.c.l.bf16 %v5377_v19  ;;  %v5358_v30 = vunpack.c.h.bf16 %v5377_v19  ;;  %s6843_s27 = smov 96   ;;  %s6846_s16 = smov 92   ;;  %vm6848_vm2 = vmmov 0  }
  0x19   : > { %s6976_s25 = scalar_select %p353_p10, %s6941_s13, 1  ;;  %5609 = vmatpush3.bf16.msra.mxu0 %v6217_v0  ;;  %v5349_v12 = vunpack.c.l.bf16 %v5375_v10  ;;  %v5350_v13 = vunpack.c.h.bf16 %v5375_v10  ;;  %v5345_v15 = vunpack.c.l.bf16 %v5344_v11  ;;  %v5346_v16 = vunpack.c.h.bf16 %v5344_v11  ;;  %v5379_v37 = vld [vmem:[%s9374_s1 + $0x28] sm:$0xff]   ;;  %v5378_v40 = vld [vmem:[%s9374_s1 + $0x20] sm:$0xff]   ;;  %v5381_v53 = vld [vmem:[%s9374_s1 + $0x38] sm:$0xff]  }
  0x1a   : > { %5610 = vmatprep.subr.bf16.mxu0 %v6218_v1  ;;  %v5353_v29 = vunpack.c.l.bf16 %v5376_v23  ;;  %v5354_v32 = vunpack.c.h.bf16 %v5376_v23  ;;  %v5365_v43 = vunpack.c.l.bf16 %v5379_v37  ;;  %v5361_v45 = vunpack.c.l.bf16 %v5378_v40  ;;  %v5380_v56 = vld [vmem:[%s9374_s1 + $0x30] sm:$0xff]   ;;  %v7051_v10 = vld [vmem:[%s9376_s3] ss:$0 sm:$0xff]  ;;  %s6847_s17 = smov 124   ;;  %s6849_s21 = smov 88  }
  0x1b   : > { %s5341_s26 = sshll.u32 %s6976_s25, 6  ;;  %v5366_v46 = vunpack.c.h.bf16 %v5379_v37  ;;  %v5362_v48 = vunpack.c.h.bf16 %v5378_v40  ;;  %v5373_v59 = vunpack.c.l.bf16 %v5381_v53  ;;  %v5369_v61 = vunpack.c.l.bf16 %v5380_v56  ;;  %s7126_s14 = scalar_lea.vmem %s9375_s2, %s6976_s25 }
  0x1c   : > { %s357_s29 = scalar_lea.vmem %s9373_s0, %s5341_s26  ;;  %v5374_v62 = vunpack.c.h.bf16 %v5381_v53  ;;  %v5370_v0 = vunpack.c.h.bf16 %v5380_v56  ;;  %v9383_v11 = vmov 0.0   ;;  %s6850_s22 = smov 120   ;;  %vm1585_vm3 = vcmask 1043456  }
  0x1d   : > { %v6219_v2 = vld [vmem:[%s357_s29] sm:$0xff]   ;;  %5611 = vmatpush3.bf16.msra.mxu0 %v6218_v1  ;;  %v6220_v3 = vld [vmem:[%s357_s29 + $0x8] sm:$0xff]   ;;  %v6221_v4 = vld [vmem:[%s357_s29 + $0x10] sm:$0xff]   ;;  %s6851_s23 = smov 60   ;;  %s6852_s24 = smov 56   ;;  %vm5053_vm4 = vcmask 32768  }
  0x1e   : > { %5612 = vmatprep.mubr.msk.bf16.mxu0 %vm471_vm0, %v6219_v2  ;;  %v6222_v5 = vld [vmem:[%s357_s29 + $0x18] sm:$0xff]   ;;  %v6223_v6 = vld [vmem:[%s357_s29 + $0x20] sm:$0xff]   ;;  %v6224_v7 = vld [vmem:[%s357_s29 + $0x28] sm:$0xff]   ;;  %5660 = vmatprep.subr.bf16.mxu0 %v9383_v11  ;;  %s6853_s28 = smov 84   ;;  %s6857_s26 = smov 112  }
  0x1f   : > { %v6225_v8 = vld [vmem:[%s357_s29 + $0x30] sm:$0xff]   ;;  %v6226_v9 = vld [vmem:[%s357_s29 + $0x38] sm:$0xff]   ;;  %s6854_s29 = smov 116  }
  0x20   : > { %5613 = vmatmul.mubr.msk.bf16.vlgmr.msra.gmra.mrb[0].mxu0 %vm471_vm0, %v6220_v3 }
  0x21   : > { %5616 = vmatprep.mubr.msk.bf16.mxu0 %vm471_vm0, %v6221_v4 }
  0x28   : > { %5617 = vmatmul.mubr.msk.bf16.gmra.mrb[4].mxu0 %vm471_vm0, %v6222_v5 }
  0x29   : > { %5620 = vmatprep.mubr.msk.bf16.mxu0 %vm471_vm0, %v6223_v6 }
  0x30   : > { %5621 = vmatmul.mubr.msk.bf16.gmra.mrb[8].mxu0 %vm471_vm0, %v6224_v7 }
  0x31   : > { %5624 = vmatprep.mubr.msk.bf16.mxu0 %vm471_vm0, %v6225_v8 }
  0x38   : > { %5625 = vmatmul.mubr.msk.bf16.gmra.mrb[12].mxu0 %vm471_vm0, %v6226_v9 }
  0x39   : > { %5676 = vmatprep.mubr.msk.bf16.mxu0 %vm6848_vm2, %v9383_v11 }
  0xf3   : > { %v5614_v14 = vpop.f32.mrb[0].mxu0 }
  0xf4   : > { %v530_v17 = vpop.f32.mrb[1].mxu0  ;;  %v539_v20 = vadd.f32 %v5614_v14, %v5349_v12 }
  0xf5   : > { %v5615_v18 = vpop.f32.mrb[2].mxu0  ;;  %v531_v24 = vadd.f32 %v5345_v15, %v530_v17 }
  0xf6   : > { %v542_v21 = vadd.f32 %v5615_v18, %v5350_v13  ;;  %v533_v22 = vpop.f32.mrb[3].mxu0 }
  0xf7   : > { %v534_v25 = vadd.f32 %v5346_v16, %v533_v22 }
  0xf8   : > { %v7002_v26 = vpack.c.bf16 %v542_v21, %v539_v20 }
  0xf9   : > { %v7004_v28 = vpack.c.bf16 %v534_v25, %v531_v24 }
  0xfb   : > { %684 = vrot.lane.b32.xlu0 %v7004_v28, %s6843_s27  ;;  %5644 = vmatprep.mubr.msk.bf16.mxu1 %vm700_vm1, %v7004_v28  ;;  %v5618_v31 = vpop.f32.mrb[4].mxu0 }
  0xfc   : > { %v555_v33 = vadd.f32 %v5618_v31, %v5357_v27  ;;  %v546_v34 = vpop.f32.mrb[5].mxu0 }
  0xfd   : > { %v547_v35 = vadd.f32 %v5353_v29, %v546_v34  ;;  %v5619_v36 = vpop.f32.mrb[6].mxu0 }
  0xfe   : > { %v558_v38 = vadd.f32 %v5619_v36, %v5358_v30  ;;  %v549_v39 = vpop.f32.mrb[7].mxu0 }
  0xff   : > { %v550_v41 = vadd.f32 %v5354_v32, %v549_v39  ;;  %686 = vrot.lane.b32.xlu0 %v7002_v26, %s6843_s27 }
 0x100   : > { %v7018_v42 = vpack.c.bf16 %v558_v38, %v555_v33 }
 0x101   : > { %v7020_v44 = vpack.c.bf16 %v550_v41, %v547_v35  ;;  %v7129_v41 = vld [vmem:[%s7126_s14] ss:$0 sm:$0xff] }
 0x103   : > { %688 = vrot.lane.b32.xlu1 %v7020_v44, %s6843_s27  ;;  %v5622_v47 = vpop.f32.mrb[8].mxu0 }
 0x104   : > { %v571_v49 = vadd.f32 %v5622_v47, %v5365_v43  ;;  %v562_v50 = vpop.f32.mrb[9].mxu0 }
 0x105   : > { %v563_v51 = vadd.f32 %v5361_v45, %v562_v50  ;;  %v5623_v52 = vpop.f32.mrb[10].mxu0 }
 0x106   : > { %v574_v54 = vadd.f32 %v5623_v52, %v5366_v46  ;;  %v565_v55 = vpop.f32.mrb[11].mxu0 }
 0x107   : > { %690 = vrot.lane.b32.xlu1 %v7018_v42, %s6843_s27  ;;  %v566_v57 = vadd.f32 %v5362_v48, %v565_v55 }
 0x108   : > { %v7032_v58 = vpack.c.bf16 %v574_v54, %v571_v49 }
 0x109   : > { %v7034_v60 = vpack.c.bf16 %v566_v57, %v563_v51 }
 0x10b   : > { %9441 = vst [vmem:[#allocation8_spill] sm:$0xff] %v7034_v60  ;;  %v5626_v63 = vpop.f32.mrb[12].mxu0  ;;  %692 = vrot.lane.b32.xlu0 %v7034_v60, %s6843_s27  ;;  %694 = vrot.lane.b32.xlu1 %v7032_v58, %s6843_s27 }
 0x10c   : > { %v587_v1 = vadd.f32 %v5626_v63, %v5373_v59  ;;  %v578_v2 = vpop.f32.mrb[13].mxu0 }
 0x10d   : > { %v579_v3 = vadd.f32 %v5369_v61, %v578_v2  ;;  %v5627_v4 = vpop.f32.mrb[14].mxu0 }
 0x10e   : > { %v590_v5 = vadd.f32 %v5627_v4, %v5374_v62  ;;  %v581_v6 = vpop.f32.mrb[15].mxu0 }
 0x10f   : > { %v582_v7 = vadd.f32 %v5370_v0, %v581_v6 }
 0x110   : > { %v7040_v8 = vpack.c.bf16 %v590_v5, %v587_v1 }
 0x111   : > { %v7042_v9 = vpack.c.bf16 %v582_v7, %v579_v3 }
 0x112   : > { %9442 = vst [vmem:[#allocation9_spill] sm:$0xff] %v7040_v8  ;;  %698 = vrot.lane.b32.xlu1 %v7040_v8, %s6843_s27 }
 0x113   : > { %9443 = vst [vmem:[#allocation10_spill] sm:$0xff] %v7042_v9  ;;  %696 = vrot.lane.b32.xlu0 %v7042_v9, %s6843_s27  ;;  %s6845_s27 = smov 64  }
 0x116   : > { %618 = vbcast.lane.b32.xlu1 %v7051_v10, 264 }
 0x117   : > { %614 = vbcast.lane.b32.xlu0 %v7051_v10, 256 }
 0x11a   : > { %650 = vbcast.lane.b32.xlu1 %v7051_v10, 328 }
 0x11b   : > { %622 = vbcast.lane.b32.xlu0 %v7051_v10, 272 }
 0x11f   : > { %626 = vbcast.lane.b32.xlu0 %v7051_v10, 280 }
 0x123   : > { %630 = vbcast.lane.b32.xlu0 %v7051_v10, 288 }
 0x127   : > { %634 = vbcast.lane.b32.xlu0 %v7051_v10, 296 }
 0x12b   : > { %1044 = vrot.lane.b32.xlu0 %v7004_v28, %s6845_s27 }
 0x12f   : > { %638 = vbcast.lane.b32.xlu0 %v7051_v10, 304 }
 0x133   : > { %642 = vbcast.lane.b32.xlu0 %v7051_v10, 312 }
 0x137   : > { %1046 = vrot.lane.b32.xlu0 %v7002_v26, %s6845_s27 }
 0x13b   : > { %646 = vbcast.lane.b32.xlu0 %v7051_v10, 320 }
 0x13f   : > { %1048 = vrot.lane.b32.xlu0 %v7020_v44, %s6845_s27 }
 0x143   : > { %654 = vbcast.lane.b32.xlu0 %v7051_v10, 336 }
 0x147   : > { %658 = vbcast.lane.b32.xlu0 %v7051_v10, 344 }
 0x16d   : > { %v685_v12 = vpop.permute.xlu0 %684 }
 0x16e   : > { %6084 = vmatprep.subr.msk.bf16.mxu1 %vm700_vm1, %v685_v12  ;;  %v726_v13 = vsel %vm700_vm1, %v685_v12, 0 }
 0x16f   : > { %5629 = vmatpush3.bf16.xpose.msra.mxu1 %v726_v13 }
 0x171   : > { %v687_v14 = vpop.permute.xlu0 %686 }
 0x172   : > { %6085 = vmatprep.subr.msk.bf16.mxu1 %vm700_vm1, %v687_v14  ;;  %v729_v15 = vsel %vm700_vm1, %v687_v14, 0 }
 0x175   : > { %v689_v16 = vpop.permute.xlu1 %688 }
 0x176   : > { %v732_v17 = vsel %vm700_vm1, %v689_v16, 0 }
 0x177   : > { %5631 = vmatpush3.bf16.xpose.msra.mxu1 %v729_v15 }
 0x178   : > { %6086 = vmatprep.subr.msk.bf16.mxu1 %vm700_vm1, %v689_v16 }
 0x179   : > { %v691_v18 = vpop.permute.xlu1 %690 }
 0x17a   : > { %v735_v21 = vsel %vm700_vm1, %v691_v18, 0 }
 0x17d   : > { %v693_v19 = vpop.permute.xlu0 %692  ;;  %v695_v25 = vpop.permute.xlu1 %694 }
 0x17e   : > { %v738_v24 = vsel %vm700_vm1, %v693_v19, 0  ;;  %v741_v30 = vsel %vm700_vm1, %v695_v25, 0 }
 0x17f   : > { %5633 = vmatpush3.bf16.xpose.msra.mxu1 %v732_v17 }
 0x180   : > { %6087 = vmatprep.subr.msk.bf16.mxu1 %vm700_vm1, %v691_v18 }
 0x184   : > { %v699_v34 = vpop.permute.xlu1 %698 }
 0x185   : > { %v697_v20 = vpop.permute.xlu0 %696  ;;  %v747_v37 = vsel %vm700_vm1, %v699_v34, 0 }
 0x186   : > { %v744_v33 = vsel %vm700_vm1, %v697_v20, 0 }
 0x187   : > { %5635 = vmatpush3.bf16.xpose.msra.mxu1 %v735_v21 }
 0x188   : > { %6088 = vmatprep.subr.msk.bf16.mxu1 %vm700_vm1, %v693_v19  ;;  %v7185_v19 = vpop.permute.xlu1 %618 }
 0x189   : > { %v7081_v22 = vpop.permute.xlu0 %614 }
 0x18a   : > { %9444 = vst [vmem:[#allocation11_spill] sm:$0xff] %v7081_v22 }
 0x18c   : > { %v7189_v21 = vpop.permute.xlu1 %650 }
 0x18d   : > { %v7083_v23 = vpop.permute.xlu0 %622  ;;  %9450 = vst [vmem:[#allocation17_spill] sm:$0xff] %v7189_v21 }
 0x18f   : > { %5637 = vmatpush3.bf16.xpose.msra.mxu1 %v738_v24 }
 0x190   : > { %6089 = vmatprep.subr.msk.bf16.mxu1 %vm700_vm1, %v695_v25 }
 0x191   : > { %v7087_v27 = vpop.permute.xlu0 %626 }
 0x195   : > { %v7089_v29 = vpop.permute.xlu0 %630 }
 0x197   : > { %5639 = vmatpush3.bf16.xpose.msra.mxu1 %v741_v30 }
 0x198   : > { %6090 = vmatprep.subr.msk.bf16.mxu1 %vm700_vm1, %v697_v20 }
 0x199   : > { %v7093_v31 = vpop.permute.xlu0 %634 }
 0x19d   : > { %v1045_v32 = vpop.permute.xlu0 %1044 }
 0x19e   : > { %5661 = vmatpush3.bf16.msra.mxu0 %v1045_v32 }
 0x19f   : > { %5641 = vmatpush3.bf16.xpose.msra.mxu1 %v744_v33  ;;  %5662 = vmatprep.subr.bf16.mxu0 %v9383_v11 }
 0x1a0   : > { %6091 = vmatprep.subr.msk.bf16.mxu1 %vm700_vm1, %v699_v34 }
 0x1a1   : > { %v7098_v35 = vpop.permute.xlu0 %638 }
 0x1a2   : > { %9445 = vst [vmem:[#allocation12_spill] sm:$0xff] %v7098_v35 }
 0x1a5   : > { %v7100_v36 = vpop.permute.xlu0 %642 }
 0x1a6   : > { %9446 = vst [vmem:[#allocation13_spill] sm:$0xff] %v7100_v36 }
 0x1a7   : > { %5643 = vmatpush3.bf16.xpose.msra.mxu1 %v747_v37 }
 0x1a8   : > { %5712 = vmatprep.subr.bf16.mxu1 %v9383_v11 }
 0x1a9   : > { %v1047_v38 = vpop.permute.xlu0 %1046 }
 0x1aa   : > { %5663 = vmatpush3.bf16.msra.mxu0 %v1047_v38 }
 0x1ab   : > { %5664 = vmatprep.subr.bf16.mxu0 %v9383_v11 }
 0x1ad   : > { %v7105_v39 = vpop.permute.xlu0 %646 }
 0x1ae   : > { %9447 = vst [vmem:[#allocation14_spill] sm:$0xff] %v7105_v39  ;;  %5645 = vmatmul.mubr.msk.bf16.vlgmr.msra.gmra.mrb[0].mxu1 %vm700_vm1, %v7002_v26 }
 0x1af   : > { %5648 = vmatprep.mubr.msk.bf16.mxu1 %vm700_vm1, %v7020_v44 }
 0x1b1   : > { %v1049_v40 = vpop.permute.xlu0 %1048 }
 0x1b2   : > { %5665 = vmatpush3.bf16.msra.mxu0 %v1049_v40 }
 0x1b3   : > { %5666 = vmatprep.subr.bf16.mxu0 %v9383_v11 }
 0x1b5   : > { %v7183_v18 = vpop.permute.xlu0 %654 }
 0x1b6   : > { %5649 = vmatmul.mubr.msk.bf16.gmra.mrb[4].mxu1 %vm700_vm1, %v7018_v42  ;;  %9448 = vst [vmem:[#allocation15_spill] sm:$0xff] %v7183_v18 }
 0x1b7   : > { %5652 = vmatprep.mubr.msk.bf16.mxu1 %vm700_vm1, %v7034_v60 }
 0x1b9   : > { %v7187_v20 = vpop.permute.xlu0 %658 }
 0x1ba   : > { %9449 = vst [vmem:[#allocation16_spill] sm:$0xff] %v7187_v20 }
 0x1be   : > { %5653 = vmatmul.mubr.msk.bf16.gmra.mrb[8].mxu1 %vm700_vm1, %v7032_v58 }
 0x1bf   : > { %5656 = vmatprep.mubr.msk.bf16.mxu1 %vm700_vm1, %v7042_v9 }
 0x1c6   : > { %5657 = vmatmul.mubr.msk.bf16.gmra.mrb[12].mxu1 %vm700_vm1, %v7040_v8 }
 0x1c7   : > { %5728 = vmatprep.mubr.msk.bf16.mxu1 %vm6848_vm2, %v9383_v11 }
 0x281   : > { %v5646_v43 = vpop.f32.mrb[0].mxu1 }
 0x282   : > { %v792_v45 = vadd.f32 %v5646_v43, %v7129_v41  ;;  %v783_v46 = vpop.f32.mrb[1].mxu1 }
 0x283   : > { %v5647_v47 = vpop.f32.mrb[2].mxu1  ;;  %v784_v50 = vadd.f32 %v7129_v41, %v783_v46 }
 0x284   : > { %850 = vmax.xlane.f32.xlu0 %v792_v45  ;;  %v786_v48 = vpop.f32.mrb[3].mxu1  ;;  %v795_v52 = vadd.f32 %v5647_v47, %v7129_v41 }
 0x285   : > { %v7133_v49 = vadd.f32 %v7129_v41, %v786_v48 }
 0x287   : > { %848 = vmax.xlane.f32.xlu1 %v7133_v49 }
 0x288   : > { %846 = vmax.xlane.f32.xlu0 %v784_v50 }
 0x289   : > { %v5650_v51 = vpop.f32.mrb[4].mxu1 }
 0x28a   : > { %v808_v53 = vadd.f32 %v5650_v51, %v7129_v41  ;;  %v799_v54 = vpop.f32.mrb[5].mxu1 }
 0x28b   : > { %v5651_v55 = vpop.f32.mrb[6].mxu1  ;;  %v800_v57 = vadd.f32 %v7129_v41, %v799_v54 }
 0x28c   : > { %v802_v56 = vpop.f32.mrb[7].mxu1  ;;  %858 = vmax.xlane.f32.xlu1 %v808_v53  ;;  %852 = vmax.xlane.f32.xlu0 %v795_v52  ;;  %v7141_v59 = vadd.f32 %v5651_v55, %v7129_v41 }
 0x28d   : > { %v7145_v62 = vadd.f32 %v7129_v41, %v802_v56 }
 0x290   : > { %854 = vmax.xlane.f32.xlu1 %v800_v57  ;;  %860 = vmax.xlane.f32.xlu0 %v7141_v59 }
 0x291   : > { %v5654_v61 = vpop.f32.mrb[8].mxu1 }
 0x292   : > { %v7148_v63 = vadd.f32 %v5654_v61, %v7129_v41  ;;  %v815_v0 = vpop.f32.mrb[9].mxu1 }
 0x293   : > { %v5655_v1 = vpop.f32.mrb[10].mxu1  ;;  %v7153_v3 = vadd.f32 %v7129_v41, %v815_v0 }
 0x294   : > { %v818_v2 = vpop.f32.mrb[11].mxu1  ;;  %866 = vmax.xlane.f32.xlu1 %v7148_v63  ;;  %856 = vmax.xlane.f32.xlu0 %v7145_v62  ;;  %v7156_v4 = vadd.f32 %v5655_v1, %v7129_v41 }
 0x295   : > { %v7161_v6 = vadd.f32 %v7129_v41, %v818_v2 }
 0x298   : > { %862 = vmax.xlane.f32.xlu1 %v7153_v3  ;;  %868 = vmax.xlane.f32.xlu0 %v7156_v4 }
 0x299   : > { %v5658_v5 = vpop.f32.mrb[12].mxu1 }
 0x29a   : > { %v7164_v7 = vadd.f32 %v5658_v5, %v7129_v41  ;;  %v831_v12 = vpop.f32.mrb[13].mxu1 }
 0x29b   : > { %v5659_v13 = vpop.f32.mrb[14].mxu1  ;;  %v7169_v15 = vadd.f32 %v7129_v41, %v831_v12 }
 0x29c   : > { %v834_v14 = vpop.f32.mrb[15].mxu1  ;;  %874 = vmax.xlane.f32.xlu1 %v7164_v7  ;;  %864 = vmax.xlane.f32.xlu0 %v7161_v6  ;;  %v7172_v16 = vadd.f32 %v5659_v13, %v7129_v41 }
 0x29d   : > { %v7177_v17 = vadd.f32 %v7129_v41, %v834_v14 }
 0x2a0   : > { %870 = vmax.xlane.f32.xlu1 %v7169_v15  ;;  %876 = vmax.xlane.f32.xlu0 %v7172_v16 }
 0x2a4   : > { %872 = vmax.xlane.f32.xlu0 %v7177_v17 }
 0x2b1   : > { %662 = vbcast.lane.b32.xlu1 %v7051_v10, 352 }
 0x2ba   : > { %1050 = vrot.lane.b32.xlu0 %v7018_v42, %s6845_s27 }
 0x311   : > { %v851_v24 = vpop.xlane.xlu0 %850 }
 0x312   : > { %v880_v25 = vsub.f32 %v792_v45, %v851_v24 }
 0x314   : > { %v898_v30 = vmul.f32 1.442695, %v880_v25  ;;  %v849_v32 = vpop.xlane.xlu1 %848 }
 0x315   : > { %v847_v33 = vpop.xlane.xlu0 %846  ;;  %v879_v47 = vsub.f32 %v7133_v49, %v849_v32 }
 0x316   : > { %6227 = vpow2.f32 %v898_v30  ;;  %v878_v34 = vsub.f32 %v784_v50, %v847_v33 }
 0x317   : > { %v896_v45 = vmul.f32 1.442695, %v879_v47 }
 0x318   : > { %v894_v37 = vmul.f32 1.442695, %v878_v34 }
 0x319   : > { %v859_v38 = vpop.xlane.xlu1 %858  ;;  %v853_v40 = vpop.xlane.xlu0 %852 }
 0x31a   : > { %6229 = vpow2.f32 %v894_v37  ;;  %v884_v43 = vsub.f32 %v808_v53, %v859_v38  ;;  %v881_v46 = vsub.f32 %v795_v52, %v853_v40 }
 0x31c   : > { %v906_v48 = vmul.f32 1.442695, %v884_v43  ;;  %v900_v51 = vmul.f32 1.442695, %v881_v46 }
 0x31d   : > { %v855_v54 = vpop.xlane.xlu1 %854  ;;  %v861_v55 = vpop.xlane.xlu0 %860 }
 0x31e   : > { %6231 = vpow2.f32 %v906_v48  ;;  %v882_v56 = vsub.f32 %v800_v57, %v855_v54  ;;  %v885_v61 = vsub.f32 %v7141_v59, %v861_v55 }
 0x31f   : > { %6233 = vpow2.f32 %v900_v51 }
 0x320   : > { %v7193_v0 = vpop.eup %6227  ;;  %v902_v50 = vmul.f32 1.442695, %v882_v56  ;;  %v908_v52 = vmul.f32 1.442695, %v885_v61 }
 0x321   : > { %930 = vadd.xlane.f32.xlu1 %v7193_v0  ;;  %v867_v1 = vpop.xlane.xlu1 %866  ;;  %v857_v53 = vpop.xlane.xlu0 %856 }
 0x322   : > { %6235 = vpow2.f32 %v902_v50  ;;  %v888_v49 = vsub.f32 %v7148_v63, %v867_v1  ;;  %v883_v2 = vsub.f32 %v7145_v62, %v857_v53 }
 0x323   : > { %6237 = vpow2.f32 %v896_v45 }
 0x324   : > { %v7198_v5 = vpop.eup %6229  ;;  %v914_v57 = vmul.f32 1.442695, %v888_v49  ;;  %v904_v14 = vmul.f32 1.442695, %v883_v2 }
 0x325   : > { %v863_v12 = vpop.xlane.xlu1 %862  ;;  %926 = vadd.xlane.f32.xlu1 %v7198_v5  ;;  %v869_v59 = vpop.xlane.xlu0 %868 }
 0x326   : > { %6239 = vpow2.f32 %v914_v57  ;;  %v886_v13 = vsub.f32 %v7153_v3, %v863_v12  ;;  %v889_v24 = vsub.f32 %v7156_v4, %v869_v59 }
 0x327   : > { %6241 = vpow2.f32 %v908_v52 }
 0x328   : > { %v7203_v25 = vpop.eup %6231  ;;  %v910_v63 = vmul.f32 1.442695, %v886_v13  ;;  %v916_v32 = vmul.f32 1.442695, %v889_v24 }
 0x329   : > { %v7205_v30 = vpop.eup %6233  ;;  %938 = vadd.xlane.f32.xlu1 %v7203_v25  ;;  %v865_v62 = vpop.xlane.xlu0 %864 }
 0x32a   : > { %6243 = vpow2.f32 %v910_v63  ;;  %932 = vadd.xlane.f32.xlu0 %v7205_v30  ;;  %v887_v33 = vsub.f32 %v7161_v6, %v865_v62  ;;  %v875_v54 = vpop.xlane.xlu1 %874 }
 0x32b   : > { %6245 = vpow2.f32 %v904_v14  ;;  %v892_v55 = vsub.f32 %v7164_v7, %v875_v54 }
 0x32c   : > { %v7210_v3 = vpop.eup %6235  ;;  %6247 = vpow2.f32 %v916_v32  ;;  %v912_v37 = vmul.f32 1.442695, %v887_v33 }
 0x32d   : > { %v7212_v34 = vpop.eup %6237  ;;  %934 = vadd.xlane.f32.xlu1 %v7210_v3  ;;  %v877_v4 = vpop.xlane.xlu0 %876  ;;  %v922_v45 = vmul.f32 1.442695, %v892_v55 }
 0x32e   : > { %928 = vadd.xlane.f32.xlu0 %v7212_v34  ;;  %6249 = vpow2.f32 %v912_v37  ;;  %v871_v56 = vpop.xlane.xlu1 %870  ;;  %v893_v1 = vsub.f32 %v7172_v16, %v877_v4 }
 0x32f   : > { %v890_v61 = vsub.f32 %v7169_v15, %v871_v56  ;;  %6251 = vpow2.f32 %v922_v45 }
 0x330   : > { %v7216_v38 = vpop.eup %6239  ;;  %v924_v49 = vmul.f32 1.442695, %v893_v1 }
 0x331   : > { %v7218_v40 = vpop.eup %6241  ;;  %946 = vadd.xlane.f32.xlu1 %v7216_v38  ;;  %v873_v43 = vpop.xlane.xlu0 %872  ;;  %v918_v50 = vmul.f32 1.442695, %v890_v61 }
 0x332   : > { %940 = vadd.xlane.f32.xlu0 %v7218_v40  ;;  %v891_v53 = vsub.f32 %v7177_v17, %v873_v43 }
 0x333   : > { %6253 = vpow2.f32 %v918_v50 }
 0x334   : > { %v7222_v6 = vpop.eup %6243  ;;  %v920_v52 = vmul.f32 1.442695, %v891_v53  ;;  %6255 = vpow2.f32 %v924_v49 }
 0x335   : > { %v7224_v46 = vpop.eup %6245  ;;  %942 = vadd.xlane.f32.xlu1 %v7222_v6  ;;  %v1051_v47 = vpop.permute.xlu0 %1050 }
 0x336   : > { %936 = vadd.xlane.f32.xlu0 %v7224_v46  ;;  %5667 = vmatpush3.bf16.msra.mxu0 %v1051_v47  ;;  %v7229_v48 = vpop.eup %6247  ;;  %6257 = vpow2.f32 %v920_v52 }
 0x337   : > { %5668 = vmatprep.subr.bf16.mxu0 %v9383_v11 }
 0x338   : > { %v7232_v51 = vpop.eup %6249 }
 0x339   : > { %v7242_v2 = vpop.eup %6251 }
 0x33a   : > { %948 = vadd.xlane.f32.xlu0 %v7229_v48 }
 0x33d   : > { %v7245_v7 = vpop.eup %6253 }
 0x33e   : > { %944 = vadd.xlane.f32.xlu0 %v7232_v51  ;;  %v7248_v15 = vpop.eup %6255 }
 0x340   : > { %v7250_v57 = vpop.eup %6257 }
 0x346   : > { %1052 = vrot.lane.b32.xlu1 %v7034_v60, %s6845_s27 }
 0x354   : > { %666 = vbcast.lane.b32.xlu0 %v7051_v10, 360 }
 0x36a   : > { %954 = vadd.xlane.f32.xlu1 %v7242_v2 }
 0x36e   : > { %950 = vadd.xlane.f32.xlu1 %v7245_v7 }
 0x372   : > { %956 = vadd.xlane.f32.xlu1 %v7248_v15 }
 0x373   : > { %952 = vadd.xlane.f32.xlu0 %v7250_v57 }
 0x383   : > { %674 = vbcast.lane.b32.xlu1 %v7051_v10, 376 }
 0x387   : > { %1056 = vrot.lane.b32.xlu1 %v7042_v9, %s6845_s27 }
 0x389   : > { %670 = vbcast.lane.b32.xlu0 %v7051_v10, 368  ;;  %v7280_v10 = vpop.permute.xlu1 %662 }
 0x38a   : > { %9451 = vst [vmem:[#allocation18_spill] sm:$0xff] %v7280_v10 }
 0x38b   : > { %1125 = vrot.lane.b32.xlu1 %v7004_v28, %s6846_s16 }
 0x38d   : > { %1054 = vrot.lane.b32.xlu0 %v7032_v58, %s6845_s27 }
 0x38f   : > { %1129 = vrot.lane.b32.xlu1 %v7020_v44, %s6846_s16 }
 0x391   : > { %1058 = vrot.lane.b32.xlu0 %v7040_v8, %s6845_s27 }
 0x393   : > { %1133 = vrot.lane.b32.xlu1 %v7034_v60, %s6846_s16 }
 0x395   : > { %1127 = vrot.lane.b32.xlu0 %v7002_v26, %s6846_s16 }
 0x397   : > { %1137 = vrot.lane.b32.xlu1 %v7042_v9, %s6846_s16 }
 0x399   : > { %1131 = vrot.lane.b32.xlu0 %v7018_v42, %s6846_s16 }
 0x39b   : > { %1109 = vrot.lane.b32.xlu1 %v7004_v28, %s6847_s17 }
 0x39d   : > { %1135 = vrot.lane.b32.xlu0 %v7032_v58, %s6846_s16 }
 0x39f   : > { %1113 = vrot.lane.b32.xlu1 %v7020_v44, %s6847_s17 }
 0x3a1   : > { %1139 = vrot.lane.b32.xlu0 %v7040_v8, %s6846_s16  ;;  %s6859_s16 = smov 76  }
 0x3a3   : > { %1117 = vrot.lane.b32.xlu1 %v7034_v60, %s6847_s17 }
 0x3a5   : > { %1111 = vrot.lane.b32.xlu0 %v7002_v26, %s6847_s17 }
 0x3a7   : > { %1121 = vrot.lane.b32.xlu1 %v7042_v9, %s6847_s17 }
 0x3a9   : > { %1115 = vrot.lane.b32.xlu0 %v7018_v42, %s6847_s17 }
 0x3ab   : > { %1751 = vrot.lane.b32.xlu1 %v7004_v28, %s6849_s21 }
 0x3ad   : > { %1119 = vrot.lane.b32.xlu0 %v7032_v58, %s6847_s17 }
 0x3ae   : > { %v931_v16 = vpop.xlane.xlu1 %930 }
 0x3af   : > { %1755 = vrot.lane.b32.xlu1 %v7020_v44, %s6849_s21 }
 0x3b1   : > { %1123 = vrot.lane.b32.xlu0 %v7040_v8, %s6847_s17  ;;  %s6860_s17 = smov 108  }
 0x3b2   : > { %v927_v17 = vpop.xlane.xlu1 %926 }
 0x3b3   : > { %1759 = vrot.lane.b32.xlu1 %v7034_v60, %s6849_s21 }
 0x3b5   : > { %1753 = vrot.lane.b32.xlu0 %v7002_v26, %s6849_s21 }
 0x3b6   : > { %v939_v12 = vpop.xlane.xlu1 %938 }
 0x3b7   : > { %1763 = vrot.lane.b32.xlu1 %v7042_v9, %s6849_s21  ;;  %v933_v24 = vpop.xlane.xlu0 %932 }
 0x3b9   : > { %1757 = vrot.lane.b32.xlu0 %v7018_v42, %s6849_s21 }
 0x3ba   : > { %v935_v59 = vpop.xlane.xlu1 %934 }
 0x3bb   : > { %1735 = vrot.lane.b32.xlu1 %v7004_v28, %s6850_s22  ;;  %v929_v62 = vpop.xlane.xlu0 %928 }
 0x3bc   : > { %6259 = vrcp.f32 %v929_v62 }
 0x3bd   : > { %1761 = vrot.lane.b32.xlu0 %v7032_v58, %s6849_s21  ;;  %6261 = vrcp.f32 %v927_v17 }
 0x3be   : > { %v947_v13 = vpop.xlane.xlu1 %946  ;;  %6263 = vrcp.f32 %v931_v16 }
 0x3bf   : > { %1739 = vrot.lane.b32.xlu1 %v7020_v44, %s6850_s22  ;;  %v941_v32 = vpop.xlane.xlu0 %940  ;;  %6265 = vrcp.f32 %v933_v24 }
 0x3c0   : > { %6267 = vrcp.f32 %v935_v59 }
 0x3c1   : > { %1765 = vrot.lane.b32.xlu0 %v7040_v8, %s6849_s21 }
 0x3c2   : > { %v943_v14 = vpop.xlane.xlu1 %942 }
 0x3c3   : > { %1743 = vrot.lane.b32.xlu1 %v7034_v60, %s6850_s22  ;;  %v937_v43 = vpop.xlane.xlu0 %936 }
 0x3c4   : > { %6269 = vrcp.f32 %v937_v43 }
 0x3c5   : > { %1737 = vrot.lane.b32.xlu0 %v7002_v26, %s6850_s22  ;;  %6271 = vrcp.f32 %v939_v12 }
 0x3c6   : > { %v1053_v63 = vpop.permute.xlu1 %1052  ;;  %v6260_v33 = vpop.eup %6259  ;;  %6273 = vrcp.f32 %v941_v32 }
 0x3c7   : > { %1747 = vrot.lane.b32.xlu1 %v7042_v9, %s6850_s22  ;;  %5669 = vmatpush3.bf16.msra.mxu0 %v1053_v63  ;;  %v6262_v4 = vpop.eup %6261  ;;  %v7302_v37 = vmul.f32 %v6260_v33, %v7212_v34  ;;  %v949_v1 = vpop.xlane.xlu0 %948  ;;  %6275 = vrcp.f32 %v943_v14 }
 0x3c8   : > { %5670 = vmatprep.subr.bf16.mxu0 %v9383_v11  ;;  %v7305_v47 = vmul.f32 %v6262_v4, %v7198_v5  ;;  %v6264_v54 = vpop.eup %6263 }
 0x3c9   : > { %1741 = vrot.lane.b32.xlu0 %v7018_v42, %s6850_s22  ;;  %9452 = vst [vmem:[#allocation19_spill] sm:$0xff] %v7302_v37  ;;  %v1007_v55 = vmul.f32 %v7302_v37, %v7185_v19  ;;  %v7310_v56 = vmul.f32 %v6264_v54, %v7193_v0  ;;  %v6266_v61 = vpop.eup %6265 }
 0x3ca   : > { %9453 = vst [vmem:[#allocation20_spill] sm:$0xff] %v7305_v47  ;;  %v1006_v45 = vmul.f32 %v7305_v47, %v7081_v22  ;;  %v7317_v5 = vmul.f32 %v6266_v61, %v7205_v30  ;;  %v6268_v53 = vpop.eup %6267 }
 0x3cb   : > { %9454 = vst [vmem:[#allocation21_spill] sm:$0xff] %v7310_v56  ;;  %v1008_v34 = vmul.f32 %v7310_v56, %v7083_v23  ;;  %v7322_v16 = vmul.f32 %v6268_v53, %v7210_v3  ;;  %v945_v59 = vpop.xlane.xlu0 %944 }
 0x3cc   : > { %v1022_v50 = vadd.f32 %v1007_v55, %v1006_v45  ;;  %9455 = vst [vmem:[#allocation22_spill] sm:$0xff] %v7317_v5  ;;  %v1009_v0 = vmul.f32 %v7317_v5, %v7087_v27  ;;  %6277 = vrcp.f32 %v945_v59 }
 0x3cd   : > { %1745 = vrot.lane.b32.xlu0 %v7032_v58, %s6850_s22  ;;  %9456 = vst [vmem:[#allocation23_spill] sm:$0xff] %v7322_v16  ;;  %v1010_v30 = vmul.f32 %v7322_v16, %v7089_v29  ;;  %6279 = vrcp.f32 %v947_v13 }
 0x3ce   : > { %v1023_v49 = vadd.f32 %v1022_v50, %v1008_v34  ;;  %v6270_v52 = vpop.eup %6269  ;;  %6281 = vrcp.f32 %v949_v1 }
 0x3cf   : > { %v7325_v12 = vmul.f32 %v6270_v52, %v7224_v46  ;;  %v6272_v24 = vpop.eup %6271  ;;  %v7347_v34 = vpop.permute.xlu0 %666 }
 0x3d0   : > { %v1024_v17 = vadd.f32 %v1023_v49, %v1009_v0  ;;  %v7332_v32 = vmul.f32 %v6272_v24, %v7203_v25  ;;  %v6274_v3 = vpop.eup %6273  ;;  %9462 = vst [vmem:[#allocation29_spill] sm:$0xff] %v7347_v34 }
 0x3d1   : > { %1749 = vrot.lane.b32.xlu0 %v7040_v8, %s6850_s22  ;;  %9457 = vst [vmem:[#allocation24_spill] sm:$0xff] %v7325_v12  ;;  %v1011_v62 = vmul.f32 %v7325_v12, %v7093_v31  ;;  %v7337_v14 = vmul.f32 %v6274_v3, %v7218_v40  ;;  %v6276_v4 = vpop.eup %6275  ;;  %s9438_s22 = sshll.u32 %s6941_s13, 4 }
 0x3d2   : > { %v1025_v63 = vadd.f32 %v1024_v17, %v1010_v30  ;;  %9458 = vst [vmem:[#allocation25_spill] sm:$0xff] %v7332_v32  ;;  %v1012_v46 = vmul.f32 %v7332_v32, %v7098_v35  ;;  %v7342_v25 = vmul.f32 %v6276_v4, %v7222_v6 }
 0x3d3   : > { %9459 = vst [vmem:[#allocation26_spill] sm:$0xff] %v7337_v14  ;;  %v1013_v45 = vmul.f32 %v7337_v14, %v7100_v36 }
 0x3d4   : > { %v1026_v33 = vadd.f32 %v1025_v63, %v1011_v62  ;;  %9460 = vst [vmem:[#allocation27_spill] sm:$0xff] %v7342_v25  ;;  %v1014_v40 = vmul.f32 %v7342_v25, %v7105_v39 }
 0x3d6   : > { %v1027_v54 = vadd.f32 %v1026_v33, %v1012_v46  ;;  %v6278_v55 = vpop.eup %6277 }
 0x3d7   : > { %v7345_v13 = vmul.f32 %v6278_v55, %v7232_v51  ;;  %v6280_v53 = vpop.eup %6279 }
 0x3d8   : > { %v1028_v50 = vadd.f32 %v1027_v54, %v1013_v45  ;;  %v7354_v0 = vmul.f32 %v6280_v53, %v7216_v38  ;;  %v6282_v51 = vpop.eup %6281 }
 0x3d9   : > { %9461 = vst [vmem:[#allocation28_spill] sm:$0xff] %v7345_v13  ;;  %v1015_v52 = vmul.f32 %v7345_v13, %v7189_v21  ;;  %v7363_v62 = vmul.f32 %v6282_v51, %v7229_v48 }
 0x3da   : > { %v1029_v49 = vadd.f32 %v1028_v50, %v1014_v40  ;;  %9463 = vst [vmem:[#allocation30_spill] sm:$0xff] %v7354_v0  ;;  %v1016_v63 = vmul.f32 %v7354_v0, %v7183_v18 }
 0x3db   : > { %9466 = vst [vmem:[#allocation33_spill] sm:$0xff] %v7363_v62  ;;  %v1017_v54 = vmul.f32 %v7363_v62, %v7187_v20 }
 0x3dc   : > { %v1030_v59 = vadd.f32 %v1029_v49, %v1015_v52 }
 0x3de   : > { %v1031_v46 = vadd.f32 %v1030_v59, %v1016_v63 }
 0x3f7   : > { %v955_v43 = vpop.xlane.xlu1 %954 }
 0x3fb   : > { %v951_v61 = vpop.xlane.xlu1 %950 }
 0x3fc   : > { %6283 = vrcp.f32 %v951_v61 }
 0x3fd   : > { %6285 = vrcp.f32 %v955_v43 }
 0x3ff   : > { %v957_v1 = vpop.xlane.xlu1 %956 }
 0x400   : > { %6287 = vrcp.f32 %v957_v1  ;;  %v953_v6 = vpop.xlane.xlu0 %952 }
 0x401   : > { %6289 = vrcp.f32 %v953_v6 }
 0x403   : > { %v7356_v17 = vpop.permute.xlu1 %674 }
 0x404   : > { %9464 = vst [vmem:[#allocation31_spill] sm:$0xff] %v7356_v17  ;;  %v7358_v30 = vpop.permute.xlu0 %670 }
 0x405   : > { %9465 = vst [vmem:[#allocation32_spill] sm:$0xff] %v7358_v30 }
 0x406   : > { %v6284_v24 = vpop.eup %6283 }
 0x407   : > { %v7366_v3 = vmul.f32 %v6284_v24, %v7245_v7  ;;  %v1057_v33 = vpop.permute.xlu1 %1056  ;;  %v6286_v4 = vpop.eup %6285  ;;  %v1032_v7 = vadd.f32 %v1031_v46, %v1017_v54 }
 0x408   : > { %v1055_v38 = vpop.permute.xlu0 %1054  ;;  %v7374_v48 = vmul.f32 %v6286_v4, %v7242_v2 }
 0x409   : > { %9467 = vst [vmem:[#allocation34_spill] sm:$0xff] %v7366_v3  ;;  %5671 = vmatpush3.bf16.msra.mxu0 %v1055_v38  ;;  %v1018_v55 = vmul.f32 %v7366_v3, %v7280_v10 }
 0x40a   : > { %v6288_v43 = vpop.eup %6287  ;;  %5672 = vmatprep.subr.bf16.mxu0 %v9383_v11  ;;  %9468 = vst [vmem:[#allocation35_spill] sm:$0xff] %v7374_v48  ;;  %v1020_v2 = vmul.f32 %v7374_v48, %v7358_v30 }
 0x40b   : > { %v6290_v45 = vpop.eup %6289  ;;  %v1126_v50 = vpop.permute.xlu1 %1125  ;;  %v1033_v40 = vadd.f32 %v1032_v7, %v1018_v55  ;;  %v7380_v53 = vmul.f32 %v6288_v43, %v7248_v15 }
 0x40c   : > { %v7377_v61 = vmul.f32 %v6290_v45, %v7250_v57  ;;  %v1059_v52 = vpop.permute.xlu0 %1058  ;;  %v1166_v45 = vsel %vm700_vm1, %v1126_v50, 0 }
 0x40d   : > { %5673 = vmatpush3.bf16.msra.mxu0 %v1057_v33  ;;  %9470 = vst [vmem:[#allocation37_spill] sm:$0xff] %v7380_v53  ;;  %v1021_v57 = vmul.f32 %v7380_v53, %v7356_v17 }
 0x40e   : > { %9469 = vst [vmem:[#allocation36_spill] sm:$0xff] %v7377_v61  ;;  %v1019_v1 = vmul.f32 %v7377_v61, %v7347_v34  ;;  %5674 = vmatprep.subr.bf16.mxu0 %v9383_v11 }
 0x40f   : > { %v1130_v6 = vpop.permute.xlu1 %1129 }
 0x410   : > { %v1034_v49 = vadd.f32 %v1033_v40, %v1019_v1  ;;  %v1128_v7 = vpop.permute.xlu0 %1127  ;;  %v1172_v1 = vsel %vm700_vm1, %v1130_v6, 0 }
 0x411   : > { %5675 = vmatpush3.bf16.msra.mxu0 %v1059_v52  ;;  %v1169_v40 = vsel %vm700_vm1, %v1128_v7, 0 }
 0x412   : > { %6092 = vmatprep.subr.msk.bf16.mxu0 %vm700_vm1, %v1126_v50  ;;  %v1035_v51 = vadd.f32 %v1034_v49, %v1020_v2 }
 0x413   : > { %v1134_v24 = vpop.permute.xlu1 %1133 }
 0x414   : > { %v1036_v15 = vadd.f32 %v1035_v51, %v1021_v57  ;;  %v1132_v49 = vpop.permute.xlu0 %1131  ;;  %v1178_v2 = vsel %vm700_vm1, %v1134_v24, 0 }
 0x415   : > { %v1175_v52 = vsel %vm700_vm1, %v1132_v49, 0 }
 0x416   : > { %v1037_v59 = vrot.slane %v1036_v15, 4 }
 0x417   : > { %v1138_v38 = vpop.permute.xlu1 %1137 }
 0x418   : > { %v1038_v63 = vadd.f32 %v1037_v59, %v1036_v15  ;;  %v1136_v50 = vpop.permute.xlu0 %1135 }
 0x419   : > { %v1181_v15 = vsel %vm700_vm1, %v1136_v50, 0 }
 0x41a   : > { %v1039_v33 = vrot.slane %v1038_v63, 2 }
 0x41b   : > { %v1110_v55 = vpop.permute.xlu1 %1109 }
 0x41c   : > { %v1040_v46 = vadd.f32 %v1039_v33, %v1038_v63  ;;  %v1140_v57 = vpop.permute.xlu0 %1139  ;;  %v1184_v33 = vsel %vm700_vm1, %v1138_v38, 0 }
 0x41e   : > { %v1041_v4 = vrot.slane %v1040_v46, 1 }
 0x41f   : > { %v1114_v51 = vpop.permute.xlu1 %1113 }
 0x420   : > { %v1042_v43 = vadd.f32 %v1041_v4, %v1040_v46  ;;  %v1187_v4 = vsel %vm700_vm1, %v1140_v57, 0 }
 0x422   : > { %v1043_v54 = vpack.c.bf16 %v1042_v43, %v1042_v43 }
 0x423   : > { %v1118_v59 = vpop.permute.xlu1 %1117 }
 0x424   : > { %5677 = vmatmul.mubr.bf16.vlgmr.msra.gmra.mrb[16].mxu0 %v1043_v54 }
 0x425   : > { %5681 = vmatpush3.bf16.xpose.msra.mxu0 %v1166_v45  ;;  %5696 = vmatprep.mubr.msk.bf16.mxu0 %vm700_vm1, %v1110_v55 }
 0x426   : > { %6093 = vmatprep.subr.msk.bf16.mxu0 %vm700_vm1, %v1128_v7 }
 0x427   : > { %v1122_v46 = vpop.permute.xlu1 %1121 }
 0x42b   : > { %v1752_v43 = vpop.permute.xlu1 %1751 }
 0x42c   : > { %v1792_v55 = vsel %vm700_vm1, %v1752_v43, 0 }
 0x42d   : > { %5683 = vmatpush3.bf16.xpose.msra.mxu0 %v1169_v40 }
 0x42e   : > { %6094 = vmatprep.subr.msk.bf16.mxu0 %vm700_vm1, %v1130_v6  ;;  %v1112_v6 = vpop.permute.xlu0 %1111 }
 0x432   : > { %v1116_v63 = vpop.permute.xlu0 %1115 }
 0x435   : > { %5685 = vmatpush3.bf16.xpose.msra.mxu0 %v1172_v1 }
 0x436   : > { %6095 = vmatprep.subr.msk.bf16.mxu0 %vm700_vm1, %v1132_v49 }
 0x43d   : > { %5687 = vmatpush3.bf16.xpose.msra.mxu0 %v1175_v52 }
 0x43e   : > { %6096 = vmatprep.subr.msk.bf16.mxu0 %vm700_vm1, %v1134_v24  ;;  %v1120_v24 = vpop.permute.xlu0 %1119 }
 0x442   : > { %v1124_v54 = vpop.permute.xlu0 %1123 }
 0x445   : > { %5689 = vmatpush3.bf16.xpose.msra.mxu0 %v1178_v2 }
 0x446   : > { %6097 = vmatprep.subr.msk.bf16.mxu0 %vm700_vm1, %v1136_v50  ;;  %v1754_v45 = vpop.permute.xlu0 %1753 }
 0x447   : > { %v1795_v7 = vsel %vm700_vm1, %v1754_v45, 0 }
 0x44a   : > { %v1758_v49 = vpop.permute.xlu0 %1757 }
 0x44b   : > { %v1801_v2 = vsel %vm700_vm1, %v1758_v49, 0 }
 0x44d   : > { %5691 = vmatpush3.bf16.xpose.msra.mxu0 %v1181_v15 }
 0x44e   : > { %6098 = vmatprep.subr.msk.bf16.mxu0 %vm700_vm1, %v1138_v38  ;;  %v1756_v38 = vpop.permute.xlu1 %1755 }
 0x44f   : > { %v1798_v1 = vsel %vm700_vm1, %v1756_v38, 0 }
 0x452   : > { %v1760_v40 = vpop.permute.xlu1 %1759 }
 0x455   : > { %5693 = vmatpush3.bf16.xpose.msra.mxu0 %v1184_v33 }
 0x456   : > { %6099 = vmatprep.subr.msk.bf16.mxu0 %vm700_vm1, %v1140_v57  ;;  %v1764_v52 = vpop.permute.xlu1 %1763  ;;  %v1804_v57 = vsel %vm700_vm1, %v1760_v40, 0 }
 0x45a   : > { %v1736_v50 = vpop.permute.xlu1 %1735 }
 0x45d   : > { %5695 = vmatpush3.bf16.xpose.msra.mxu0 %v1187_v4 }
 0x45e   : > { %6100 = vmatprep.subr.msk.bf16.mxu0 %vm700_vm1, %v1752_v43 }
 0x464   : > { %5697 = vmatmul.mubr.msk.bf16.vlgmr.msra.gmra.mrb[20].mxu0 %vm700_vm1, %v1112_v6  ;;  %v1810_v6 = vsel %vm700_vm1, %v1764_v52, 0 }
 0x465   : > { %5700 = vmatprep.mubr.msk.bf16.mxu0 %vm700_vm1, %v1114_v51  ;;  %5743 = vmatpush3.bf16.xpose.msra.mxu0 %v1792_v55  ;;  %v1762_v51 = vpop.permute.xlu0 %1761 }
 0x466   : > { %6101 = vmatprep.subr.msk.bf16.mxu0 %vm700_vm1, %v1754_v45  ;;  %v1807_v15 = vsel %vm700_vm1, %v1762_v51, 0 }
 0x46c   : > { %5701 = vmatmul.mubr.msk.bf16.gmra.mrb[24].mxu0 %vm700_vm1, %v1116_v63 }
 0x46d   : > { %5704 = vmatprep.mubr.msk.bf16.mxu0 %vm700_vm1, %v1118_v59  ;;  %5745 = vmatpush3.bf16.xpose.msra.mxu0 %v1795_v7  ;;  %v1766_v59 = vpop.permute.xlu0 %1765 }
 0x46e   : > { %6102 = vmatprep.subr.msk.bf16.mxu0 %vm700_vm1, %v1756_v38  ;;  %v1813_v63 = vsel %vm700_vm1, %v1766_v59, 0 }
 0x471   : > { %v1738_v33 = vpop.permute.xlu0 %1737 }
 0x474   : > { %5705 = vmatmul.mubr.msk.bf16.gmra.mrb[28].mxu0 %vm700_vm1, %v1120_v24 }
 0x475   : > { %5708 = vmatprep.mubr.msk.bf16.mxu0 %vm700_vm1, %v1122_v46  ;;  %5747 = vmatpush3.bf16.xpose.msra.mxu0 %v1798_v1  ;;  %v1740_v46 = vpop.permute.xlu1 %1739  ;;  %v1742_v24 = vpop.permute.xlu0 %1741 }
 0x476   : > { %6103 = vmatprep.subr.msk.bf16.mxu0 %vm700_vm1, %v1758_v49 }
 0x479   : > { %v1744_v4 = vpop.permute.xlu1 %1743  ;;  %v1746_v43 = vpop.permute.xlu0 %1745 }
 0x47c   : > { %5709 = vmatmul.mubr.msk.bf16.gmra.mrb[32].mxu0 %vm700_vm1, %v1124_v54 }
 0x47d   : > { %5749 = vmatpush3.bf16.xpose.msra.mxu0 %v1801_v2  ;;  %5758 = vmatprep.mubr.msk.bf16.mxu0 %vm700_vm1, %v1736_v50  ;;  %v1748_v54 = vpop.permute.xlu1 %1747  ;;  %v1750_v55 = vpop.permute.xlu0 %1749 }
 0x47e   : > { %6104 = vmatprep.subr.msk.bf16.mxu0 %vm700_vm1, %v1760_v40 }
 0x485   : > { %5751 = vmatpush3.bf16.xpose.msra.mxu0 %v1804_v57 }
 0x486   : > { %6105 = vmatprep.subr.msk.bf16.mxu0 %vm700_vm1, %v1762_v51 }
 0x48d   : > { %5753 = vmatpush3.bf16.xpose.msra.mxu0 %v1807_v15 }
 0x48e   : > { %6106 = vmatprep.subr.msk.bf16.mxu0 %vm700_vm1, %v1764_v52 }
 0x495   : > { %5755 = vmatpush3.bf16.xpose.msra.mxu0 %v1810_v6 }
 0x496   : > { %6107 = vmatprep.subr.msk.bf16.mxu0 %vm700_vm1, %v1766_v59 }
 0x49d   : > { %5757 = vmatpush3.bf16.xpose.msra.mxu0 %v1813_v63 }
 0x49e   : > { %5831 = vmatprep.subr.bf16.mxu0 %v9383_v11 }
 0x4a4   : > { %5759 = vmatmul.mubr.msk.bf16.vlgmr.msra.gmra.mrb[36].mxu0 %vm700_vm1, %v1738_v33 }
 0x4a5   : > { %5762 = vmatprep.mubr.msk.bf16.mxu0 %vm700_vm1, %v1740_v46 }
 0x4ac   : > { %5763 = vmatmul.mubr.msk.bf16.gmra.mrb[40].mxu0 %vm700_vm1, %v1742_v24 }
 0x4ad   : > { %5766 = vmatprep.mubr.msk.bf16.mxu0 %vm700_vm1, %v1744_v4 }
 0x4b4   : > { %5767 = vmatmul.mubr.msk.bf16.gmra.mrb[44].mxu0 %vm700_vm1, %v1746_v43 }
 0x4b5   : > { %5770 = vmatprep.mubr.msk.bf16.mxu0 %vm700_vm1, %v1748_v54 }
 0x4bc   : > { %5771 = vmatmul.mubr.msk.bf16.gmra.mrb[48].mxu0 %vm700_vm1, %v1750_v55 }
 0x4bd   : > { %5847 = vmatprep.mubr.msk.bf16.mxu0 %vm6848_vm2, %v9383_v11 }
 0x4f7   : > { %v7440_v45 = vpop.f32.mrb[16].mxu0 }
 0x4f8   : > { %9471 = vst [vmem:[#allocation38_spill] sm:$0xff] %v7440_v45  ;;  %v5678_v38 = vpop.f32.mrb[17].mxu0 }
 0x4f9   : > { %v1105_v7 = vpop.f32.mrb[18].mxu0 }
 0x4fa   : > { %v5679_v40 = vpop.f32.mrb[19].mxu0 }
 0x537   : > { %v5698_v1 = vpop.f32.mrb[20].mxu0 }
 0x538   : > { %v1223_v49 = vpop.f32.mrb[21].mxu0  ;;  %v7454_v15 = vadd.f32 %v5698_v1, %v7129_v41 }
 0x539   : > { %v7443_v52 = vadd.f32 %v7129_v41, %v1223_v49  ;;  %v5699_v50 = vpop.f32.mrb[22].mxu0 }
 0x53a   : > { %v1226_v2 = vpop.f32.mrb[23].mxu0  ;;  %v7450_v51 = vadd.f32 %v5699_v50, %v7129_v41 }
 0x53b   : > { %v7446_v57 = vadd.f32 %v7129_v41, %v1226_v2  ;;  %1286 = vmax.xlane.f32.xlu1 %v7443_v52 }
 0x53d   : > { %1288 = vmax.xlane.f32.xlu0 %v7446_v57 }
 0x53f   : > { %1292 = vmax.xlane.f32.xlu1 %v7450_v51  ;;  %v5702_v6 = vpop.f32.mrb[24].mxu0 }
 0x540   : > { %v1239_v59 = vpop.f32.mrb[25].mxu0  ;;  %v7470_v43 = vadd.f32 %v5702_v6, %v7129_v41 }
 0x541   : > { %1290 = vmax.xlane.f32.xlu0 %v7454_v15  ;;  %v5703_v63 = vpop.f32.mrb[26].mxu0  ;;  %v7462_v24 = vadd.f32 %v7129_v41, %v1239_v59 }
 0x542   : > { %v7459_v33 = vadd.f32 %v5703_v63, %v7129_v41  ;;  %v1242_v46 = vpop.f32.mrb[27].mxu0 }
 0x543   : > { %v7467_v4 = vadd.f32 %v7129_v41, %v1242_v46 }
 0x544   : > { %1300 = vmax.xlane.f32.xlu1 %v7459_v33 }
 0x545   : > { %1294 = vmax.xlane.f32.xlu0 %v7462_v24 }
 0x547   : > { %v5706_v54 = vpop.f32.mrb[28].mxu0 }
 0x548   : > { %1296 = vmax.xlane.f32.xlu1 %v7467_v4  ;;  %v1255_v55 = vpop.f32.mrb[29].mxu0  ;;  %v7486_v50 = vadd.f32 %v5706_v54, %v7129_v41 }
 0x549   : > { %1298 = vmax.xlane.f32.xlu0 %v7470_v43  ;;  %v5707_v38 = vpop.f32.mrb[30].mxu0  ;;  %v7478_v1 = vadd.f32 %v7129_v41, %v1255_v55 }
 0x54a   : > { %v7475_v7 = vadd.f32 %v5707_v38, %v7129_v41  ;;  %v1258_v40 = vpop.f32.mrb[31].mxu0 }
 0x54b   : > { %v7483_v49 = vadd.f32 %v7129_v41, %v1258_v40 }
 0x54c   : > { %1308 = vmax.xlane.f32.xlu1 %v7475_v7 }
 0x54d   : > { %1302 = vmax.xlane.f32.xlu0 %v7478_v1 }
 0x54f   : > { %v5710_v2 = vpop.f32.mrb[32].mxu0 }
 0x550   : > { %1304 = vmax.xlane.f32.xlu1 %v7483_v49  ;;  %v1271_v6 = vpop.f32.mrb[33].mxu0  ;;  %v7502_v38 = vadd.f32 %v5710_v2, %v7129_v41 }
 0x551   : > { %1306 = vmax.xlane.f32.xlu0 %v7486_v50  ;;  %v5711_v59 = vpop.f32.mrb[34].mxu0  ;;  %v7494_v55 = vadd.f32 %v7129_v41, %v1271_v6 }
 0x552   : > { %v7491_v63 = vadd.f32 %v5711_v59, %v7129_v41  ;;  %v1274_v46 = vpop.f32.mrb[35].mxu0 }
 0x553   : > { %v7499_v54 = vadd.f32 %v7129_v41, %v1274_v46 }
 0x554   : > { %1316 = vmax.xlane.f32.xlu1 %v7491_v63 }
 0x555   : > { %1310 = vmax.xlane.f32.xlu0 %v7494_v55 }
 0x558   : > { %1312 = vmax.xlane.f32.xlu1 %v7499_v54 }
 0x559   : > { %1314 = vmax.xlane.f32.xlu0 %v7502_v38 }
 0x577   : > { %v7506_v40 = vpop.f32.mrb[36].mxu0 }
 0x578   : > { %v7508_v59 = vpop.f32.mrb[37].mxu0 }
 0x579   : > { %v7510_v6 = vpop.f32.mrb[38].mxu0 }
 0x57a   : > { %v7512_v11 = vpop.f32.mrb[39].mxu0 }
 0x57f   : > { %v7514_v61 = vpop.f32.mrb[40].mxu0 }
 0x580   : > { %v7516_v53 = vpop.f32.mrb[41].mxu0 }
 0x581   : > { %v7518_v46 = vpop.f32.mrb[42].mxu0 }
 0x582   : > { %v7520_v41 = vpop.f32.mrb[43].mxu0 }
 0x587   : > { %v7522_v2 = vpop.f32.mrb[44].mxu0 }
 0x588   : > { %v7524_v45 = vpop.f32.mrb[45].mxu0 }
 0x589   : > { %v7526_v3 = vpop.f32.mrb[46].mxu0 }
 0x58a   : > { %v7528_v13 = vpop.f32.mrb[47].mxu0 }
 0x58f   : > { %v7530_v48 = vpop.f32.mrb[48].mxu0 }
 0x590   : > { %v7532_v62 = vpop.f32.mrb[49].mxu0 }
 0x591   : > { %v7534_v25 = vpop.f32.mrb[50].mxu0 }
 0x592   : > { %v7536_v12 = vpop.f32.mrb[51].mxu0 }
 0x5c8   : > { %v1287_v0 = vpop.xlane.xlu1 %1286 }
 0x5c9   : > { %v1318_v47 = vsub.f32 %v7443_v52, %v1287_v0 }
 0x5ca   : > { %v1289_v14 = vpop.xlane.xlu0 %1288 }
 0x5cb   : > { %v1319_v37 = vsub.f32 %v7446_v57, %v1289_v14  ;;  %v1334_v21 = vmul.f32 1.442695, %v1318_v47 }
 0x5cc   : > { %v1293_v16 = vpop.xlane.xlu1 %1292 }
 0x5cd   : > { %v1321_v32 = vsub.f32 %v7450_v51, %v1293_v16  ;;  %v1336_v30 = vmul.f32 1.442695, %v1319_v37 }
 0x5ce   : > { %v1291_v5 = vpop.xlane.xlu0 %1290 }
 0x5cf   : > { %v1340_v56 = vmul.f32 1.442695, %v1321_v32  ;;  %v1320_v17 = vsub.f32 %v7454_v15, %v1291_v5 }
 0x5d1   : > { %6291 = vpow2.f32 %v1340_v56  ;;  %v1338_v34 = vmul.f32 1.442695, %v1320_v17  ;;  %v1301_v10 = vpop.xlane.xlu1 %1300 }
 0x5d2   : > { %v1325_v20 = vsub.f32 %v7459_v33, %v1301_v10  ;;  %v1295_v18 = vpop.xlane.xlu0 %1294 }
 0x5d3   : > { %6293 = vpow2.f32 %v1338_v34  ;;  %v1322_v32 = vsub.f32 %v7462_v24, %v1295_v18 }
 0x5d4   : > { %6295 = vpow2.f32 %v1336_v30  ;;  %v1348_v39 = vmul.f32 1.442695, %v1325_v20 }
 0x5d5   : > { %v1297_v14 = vpop.xlane.xlu1 %1296  ;;  %6297 = vpow2.f32 %v1334_v21  ;;  %v1342_v34 = vmul.f32 1.442695, %v1322_v32 }
 0x5d6   : > { %v1323_v16 = vsub.f32 %v7467_v4, %v1297_v14  ;;  %v1299_v57 = vpop.xlane.xlu0 %1298  ;;  %6299 = vpow2.f32 %v1348_v39 }
 0x5d7   : > { %v1324_v5 = vsub.f32 %v7470_v43, %v1299_v57 }
 0x5d8   : > { %v1344_v37 = vmul.f32 1.442695, %v1323_v16 }
 0x5d9   : > { %v1346_v56 = vmul.f32 1.442695, %v1324_v5  ;;  %v1309_v0 = vpop.xlane.xlu1 %1308 }
 0x5da   : > { %v1329_v10 = vsub.f32 %v7475_v7, %v1309_v0  ;;  %v1303_v17 = vpop.xlane.xlu0 %1302 }
 0x5db   : > { %v7547_v47 = vpop.eup %6291  ;;  %6301 = vpow2.f32 %v1346_v56  ;;  %v1326_v51 = vsub.f32 %v7478_v1, %v1303_v17 }
 0x5dc   : > { %1372 = vadd.xlane.f32.xlu1 %v7547_v47  ;;  %6303 = vpow2.f32 %v1344_v37  ;;  %v1356_v21 = vmul.f32 1.442695, %v1329_v10 }
 0x5dd   : > { %v7550_v20 = vpop.eup %6293  ;;  %v1305_v18 = vpop.xlane.xlu1 %1304  ;;  %6305 = vpow2.f32 %v1342_v34 }
 0x5de   : > { %v1327_v30 = vsub.f32 %v7483_v49, %v1305_v18  ;;  %1370 = vadd.xlane.f32.xlu0 %v7550_v20  ;;  %v1307_v39 = vpop.xlane.xlu0 %1306  ;;  %v7554_v52 = vpop.eup %6295  ;;  %6307 = vpow2.f32 %v1356_v21  ;;  %v1350_v49 = vmul.f32 1.442695, %v1326_v51 }
 0x5df   : > { %v1328_v15 = vsub.f32 %v7486_v50, %v1307_v39  ;;  %v7559_v33 = vpop.eup %6297 }
 0x5e0   : > { %1368 = vadd.xlane.f32.xlu1 %v7554_v52  ;;  %v1352_v24 = vmul.f32 1.442695, %v1327_v30  ;;  %v7562_v7 = vpop.eup %6299 }
 0x5e1   : > { %v1354_v4 = vmul.f32 1.442695, %v1328_v15  ;;  %v1317_v34 = vpop.xlane.xlu1 %1316 }
 0x5e2   : > { %1366 = vadd.xlane.f32.xlu0 %v7559_v33  ;;  %v1311_v43 = vpop.xlane.xlu0 %1310  ;;  %v1333_v21 = vsub.f32 %v7491_v63, %v1317_v34  ;;  %v6743_v63 = vld [vmem:[%s7126_s14] ss:$0 sm:$0xff] }
 0x5e3   : > { %6309 = vpow2.f32 %v1354_v4  ;;  %v1330_v16 = vsub.f32 %v7494_v55, %v1311_v43  ;;  %v7610_v4 = vadd.f32 %v6743_v63, %v7512_v11  ;;  %v7619_v43 = vadd.f32 %v6743_v63, %v7516_v53 }
 0x5e4   : > { %1380 = vadd.xlane.f32.xlu1 %v7562_v7  ;;  %6311 = vpow2.f32 %v1352_v24  ;;  %v1364_v30 = vmul.f32 1.442695, %v1333_v21  ;;  %v7628_v11 = vadd.f32 %v6743_v63, %v7524_v45  ;;  %v7636_v53 = vadd.f32 %v6743_v63, %v7532_v62 }
 0x5e5   : > { %v7565_v14 = vpop.eup %6301  ;;  %6313 = vpow2.f32 %v1350_v49  ;;  %v1358_v56 = vmul.f32 1.442695, %v1330_v16  ;;  %v1313_v18 = vpop.xlane.xlu1 %1312  ;;  %v7624_v49 = vadd.f32 %v6743_v63, %v7514_v61  ;;  %v7640_v61 = vadd.f32 %v6743_v63, %v7530_v48 }
 0x5e6   : > { %1378 = vadd.xlane.f32.xlu0 %v7565_v14  ;;  %v1315_v1 = vpop.xlane.xlu0 %1314  ;;  %v7568_v50 = vpop.eup %6303  ;;  %v1331_v39 = vsub.f32 %v7499_v54, %v1313_v18  ;;  %v7614_v54 = vadd.f32 %v6743_v63, %v7506_v40  ;;  %v7632_v40 = vadd.f32 %v6743_v63, %v7522_v2  ;;  %v7644_v45 = vadd.f32 %v6743_v63, %v7508_v59 }
 0x5e7   : > { %v1332_v57 = vsub.f32 %v7502_v38, %v1315_v1  ;;  %v7573_v32 = vpop.eup %6305  ;;  %v7648_v2 = vadd.f32 %v6743_v63, %v7510_v6  ;;  %v7652_v16 = vadd.f32 %v6743_v63, %v7520_v41  ;;  %v7660_v6 = vadd.f32 %v6743_v63, %v7528_v13 }
 0x5e8   : > { %1376 = vadd.xlane.f32.xlu1 %v7568_v50  ;;  %v7576_v37 = vpop.eup %6307  ;;  %v1360_v51 = vmul.f32 1.442695, %v1331_v39  ;;  %v7664_v41 = vadd.f32 %v6743_v63, %v7526_v3  ;;  %v7672_v13 = vadd.f32 %v6743_v63, %v7534_v25 }
 0x5e9   : > { %v1362_v5 = vmul.f32 1.442695, %v1332_v57 }
 0x5ea   : > { %1374 = vadd.xlane.f32.xlu0 %v7573_v32 }
 0x5eb   : > { %6315 = vpow2.f32 %v1362_v5  ;;  %v7656_v5 = vadd.f32 %v6743_v63, %v7518_v46  ;;  %v7668_v46 = vadd.f32 %v6743_v63, %v7536_v12  ;;  %v9473_v12 = vmov 0.0  }
 0x5ec   : > { %1388 = vadd.xlane.f32.xlu1 %v7576_v37  ;;  %6317 = vpow2.f32 %v1358_v56 }
 0x5ed   : > { %v7579_v0 = vpop.eup %6309  ;;  %6319 = vpow2.f32 %v1364_v30  ;;  %9472 = vst [vmem:[#allocation39_spill] sm:$0xff] %v7668_v46 }
 0x5ee   : > { %1386 = vadd.xlane.f32.xlu0 %v7579_v0  ;;  %v7582_v55 = vpop.eup %6311  ;;  %6321 = vpow2.f32 %v1360_v51 }
 0x5ef   : > { %v7585_v38 = vpop.eup %6313 }
 0x5f0   : > { %1384 = vadd.xlane.f32.xlu1 %v7582_v55 }
 0x5f2   : > { %1382 = vadd.xlane.f32.xlu0 %v7585_v38 }
 0x5f5   : > { %v7588_v10 = vpop.eup %6315 }
 0x5f6   : > { %1394 = vadd.xlane.f32.xlu0 %v7588_v10  ;;  %v7591_v17 = vpop.eup %6317 }
 0x5f7   : > { %v7602_v15 = vpop.eup %6319 }
 0x5f8   : > { %v7605_v24 = vpop.eup %6321 }
 0x5fa   : > { %1390 = vadd.xlane.f32.xlu0 %v7591_v17 }
 0x601   : > { %1518 = vrot.lane.b32.xlu1 %v7002_v26, %s6851_s23 }
 0x605   : > { %1520 = vrot.lane.b32.xlu1 %v7020_v44, %s6851_s23 }
 0x610   : > { %1516 = vrot.lane.b32.xlu0 %v7004_v28, %s6851_s23 }
 0x614   : > { %1522 = vrot.lane.b32.xlu0 %v7018_v42, %s6851_s23 }
 0x618   : > { %1526 = vrot.lane.b32.xlu0 %v7032_v58, %s6851_s23 }
 0x61c   : > { %1530 = vrot.lane.b32.xlu0 %v7040_v8, %s6851_s23 }
 0x629   : > { %1396 = vadd.xlane.f32.xlu1 %v7602_v15 }
 0x62d   : > { %1392 = vadd.xlane.f32.xlu1 %v7605_v24 }
 0x63b   : > { %1914 = vmax.xlane.f32.xlu0 %v7610_v4 }
 0x63e   : > { %1524 = vrot.lane.b32.xlu1 %v7034_v60, %s6851_s23 }
 0x63f   : > { %1916 = vmax.xlane.f32.xlu0 %v7614_v54 }
 0x642   : > { %1528 = vrot.lane.b32.xlu1 %v7042_v9, %s6851_s23  ;;  %s6855_s23 = smov 52  }
 0x643   : > { %1920 = vmax.xlane.f32.xlu0 %v7619_v43 }
 0x647   : > { %1924 = vmax.xlane.f32.xlu0 %v7624_v49 }
 0x64b   : > { %1928 = vmax.xlane.f32.xlu0 %v7628_v11 }
 0x64f   : > { %1932 = vmax.xlane.f32.xlu0 %v7632_v40 }
 0x653   : > { %1936 = vmax.xlane.f32.xlu0 %v7636_v53 }
 0x657   : > { %1940 = vmax.xlane.f32.xlu0 %v7640_v61 }
 0x666   : > { %1912 = vmax.xlane.f32.xlu1 %v7644_v45 }
 0x669   : > { %v1373_v1 = vpop.xlane.xlu1 %1372 }
 0x66a   : > { %1918 = vmax.xlane.f32.xlu1 %v7648_v2 }
 0x66b   : > { %v1371_v62 = vpop.xlane.xlu0 %1370 }
 0x66d   : > { %v1369_v48 = vpop.xlane.xlu1 %1368 }
 0x66e   : > { %1922 = vmax.xlane.f32.xlu1 %v7652_v16 }
 0x66f   : > { %v1367_v57 = vpop.xlane.xlu0 %1366 }
 0x670   : > { %6323 = vrcp.f32 %v1367_v57 }
 0x671   : > { %v1381_v56 = vpop.xlane.xlu1 %1380  ;;  %6325 = vrcp.f32 %v1369_v48 }
 0x672   : > { %1926 = vmax.xlane.f32.xlu1 %v7656_v5  ;;  %6327 = vrcp.f32 %v1371_v62 }
 0x673   : > { %v1379_v59 = vpop.xlane.xlu0 %1378  ;;  %6329 = vrcp.f32 %v1373_v1 }
 0x675   : > { %v1377_v21 = vpop.xlane.xlu1 %1376 }
 0x676   : > { %1930 = vmax.xlane.f32.xlu1 %v7660_v6 }
 0x677   : > { %v1375_v34 = vpop.xlane.xlu0 %1374 }
 0x678   : > { %6331 = vrcp.f32 %v1375_v34 }
 0x679   : > { %v1389_v39 = vpop.xlane.xlu1 %1388  ;;  %6333 = vrcp.f32 %v1377_v21 }
 0x67a   : > { %1934 = vmax.xlane.f32.xlu1 %v7664_v41  ;;  %v6324_v25 = vpop.eup %6323  ;;  %6335 = vrcp.f32 %v1379_v59 }
 0x67b   : > { %v1387_v18 = vpop.xlane.xlu0 %1386  ;;  %v7681_v57 = vmul.f32 %v6324_v25, %v7559_v33  ;;  %6337 = vrcp.f32 %v1381_v56 }
 0x67d   : > { %v1385_v3 = vpop.xlane.xlu1 %1384 }
 0x67e   : > { %1938 = vmax.xlane.f32.xlu1 %v7668_v46  ;;  %v6326_v46 = vpop.eup %6325 }
 0x67f   : > { %v1383_v30 = vpop.xlane.xlu0 %1382  ;;  %v6328_v62 = vpop.eup %6327 }
 0x680   : > { %v6330_v1 = vpop.eup %6329  ;;  %v7690_v34 = vmul.f32 %v6328_v62, %v7550_v20  ;;  %6339 = vrcp.f32 %v1383_v30 }
 0x681   : > { %v1519_v8 = vpop.permute.xlu1 %1518  ;;  %6341 = vrcp.f32 %v1385_v3 }
 0x682   : > { %1942 = vmax.xlane.f32.xlu1 %v7672_v13  ;;  %v6332_v25 = vpop.eup %6331  ;;  %v1480_v21 = vmul.f32 %v7690_v34, %v7083_v23  ;;  %6343 = vrcp.f32 %v1387_v18 }
 0x683   : > { %v7675_v51 = vpop.xlane.xlu0 %1394  ;;  %6345 = vrcp.f32 %v1389_v39  ;;  %v9475_v39 = vld [vmem:[#allocation17_spill] sm:$0xff] }
 0x685   : > { %v1521_v63 = vpop.permute.xlu1 %1520 }
 0x687   : > { %v1391_v9 = vpop.xlane.xlu0 %1390 }
 0x688   : > { %6347 = vrcp.f32 %v1391_v9 }
 0x689   : > { %6349 = vrcp.f32 %v7675_v51 }
 0x68b   : > { %v1517_v60 = vpop.permute.xlu0 %1516 }
 0x68c   : > { %5713 = vmatpush3.bf16.msra.mxu1 %v1517_v60  ;;  %v7684_v60 = vmul.f32 %v6326_v46, %v7554_v52  ;;  %v7695_v52 = vmul.f32 %v6330_v1, %v7547_v47  ;;  %v7700_v46 = vmul.f32 %v6332_v25, %v7573_v32 }
 0x68d   : > { %5714 = vmatprep.subr.bf16.mxu1 %v9473_v12 }
 0x68e   : > { %v1479_v33 = vmul.f32 %v7684_v60, %v7185_v19  ;;  %v1481_v20 = vmul.f32 %v7695_v52, %v7087_v27  ;;  %v1482_v59 = vmul.f32 %v7700_v46, %v7089_v29 }
 0x68f   : > { %v1523_v48 = vpop.permute.xlu0 %1522 }
 0x690   : > { %5715 = vmatpush3.bf16.msra.mxu1 %v1519_v8  ;;  %v1478_v8 = vmul.f32 %v7681_v57, %v7081_v22  ;;  %v6334_v22 = vpop.eup %6333 }
 0x691   : > { %5716 = vmatprep.subr.bf16.mxu1 %v9473_v12  ;;  %v7707_v62 = vmul.f32 %v6334_v22, %v7568_v50 }
 0x693   : > { %v1483_v56 = vmul.f32 %v7707_v62, %v7093_v31 }
 0x694   : > { %5717 = vmatpush3.bf16.msra.mxu1 %v1521_v63  ;;  %v1494_v63 = vadd.f32 %v1479_v33, %v1478_v8  ;;  %v6336_v8 = vpop.eup %6335 }
 0x695   : > { %5718 = vmatprep.subr.bf16.mxu1 %v9473_v12  ;;  %v7710_v32 = vmul.f32 %v6336_v8, %v7565_v14  ;;  %v6338_v30 = vpop.eup %6337 }
 0x696   : > { %v6340_v25 = vpop.eup %6339 }
 0x697   : > { %v1484_v22 = vmul.f32 %v7710_v32, %v7098_v35  ;;  %v6342_v3 = vpop.eup %6341 }
 0x698   : > { %5719 = vmatpush3.bf16.msra.mxu1 %v1523_v48  ;;  %v1495_v48 = vadd.f32 %v1494_v63, %v1480_v21  ;;  %v7715_v63 = vmul.f32 %v6338_v30, %v7562_v7  ;;  %v7720_v21 = vmul.f32 %v6340_v25, %v7585_v38  ;;  %v7727_v7 = vmul.f32 %v6342_v3, %v7582_v55  ;;  %v9476_v25 = vld [vmem:[#allocation15_spill] sm:$0xff]  ;;  %v9477_v3 = vld [vmem:[#allocation16_spill] sm:$0xff] }
 0x699   : > { %5720 = vmatprep.subr.bf16.mxu1 %v9473_v12 }
 0x69a   : > { %v1496_v47 = vadd.f32 %v1495_v48, %v1481_v20  ;;  %v1485_v14 = vmul.f32 %v7715_v63, %v7100_v36  ;;  %v9474_v20 = vld [vmem:[#allocation14_spill] sm:$0xff] }
 0x69b   : > { %v1486_v18 = vmul.f32 %v7720_v21, %v9474_v20 }
 0x69c   : > { %v1497_v1 = vadd.f32 %v1496_v47, %v1482_v59  ;;  %v6344_v47 = vpop.eup %6343 }
 0x69d   : > { %v7731_v38 = vmul.f32 %v6344_v47, %v7579_v0  ;;  %v9478_v47 = vld [vmem:[#allocation18_spill] sm:$0xff] }
 0x69e   : > { %v1498_v33 = vadd.f32 %v1497_v1, %v1483_v56  ;;  %v1487_v1 = vmul.f32 %v7727_v7, %v9475_v39  ;;  %v6346_v56 = vpop.eup %6345 }
 0x69f   : > { %v7736_v55 = vmul.f32 %v6346_v56, %v7576_v37 }
 0x6a0   : > { %v1499_v50 = vadd.f32 %v1498_v33, %v1484_v22  ;;  %v6348_v33 = vpop.eup %6347  ;;  %v1488_v22 = vmul.f32 %v7731_v38, %v9476_v25 }
 0x6a2   : > { %v1500_v48 = vadd.f32 %v1499_v50, %v1485_v14  ;;  %v1527_v50 = vpop.permute.xlu0 %1526  ;;  %v7741_v14 = vmul.f32 %v6348_v33, %v7591_v17 }
 0x6a4   : > { %v1501_v8 = vadd.f32 %v1500_v48, %v1486_v18  ;;  %v1489_v48 = vmul.f32 %v7736_v55, %v9477_v3  ;;  %v6350_v18 = vpop.eup %6349 }
 0x6a5   : > { %v7750_v56 = vmul.f32 %v6350_v18, %v7588_v10  ;;  %v9482_v18 = vld [vmem:[#allocation31_spill] sm:$0xff] }
 0x6a6   : > { %v1502_v30 = vadd.f32 %v1501_v8, %v1487_v1  ;;  %v1490_v8 = vmul.f32 %v7741_v14, %v9478_v47  ;;  %v1531_v1 = vpop.permute.xlu0 %1530 }
 0x6a8   : > { %v1503_v0 = vadd.f32 %v1502_v30, %v1488_v22 }
 0x6aa   : > { %v1504_v37 = vadd.f32 %v1503_v0, %v1489_v48  ;;  %v9481_v48 = vld [vmem:[#allocation32_spill] sm:$0xff] }
 0x6ab   : > { %v1492_v47 = vmul.f32 %v7750_v56, %v9481_v48 }
 0x6ac   : > { %v1505_v33 = vadd.f32 %v1504_v37, %v1490_v8 }
 0x6b6   : > { %v1397_v59 = vpop.xlane.xlu1 %1396 }
 0x6b7   : > { %6351 = vrcp.f32 %v1397_v59 }
 0x6ba   : > { %v1393_v9 = vpop.xlane.xlu1 %1392 }
 0x6bb   : > { %6353 = vrcp.f32 %v1393_v9 }
 0x6be   : > { %v1525_v51 = vpop.permute.xlu1 %1524 }
 0x6bf   : > { %5721 = vmatpush3.bf16.msra.mxu1 %v1525_v51 }
 0x6c0   : > { %5722 = vmatprep.subr.bf16.mxu1 %v9473_v12 }
 0x6c1   : > { %v6352_v59 = vpop.eup %6351 }
 0x6c2   : > { %v1529_v30 = vpop.permute.xlu1 %1528  ;;  %v7756_v22 = vmul.f32 %v6352_v59, %v7602_v15 }
 0x6c3   : > { %5723 = vmatpush3.bf16.msra.mxu1 %v1527_v50  ;;  %v9480_v50 = vld [vmem:[#allocation29_spill] sm:$0xff] }
 0x6c4   : > { %5724 = vmatprep.subr.bf16.mxu1 %v9473_v12 }
 0x6c5   : > { %v6354_v9 = vpop.eup %6353 }
 0x6c6   : > { %v7753_v17 = vmul.f32 %v6354_v9, %v7605_v24  ;;  %v1493_v24 = vmul.f32 %v7756_v22, %v9482_v18 }
 0x6c7   : > { %5725 = vmatpush3.bf16.msra.mxu1 %v1529_v30 }
 0x6c8   : > { %9479 = vst [vmem:[#allocation40_spill] sm:$0xff] %v7753_v17  ;;  %v1491_v51 = vmul.f32 %v7753_v17, %v9480_v50  ;;  %v1915_v0 = vpop.xlane.xlu0 %1914  ;;  %5726 = vmatprep.subr.bf16.mxu1 %v9473_v12 }
 0x6ca   : > { %v1506_v10 = vadd.f32 %v1505_v33, %v1491_v51 }
 0x6cb   : > { %5727 = vmatpush3.bf16.msra.mxu1 %v1531_v1 }
 0x6cc   : > { %v1507_v9 = vadd.f32 %v1506_v10, %v1492_v47  ;;  %v1917_v30 = vpop.xlane.xlu0 %1916  ;;  %5732 = vmatprep.subr.mxu1 %v9473_v12 }
 0x6cd   : > { %v1946_v15 = vsub.f32 %v7614_v54, %v1917_v30 }
 0x6ce   : > { %v1508_v59 = vadd.f32 %v1507_v9, %v1493_v24 }
 0x6cf   : > { %v1964_v37 = vmul.f32 1.442695, %v1946_v15 }
 0x6d0   : > { %v1509_v8 = vrot.slane %v1508_v59, 4  ;;  %v1921_v47 = vpop.xlane.xlu0 %1920 }
 0x6d1   : > { %6355 = vpow2.f32 %v1964_v37 }
 0x6d2   : > { %v1510_v50 = vadd.f32 %v1509_v8, %v1508_v59 }
 0x6d4   : > { %v1511_v17 = vrot.slane %v1510_v50, 2  ;;  %v1925_v54 = vpop.xlane.xlu0 %1924 }
 0x6d5   : > { %v1950_v10 = vsub.f32 %v7624_v49, %v1925_v54 }
 0x6d6   : > { %v1512_v3 = vadd.f32 %v1511_v17, %v1510_v50 }
 0x6d8   : > { %v1513_v25 = vrot.slane %v1512_v3, 1  ;;  %v1929_v51 = vpop.xlane.xlu0 %1928 }
 0x6da   : > { %v1514_v48 = vadd.f32 %v1513_v25, %v1512_v3  ;;  %v1945_v25 = vsub.f32 %v7610_v4, %v1915_v0  ;;  %v1972_v3 = vmul.f32 1.442695, %v1950_v10 }
 0x6db   : > { %v7767_v33 = vpop.eup %6355 }
 0x6dc   : > { %1996 = vadd.xlane.f32.xlu0 %v7767_v33  ;;  %v1515_v1 = vpack.c.bf16 %v1514_v48, %v1514_v48  ;;  %v1933_v9 = vpop.xlane.xlu0 %1932  ;;  %v1948_v48 = vsub.f32 %v7619_v43, %v1921_v47  ;;  %v1962_v8 = vmul.f32 1.442695, %v1945_v25 }
 0x6dd   : > { %v1954_v49 = vsub.f32 %v7632_v40, %v1933_v9 }
 0x6de   : > { %5729 = vmatmul.mubr.bf16.vlgmr.msra.gmra.mrb[16].mxu1 %v1515_v1  ;;  %v1968_v54 = vmul.f32 1.442695, %v1948_v48 }
 0x6df   : > { %5734 = vmatprep.mubr.msk.f32.mxu1 %vm6848_vm2, %v9473_v12  ;;  %v1980_v4 = vmul.f32 1.442695, %v1954_v49 }
 0x6e0   : > { %v1937_v59 = vpop.xlane.xlu0 %1936 }
 0x6e4   : > { %v1941_v10 = vpop.xlane.xlu0 %1940 }
 0x6e5   : > { %v1958_v40 = vsub.f32 %v7640_v61, %v1941_v10  ;;  %v9483_v10 = vld [vmem:[#allocation9_spill] sm:$0xff] }
 0x6f3   : > { %v1913_v24 = vpop.xlane.xlu1 %1912 }
 0x6f4   : > { %v1944_v17 = vsub.f32 %v7644_v45, %v1913_v24  ;;  %v1952_v45 = vsub.f32 %v7628_v11, %v1929_v51 }
 0x6f6   : > { %v1960_v50 = vmul.f32 1.442695, %v1944_v17  ;;  %v1976_v17 = vmul.f32 1.442695, %v1952_v45 }
 0x6f7   : > { %v1919_v30 = vpop.xlane.xlu1 %1918 }
 0x6f8   : > { %6357 = vpow2.f32 %v1960_v50  ;;  %v1947_v15 = vsub.f32 %v7648_v2, %v1919_v30 }
 0x6f9   : > { %6359 = vpow2.f32 %v1972_v3 }
 0x6fa   : > { %v1966_v37 = vmul.f32 1.442695, %v1947_v15 }
 0x6fb   : > { %v1923_v1 = vpop.xlane.xlu1 %1922 }
 0x6fc   : > { %6361 = vpow2.f32 %v1966_v37  ;;  %v1949_v43 = vsub.f32 %v7652_v16, %v1923_v1  ;;  %v1956_v16 = vsub.f32 %v7636_v53, %v1937_v59 }
 0x6fd   : > { %6363 = vpow2.f32 %v1962_v8 }
 0x6fe   : > { %6365 = vpow2.f32 %v1968_v54  ;;  %v1970_v50 = vmul.f32 1.442695, %v1949_v43  ;;  %v1984_v37 = vmul.f32 1.442695, %v1956_v16  ;;  %v9485_v16 = vld [vmem:[#allocation8_spill] sm:$0xff] }
 0x6ff   : > { %v1927_v0 = vpop.xlane.xlu1 %1926  ;;  %6367 = vpow2.f32 %v1980_v4  ;;  %v5266_v4 = vld [vmem:[%s9378_s5 + $0x4] sm:$0xf] }
 0x700   : > { %v1951_v2 = vsub.f32 %v7656_v5, %v1927_v0  ;;  %v1988_v5 = vmul.f32 1.442695, %v1958_v40  ;;  %5733 = vmatpush3.msk.msra.mxu1 %vm1585_vm3, %v5266_v4 }
 0x701   : > { %5737 = vmatprep.subr.mxu1 %v9473_v12 }
 0x702   : > { %v7781_v47 = vpop.eup %6357  ;;  %v1974_v24 = vmul.f32 1.442695, %v1951_v2 }
 0x703   : > { %v1931_v9 = vpop.xlane.xlu1 %1930  ;;  %1992 = vadd.xlane.f32.xlu0 %v7781_v47  ;;  %v7785_v11 = vpop.eup %6359 }
 0x704   : > { %6369 = vpow2.f32 %v1974_v24  ;;  %v1953_v61 = vsub.f32 %v7660_v6, %v1931_v9  ;;  %v9484_v24 = vld [vmem:[#allocation39_spill] sm:$0xff] }
 0x705   : > { %6371 = vpow2.f32 %v1976_v17 }
 0x706   : > { %v7787_v51 = vpop.eup %6361  ;;  %6373 = vpow2.f32 %v1970_v50  ;;  %v1978_v53 = vmul.f32 1.442695, %v1953_v61 }
 0x707   : > { %1998 = vadd.xlane.f32.xlu1 %v7787_v51  ;;  %v1935_v25 = vpop.xlane.xlu1 %1934  ;;  %2004 = vadd.xlane.f32.xlu0 %v7785_v11  ;;  %v7794_v30 = vpop.eup %6363  ;;  %6375 = vpow2.f32 %v1988_v5 }
 0x708   : > { %v1955_v3 = vsub.f32 %v7664_v41, %v1935_v25  ;;  %v7796_v48 = vpop.eup %6365  ;;  %v9486_v25 = vld [vmem:[#allocation10_spill] sm:$0xff] }
 0x709   : > { %v7800_v59 = vpop.eup %6367 }
 0x70a   : > { %v1982_v15 = vmul.f32 1.442695, %v1955_v3  ;;  %v9487_v3 = vld [vmem:[#allocation21_spill] sm:$0xff] }
 0x70b   : > { %1994 = vadd.xlane.f32.xlu1 %v7794_v30  ;;  %2000 = vadd.xlane.f32.xlu0 %v7796_v48  ;;  %v1939_v0 = vpop.xlane.xlu1 %1938 }
 0x70c   : > { %6377 = vpow2.f32 %v1982_v15  ;;  %v1957_v17 = vsub.f32 %v9484_v24, %v1939_v0  ;;  %v1448_v15 = vadd.f32 %v7690_v34, %v9487_v3  ;;  %v9488_v24 = vld [vmem:[#allocation20_spill] sm:$0xff] }
 0x70d   : > { %6379 = vpow2.f32 %v1984_v37 }
 0x70e   : > { %v7802_v8 = vpop.eup %6369  ;;  %6381 = vpow2.f32 %v1978_v53  ;;  %v1986_v9 = vmul.f32 1.442695, %v1957_v17  ;;  %v1446_v17 = vadd.f32 %v7681_v57, %v9488_v24 }
 0x70f   : > { %2006 = vadd.xlane.f32.xlu1 %v7802_v8  ;;  %2012 = vadd.xlane.f32.xlu0 %v7800_v59  ;;  %v7806_v6 = vpop.eup %6371  ;;  %v1943_v43 = vpop.xlane.xlu1 %1942 }
 0x710   : > { %v7808_v41 = vpop.eup %6373  ;;  %v1959_v2 = vsub.f32 %v7672_v13, %v1943_v43 }
 0x711   : > { %v7812_v49 = vpop.eup %6375 }
 0x712   : > { %v1990_v40 = vmul.f32 1.442695, %v1959_v2 }
 0x713   : > { %2002 = vadd.xlane.f32.xlu1 %v7808_v41  ;;  %2008 = vadd.xlane.f32.xlu0 %v7806_v6 }
 0x714   : > { %6383 = vpow2.f32 %v1990_v40 }
 0x715   : > { %6385 = vpow2.f32 %v1986_v9 }
 0x716   : > { %v7814_v1 = vpop.eup %6377 }
 0x717   : > { %2014 = vadd.xlane.f32.xlu1 %v7814_v1  ;;  %2020 = vadd.xlane.f32.xlu0 %v7812_v49  ;;  %v7818_v54 = vpop.eup %6379 }
 0x718   : > { %v7820_v45 = vpop.eup %6381 }
 0x71b   : > { %2010 = vadd.xlane.f32.xlu1 %v7820_v45  ;;  %2016 = vadd.xlane.f32.xlu0 %v7818_v54 }
 0x71e   : > { %v7848_v50 = vpop.eup %6383 }
 0x71f   : > { %v7852_v13 = vpop.eup %6385 }
 0x72c   : > { %2144 = vrot.lane.b32.xlu1 %v7002_v26, %s6852_s24 }
 0x730   : > { %2146 = vrot.lane.b32.xlu1 %v7020_v44, %s6852_s24 }
 0x731   : > { %2142 = vrot.lane.b32.xlu0 %v7004_v28, %s6852_s24 }
 0x735   : > { %2148 = vrot.lane.b32.xlu0 %v7018_v42, %s6852_s24 }
 0x739   : > { %2152 = vrot.lane.b32.xlu0 %v7032_v58, %s6852_s24 }
 0x73d   : > { %2156 = vrot.lane.b32.xlu0 %v9483_v10, %s6852_s24 }
 0x741   : > { %2303 = vrot.lane.b32.xlu0 %v7002_v26, %s6853_s28 }
 0x745   : > { %2307 = vrot.lane.b32.xlu0 %v7018_v42, %s6853_s28 }
 0x749   : > { %2311 = vrot.lane.b32.xlu0 %v7032_v58, %s6853_s28 }
 0x74d   : > { %2315 = vrot.lane.b32.xlu0 %v9483_v10, %s6853_s28 }
 0x751   : > { %2287 = vrot.lane.b32.xlu0 %v7002_v26, %s6854_s29 }
 0x754   : > { %2022 = vadd.xlane.f32.xlu1 %v7848_v50 }
 0x755   : > { %2291 = vrot.lane.b32.xlu0 %v7018_v42, %s6854_s29 }
 0x758   : > { %2018 = vadd.xlane.f32.xlu1 %v7852_v13 }
 0x759   : > { %2295 = vrot.lane.b32.xlu0 %v7032_v58, %s6854_s29 }
 0x75d   : > { %2299 = vrot.lane.b32.xlu0 %v9483_v10, %s6854_s29 }
 0x769   : > { %2150 = vrot.lane.b32.xlu1 %v9485_v16, %s6852_s24  ;;  %v1997_v5 = vpop.xlane.xlu0 %1996 }
 0x76a   : > { %6387 = vrcp.f32 %v1997_v5 }
 0x76d   : > { %2154 = vrot.lane.b32.xlu1 %v9486_v25, %s6852_s24  ;;  %s6856_s24 = smov 80  }
 0x771   : > { %2301 = vrot.lane.b32.xlu1 %v7004_v28, %s6853_s28 }
 0x774   : > { %v6388_v61 = vpop.eup %6387 }
 0x775   : > { %v7865_v37 = vmul.f32 %v6388_v61, %v7767_v33  ;;  %2305 = vrot.lane.b32.xlu1 %v7020_v44, %s6853_s28 }
 0x777   : > { %v7869_v53 = vadd.f32 %v7865_v37, %v1448_v15 }
 0x779   : > { %2309 = vrot.lane.b32.xlu1 %v9485_v16, %s6853_s28 }
 0x77d   : > { %2313 = vrot.lane.b32.xlu1 %v9486_v25, %s6853_s28  ;;  %s6868_s28 = smov [#allocation2]  }
 0x781   : > { %2285 = vrot.lane.b32.xlu1 %v7004_v28, %s6854_s29 }
 0x785   : > { %2289 = vrot.lane.b32.xlu1 %v7020_v44, %s6854_s29 }
 0x789   : > { %2293 = vrot.lane.b32.xlu1 %v9485_v16, %s6854_s29 }
 0x78d   : > { %2297 = vrot.lane.b32.xlu1 %v9486_v25, %s6854_s29  ;;  %s6858_s29 = smov 48  }
 0x790   : > { %v1993_v34 = vpop.xlane.xlu0 %1992 }
 0x791   : > { %6389 = vrcp.f32 %v1993_v34  ;;  %v9489_v34 = vld [vmem:[#allocation22_spill] sm:$0xff] }
 0x794   : > { %v1999_v33 = vpop.xlane.xlu1 %1998  ;;  %v2005_v4 = vpop.xlane.xlu0 %2004 }
 0x795   : > { %6391 = vrcp.f32 %v1999_v33  ;;  %v1449_v33 = vadd.f32 %v7695_v52, %v9489_v34 }
 0x796   : > { %6393 = vrcp.f32 %v2005_v4 }
 0x798   : > { %v1995_v0 = vpop.xlane.xlu1 %1994  ;;  %v2001_v43 = vpop.xlane.xlu0 %2000 }
 0x799   : > { %6395 = vrcp.f32 %v1995_v0 }
 0x79a   : > { %6397 = vrcp.f32 %v2001_v43  ;;  %v9490_v43 = vld [vmem:[#allocation25_spill] sm:$0xff] }
 0x79b   : > { %v6390_v2 = vpop.eup %6389 }
 0x79c   : > { %v7880_v40 = vmul.f32 %v6390_v2, %v7781_v47  ;;  %v2007_v9 = vpop.xlane.xlu1 %2006  ;;  %v2013_v5 = vpop.xlane.xlu0 %2012  ;;  %v1452_v47 = vadd.f32 %v7710_v32, %v9490_v43 }
 0x79d   : > { %6399 = vrcp.f32 %v2007_v9 }
 0x79e   : > { %v7883_v61 = vadd.f32 %v7880_v40, %v1446_v17  ;;  %6401 = vrcp.f32 %v2013_v5 }
 0x79f   : > { %v6392_v3 = vpop.eup %6391 }
 0x7a0   : > { %v6394_v15 = vpop.eup %6393  ;;  %v7888_v4 = vmul.f32 %v6392_v3, %v7787_v51  ;;  %v2003_v0 = vpop.xlane.xlu1 %2002  ;;  %v9491_v51 = vld [vmem:[#allocation19_spill] sm:$0xff] }
 0x7a1   : > { %v2009_v57 = vpop.xlane.xlu0 %2008  ;;  %v7893_v2 = vmul.f32 %v6394_v15, %v7785_v11  ;;  %6403 = vrcp.f32 %v2003_v0  ;;  %v1447_v5 = vadd.f32 %v7684_v60, %v9491_v51  ;;  %v9492_v11 = vld [vmem:[#allocation23_spill] sm:$0xff] }
 0x7a2   : > { %v7896_v24 = vadd.f32 %v7888_v4, %v1449_v33  ;;  %6405 = vrcp.f32 %v2009_v57  ;;  %v1450_v15 = vadd.f32 %v7700_v46, %v9492_v11 }
 0x7a3   : > { %v6396_v17 = vpop.eup %6395  ;;  %v7899_v9 = vadd.f32 %v7893_v2, %v1452_v47 }
 0x7a4   : > { %v6398_v52 = vpop.eup %6397  ;;  %v7904_v3 = vmul.f32 %v6396_v17, %v7794_v30  ;;  %v2015_v32 = vpop.xlane.xlu1 %2014  ;;  %v9493_v30 = vld [vmem:[#allocation26_spill] sm:$0xff] }
 0x7a5   : > { %v2021_v34 = vpop.xlane.xlu0 %2020  ;;  %v7909_v33 = vmul.f32 %v6398_v52, %v7796_v48  ;;  %6407 = vrcp.f32 %v2015_v32  ;;  %v1453_v47 = vadd.f32 %v7715_v63, %v9493_v30  ;;  %v9494_v48 = vld [vmem:[#allocation30_spill] sm:$0xff]  ;;  %v9497_v30 = vld [vmem:[#allocation27_spill] sm:$0xff] }
 0x7a6   : > { %v7912_v0 = vadd.f32 %v7904_v3, %v1447_v5  ;;  %6409 = vrcp.f32 %v2021_v34  ;;  %v1456_v52 = vadd.f32 %v7731_v38, %v9494_v48  ;;  %v1454_v38 = vadd.f32 %v7720_v21, %v9497_v30  ;;  %v9498_v48 = vld [vmem:[#allocation33_spill] sm:$0xff] }
 0x7a7   : > { %v6400_v57 = vpop.eup %6399  ;;  %v7915_v43 = vadd.f32 %v7909_v33, %v1450_v15 }
 0x7a8   : > { %v6402_v60 = vpop.eup %6401  ;;  %v7920_v17 = vmul.f32 %v6400_v57, %v7802_v8  ;;  %v2011_v46 = vpop.xlane.xlu1 %2010  ;;  %v9496_v8 = vld [vmem:[#allocation24_spill] sm:$0xff] }
 0x7a9   : > { %v2017_v51 = vpop.xlane.xlu0 %2016  ;;  %v7925_v5 = vmul.f32 %v6402_v60, %v7800_v59  ;;  %6411 = vrcp.f32 %v2011_v46  ;;  %v1451_v15 = vadd.f32 %v7707_v62, %v9496_v8  ;;  %v1108_v62 = vld [vmem:[%s9378_s5] sm:$0xf] }
 0x7aa   : > { %v7928_v32 = vadd.f32 %v7920_v17, %v1453_v47  ;;  %6413 = vrcp.f32 %v2017_v51 }
 0x7ab   : > { %v6404_v34 = vpop.eup %6403  ;;  %v7931_v11 = vadd.f32 %v7925_v5, %v1456_v52  ;;  %v1457_v52 = vadd.f32 %v7736_v55, %v9498_v48 }
 0x7ac   : > { %v6406_v63 = vpop.eup %6405  ;;  %v2045_v57 = vmul.f32 %v6404_v34, %v7808_v41  ;;  %v9499_v41 = vld [vmem:[#allocation35_spill] sm:$0xff] }
 0x7ad   : > { %9495 = vst [vmem:[#allocation9_spill] sm:$0xff] %v7931_v11  ;;  %v2048_v59 = vmul.f32 %v6406_v63, %v7806_v6  ;;  %v1460_v21 = vadd.f32 %v7750_v56, %v9499_v41 }
 0x7ae   : > { %v7939_v60 = vadd.f32 %v2045_v57, %v1451_v15 }
 0x7af   : > { %v6408_v47 = vpop.eup %6407  ;;  %v7941_v46 = vadd.f32 %v2048_v59, %v1454_v38 }
 0x7b0   : > { %v6410_v51 = vpop.eup %6409  ;;  %v7946_v11 = vmul.f32 %v6408_v47, %v7814_v1 }
 0x7b1   : > { %v7954_v6 = vmul.f32 %v6410_v51, %v7812_v49  ;;  %v1574_v34 = vpop.f32.mrb[16].mxu1  ;;  %v9500_v49 = vld [vmem:[#allocation28_spill] sm:$0xff]  ;;  %v9501_v51 = vld [vmem:[#allocation34_spill] sm:$0xff] }
 0x7b2   : > { %v7957_v63 = vadd.f32 %v7946_v11, %v1457_v52  ;;  %v5730_v8 = vpop.f32.mrb[17].mxu1  ;;  %5735 = vmatmul.mubr.msk.f32.vlgmr.msra.gmra.mrb[20].mxu1 %vm700_vm1, %v1574_v34  ;;  %v1455_v30 = vadd.f32 %v7727_v7, %v9500_v49  ;;  %v1458_v48 = vadd.f32 %v7741_v14, %v9501_v51  ;;  %v2145_v7 = vpop.permute.xlu1 %2144  ;;  %v2108_v51 = vmul.f32 %v7909_v33, %v7089_v29 }
 0x7b3   : > { %v6412_v55 = vpop.eup %6411  ;;  %v7961_v1 = vadd.f32 %v7954_v6, %v1460_v21  ;;  %v1577_v15 = vpop.f32.mrb[18].mxu1  ;;  %5738 = vmatpush3.msk.msra.mxu1 %vm1585_vm3, %v1108_v62  ;;  %5739 = vmatprep.mubr.msk.f32.mxu1 %vm6848_vm2, %v9473_v12  ;;  %v9502_v21 = vld [vmem:[#allocation38_spill] sm:$0xff]  ;;  %v9503_v8 = vld [vmem:[#allocation11_spill] sm:$0xff] }
 0x7b4   : > { %v6414_v56 = vpop.eup %6413  ;;  %v2049_v38 = vmul.f32 %v6412_v55, %v7820_v45  ;;  %v5731_v47 = vpop.f32.mrb[19].mxu1  ;;  %5774 = vmatprep.subr.bf16.mxu1 %v9473_v12  ;;  %v2105_v45 = vmul.f32 %v7904_v3, %v7185_v19  ;;  %v2104_v55 = vmul.f32 %v7880_v40, %v9503_v8  ;;  %v2109_v3 = vmul.f32 %v2045_v57, %v7093_v31  ;;  %v9504_v57 = vld [vmem:[#allocation15_spill] sm:$0xff] }
 0x7b5   : > { %v2052_v52 = vmul.f32 %v6414_v56, %v7818_v54  ;;  %v2143_v62 = vpop.permute.xlu0 %2142  ;;  %v2106_v56 = vmul.f32 %v7865_v37, %v7083_v23 }
 0x7b6   : > { %v7973_v41 = vadd.f32 %v2049_v38, %v1455_v30  ;;  %5740 = vmatmul.mubr.msk.f32.vlgmr.msra.gmra.mrb[22].mxu1 %vm700_vm1, %v9502_v21  ;;  %v2147_v14 = vpop.permute.xlu1 %2146  ;;  %v2120_v15 = vadd.f32 %v2105_v45, %v2104_v55  ;;  %v2107_v30 = vmul.f32 %v7888_v4, %v7087_v27  ;;  %v2110_v21 = vmul.f32 %v7893_v2, %v7098_v35 }
 0x7b7   : > { %v7977_v34 = vadd.f32 %v2052_v52, %v1458_v48  ;;  %5775 = vmatpush3.bf16.msra.mxu1 %v2143_v62  ;;  %5790 = vmatprep.mubr.msk.bf16.mxu1 %vm6848_vm2, %v9473_v12  ;;  %v2113_v45 = vmul.f32 %v2049_v38, %v9475_v39 }
 0x7b8   : > { %5776 = vmatprep.subr.bf16.mxu1 %v9473_v12  ;;  %v2121_v49 = vadd.f32 %v2120_v15, %v2106_v56  ;;  %v2114_v15 = vmul.f32 %v7925_v5, %v9504_v57 }
 0x7b9   : > { %v2149_v54 = vpop.permute.xlu0 %2148 }
 0x7ba   : > { %v2122_v47 = vadd.f32 %v2121_v49, %v2107_v30  ;;  %v9505_v49 = vld [vmem:[#allocation37_spill] sm:$0xff]  ;;  %v9506_v30 = vld [vmem:[#allocation16_spill] sm:$0xff] }
 0x7bb   : > { %5777 = vmatpush3.bf16.msra.mxu1 %v2145_v7  ;;  %v2111_v7 = vmul.f32 %v7920_v17, %v7100_v36 }
 0x7bc   : > { %5778 = vmatprep.subr.bf16.mxu1 %v9473_v12  ;;  %v2123_v48 = vadd.f32 %v2122_v47, %v2108_v51  ;;  %v2115_v47 = vmul.f32 %v7946_v11, %v9506_v30 }
 0x7bd   : > { %v2153_v51 = vpop.permute.xlu0 %2152 }
 0x7be   : > { %v2124_v62 = vadd.f32 %v2123_v48, %v2109_v3 }
 0x7bf   : > { %5779 = vmatpush3.bf16.msra.mxu1 %v2147_v14  ;;  %v2112_v14 = vmul.f32 %v2048_v59, %v9474_v20  ;;  %v1461_v59 = vadd.f32 %v7756_v22, %v9505_v49 }
 0x7c0   : > { %5780 = vmatprep.subr.bf16.mxu1 %v9473_v12  ;;  %v2125_v40 = vadd.f32 %v2124_v62, %v2110_v21  ;;  %v9508_v62 = vld [vmem:[#allocation36_spill] sm:$0xff] }
 0x7c1   : > { %v9509_v21 = vld [vmem:[#allocation40_spill] sm:$0xff] }
 0x7c2   : > { %v2126_v37 = vadd.f32 %v2125_v40, %v2111_v7  ;;  %v1459_v40 = vadd.f32 %v9509_v21, %v9508_v62  ;;  %v9510_v7 = vld [vmem:[#allocation18_spill] sm:$0xff] }
 0x7c3   : > { %5781 = vmatpush3.bf16.msra.mxu1 %v2149_v54 }
 0x7c4   : > { %5782 = vmatprep.subr.bf16.mxu1 %v9473_v12  ;;  %v2127_v4 = vadd.f32 %v2126_v37, %v2112_v14  ;;  %v2116_v37 = vmul.f32 %v2052_v52, %v9510_v7 }
 0x7c6   : > { %v2128_v55 = vadd.f32 %v2127_v4, %v2113_v45  ;;  %v9513_v45 = vld [vmem:[#allocation32_spill] sm:$0xff] }
 0x7c8   : > { %v2129_v2 = vadd.f32 %v2128_v55, %v2114_v15  ;;  %v2157_v55 = vpop.permute.xlu0 %2156 }
 0x7ca   : > { %v2130_v48 = vadd.f32 %v2129_v2, %v2115_v47 }
 0x7cc   : > { %v2131_v11 = vadd.f32 %v2130_v48, %v2116_v37 }
 0x7e1   : > { %v2023_v54 = vpop.xlane.xlu1 %2022 }
 0x7e2   : > { %6415 = vrcp.f32 %v2023_v54 }
 0x7e5   : > { %v2019_v33 = vpop.xlane.xlu1 %2018 }
 0x7e6   : > { %6417 = vrcp.f32 %v2019_v33  ;;  %v2118_v33 = vmul.f32 %v7954_v6, %v9513_v45  ;;  %v5279_v6 = vld [vmem:[%s9378_s5 + $0x8] sm:$0xf] }
 0x7e9   : > { %v2151_v56 = vpop.permute.xlu1 %2150 }
 0x7ea   : > { %5783 = vmatpush3.bf16.msra.mxu1 %v2151_v56 }
 0x7eb   : > { %5784 = vmatprep.subr.bf16.mxu1 %v9473_v12 }
 0x7ec   : > { %v6416_v17 = vpop.eup %6415 }
 0x7ed   : > { %v2055_v38 = vmul.f32 %v6416_v17, %v7848_v50  ;;  %v2155_v14 = vpop.permute.xlu1 %2154  ;;  %v9512_v50 = vld [vmem:[#allocation29_spill] sm:$0xff] }
 0x7ee   : > { %5785 = vmatpush3.bf16.msra.mxu1 %v2153_v51 }
 0x7ef   : > { %v8010_v3 = vadd.f32 %v2055_v38, %v1461_v59  ;;  %5786 = vmatprep.subr.bf16.mxu1 %v9473_v12  ;;  %v2119_v56 = vmul.f32 %v2055_v38, %v9482_v18 }
 0x7f0   : > { %v6418_v5 = vpop.eup %6417 }
 0x7f1   : > { %9507 = vst [vmem:[#allocation39_spill] sm:$0xff] %v8010_v3  ;;  %v2053_v22 = vmul.f32 %v6418_v5, %v7852_v13  ;;  %v2302_v5 = vpop.permute.xlu1 %2301 }
 0x7f2   : > { %5787 = vmatpush3.bf16.msra.mxu1 %v2155_v14 }
 0x7f3   : > { %v8017_v54 = vadd.f32 %v2053_v22, %v1459_v40  ;;  %v2117_v4 = vmul.f32 %v2053_v22, %v9512_v50  ;;  %5788 = vmatprep.subr.bf16.mxu1 %v9473_v12 }
 0x7f5   : > { %9511 = vst [vmem:[#allocation8_spill] sm:$0xff] %v8017_v54  ;;  %v2132_v15 = vadd.f32 %v2131_v11, %v2117_v4  ;;  %v2306_v22 = vpop.permute.xlu1 %2305 }
 0x7f6   : > { %5789 = vmatpush3.bf16.msra.mxu1 %v2157_v55 }
 0x7f7   : > { %5794 = vmatprep.subr.mxu1 %v9473_v12  ;;  %v2133_v13 = vadd.f32 %v2132_v15, %v2118_v33  ;;  %v2342_v15 = vsel %vm700_vm1, %v2302_v5, 0 }
 0x7f9   : > { %v2134_v52 = vadd.f32 %v2133_v13, %v2119_v56  ;;  %v2310_v14 = vpop.permute.xlu1 %2309  ;;  %v2304_v56 = vpop.permute.xlu0 %2303 }
 0x7fb   : > { %v2135_v2 = vrot.slane %v2134_v52, 4 }
 0x7fd   : > { %v2136_v17 = vadd.f32 %v2135_v2, %v2134_v52  ;;  %v2314_v11 = vpop.permute.xlu1 %2313  ;;  %v2345_v2 = vsel %vm700_vm1, %v2304_v56, 0 }
 0x7ff   : > { %v2137_v49 = vrot.slane %v2136_v17, 2 }
 0x801   : > { %v2138_v59 = vadd.f32 %v2137_v49, %v2136_v17  ;;  %v2286_v33 = vpop.permute.xlu1 %2285  ;;  %v2348_v17 = vsel %vm700_vm1, %v2306_v22, 0  ;;  %v2308_v49 = vpop.permute.xlu0 %2307 }
 0x803   : > { %v2139_v47 = vrot.slane %v2138_v59, 1 }
 0x805   : > { %v2140_v51 = vadd.f32 %v2139_v47, %v2138_v59  ;;  %v2351_v59 = vsel %vm700_vm1, %v2308_v49, 0  ;;  %v2354_v47 = vsel %vm700_vm1, %v2310_v14, 0 }
 0x807   : > { %v2141_v48 = vpack.c.bf16 %v2140_v51, %v2140_v51  ;;  %v2312_v51 = vpop.permute.xlu0 %2311 }
 0x809   : > { %5791 = vmatmul.mubr.bf16.vlgmr.msra.gmra.mrb[24].mxu1 %v2141_v48  ;;  %v2357_v48 = vsel %vm700_vm1, %v2312_v51, 0 }
 0x80a   : > { %5795 = vmatpush3.msk.msra.mxu1 %vm1585_vm3, %v5279_v6  ;;  %5796 = vmatprep.mubr.msk.f32.mxu1 %vm6848_vm2, %v9473_v12  ;;  %v2360_v6 = vsel %vm700_vm1, %v2314_v11, 0 }
 0x80b   : > { %6108 = vmatprep.subr.msk.bf16.mxu1 %vm700_vm1, %v2302_v5  ;;  %v2316_v5 = vpop.permute.xlu0 %2315 }
 0x885   : > { %v1655_v38 = vpop.f32.mrb[20].mxu1 }
 0x886   : > { %v5736_v62 = vpop.f32.mrb[21].mxu1 }
 0x887   : > { %v2288_v62 = vpop.permute.xlu0 %2287 }
 0x889   : > { %v1731_v21 = vpop.f32.mrb[22].mxu1 }
 0x88a   : > { %v1732_v40 = vadd.f32 %v1731_v21, %v1655_v38  ;;  %v5741_v37 = vpop.f32.mrb[23].mxu1  ;;  %v2363_v38 = vsel %vm700_vm1, %v2316_v5, 0  ;;  %v2290_v21 = vpop.permute.xlu1 %2289 }
 0x88b   : > { %v2292_v37 = vpop.permute.xlu0 %2291 }
 0x8dc   : > { %v2200_v4 = vpop.f32.mrb[24].mxu1 }
 0x8dd   : > { %v5792_v55 = vpop.f32.mrb[25].mxu1  ;;  %5797 = vmatmul.mubr.msk.f32.vlgmr.msra.gmra.mrb[28].mxu1 %vm700_vm1, %v2200_v4 }
 0x8de   : > { %5800 = vmatpush3.bf16.xpose.msra.mxu1 %v2342_v15  ;;  %v2203_v13 = vpop.f32.mrb[26].mxu1  ;;  %5815 = vmatprep.mubr.msk.bf16.mxu1 %vm700_vm1, %v2286_v33 }
 0x8df   : > { %6109 = vmatprep.subr.msk.bf16.mxu1 %vm700_vm1, %v2304_v56  ;;  %v5793_v52 = vpop.f32.mrb[27].mxu1 }
 0x8e0   : > { %v8062_v52 = vld [vmem:[%s7126_s14] ss:$0 sm:$0xff] }
 0x8e1   : > { %9515 = vst [vmem:[#allocation21_spill] sm:$0xff] %v8062_v52 }
 0x8e6   : > { %5802 = vmatpush3.bf16.xpose.msra.mxu1 %v2345_v2 }
 0x8e7   : > { %6110 = vmatprep.subr.msk.bf16.mxu1 %vm700_vm1, %v2306_v22  ;;  %v2294_v22 = vpop.permute.xlu1 %2293 }
 0x8ee   : > { %5804 = vmatpush3.bf16.xpose.msra.mxu1 %v2348_v17 }
 0x8ef   : > { %6111 = vmatprep.subr.msk.bf16.mxu1 %vm700_vm1, %v2308_v49 }
 0x8f6   : > { %5806 = vmatpush3.bf16.xpose.msra.mxu1 %v2351_v59 }
 0x8f7   : > { %6112 = vmatprep.subr.msk.bf16.mxu1 %vm700_vm1, %v2310_v14  ;;  %v2296_v14 = vpop.permute.xlu0 %2295 }
 0x8fb   : > { %v2300_v4 = vpop.permute.xlu0 %2299 }
 0x8fe   : > { %5808 = vmatpush3.bf16.xpose.msra.mxu1 %v2354_v47 }
 0x8ff   : > { %6113 = vmatprep.subr.msk.bf16.mxu1 %vm700_vm1, %v2312_v51 }
 0x906   : > { %5810 = vmatpush3.bf16.xpose.msra.mxu1 %v2357_v48 }
 0x907   : > { %6114 = vmatprep.subr.msk.bf16.mxu1 %vm700_vm1, %v2314_v11  ;;  %v2298_v11 = vpop.permute.xlu1 %2297 }
 0x90e   : > { %5812 = vmatpush3.bf16.xpose.msra.mxu1 %v2360_v6 }
 0x90f   : > { %6115 = vmatprep.subr.msk.bf16.mxu1 %vm700_vm1, %v2316_v5 }
 0x916   : > { %5814 = vmatpush3.bf16.xpose.msra.mxu1 %v2363_v38 }
 0x917   : > { %5888 = vmatprep.subr.bf16.mxu1 %v9473_v12 }
 0x91d   : > { %5816 = vmatmul.mubr.msk.bf16.vlgmr.msra.gmra.mrb[32].mxu1 %vm700_vm1, %v2288_v62 }
 0x91e   : > { %5819 = vmatprep.mubr.msk.bf16.mxu1 %vm700_vm1, %v2290_v21 }
 0x925   : > { %5820 = vmatmul.mubr.msk.bf16.gmra.mrb[36].mxu1 %vm700_vm1, %v2292_v37 }
 0x926   : > { %5823 = vmatprep.mubr.msk.bf16.mxu1 %vm700_vm1, %v2294_v22 }
 0x92d   : > { %5824 = vmatmul.mubr.msk.bf16.gmra.mrb[40].mxu1 %vm700_vm1, %v2296_v14 }
 0x92e   : > { %5827 = vmatprep.mubr.msk.bf16.mxu1 %vm700_vm1, %v2298_v11 }
 0x935   : > { %5828 = vmatmul.mubr.msk.bf16.gmra.mrb[44].mxu1 %vm700_vm1, %v2300_v4 }
 0x936   : > { %5904 = vmatprep.mubr.msk.bf16.mxu1 %vm6848_vm2, %v9473_v12 }
 0x9b0   : > { %v2280_v33 = vpop.f32.mrb[28].mxu1 }
 0x9b1   : > { %v8059_v55 = vadd.f32 %v2280_v33, %v1732_v40  ;;  %v5798_v15 = vpop.f32.mrb[29].mxu1 }
 0x9b3   : > { %9514 = vst [vmem:[#allocation10_spill] sm:$0xff] %v8059_v55 }
 0x9f0   : > { %v5817_v56 = vpop.f32.mrb[32].mxu1 }
 0x9f1   : > { %v2399_v13 = vpop.f32.mrb[33].mxu1  ;;  %v2408_v51 = vadd.f32 %v8062_v52, %v5817_v56 }
 0x9f2   : > { %v2400_v2 = vadd.f32 %v8062_v52, %v2399_v13  ;;  %v5818_v17 = vpop.f32.mrb[34].mxu1 }
 0x9f3   : > { %v2402_v49 = vpop.f32.mrb[35].mxu1  ;;  %v2411_v47 = vadd.f32 %v8062_v52, %v5818_v17 }
 0x9f4   : > { %v2403_v59 = vadd.f32 %v8062_v52, %v2402_v49  ;;  %2462 = vmax.xlane.f32.xlu1 %v2400_v2 }
 0x9f6   : > { %2464 = vmax.xlane.f32.xlu0 %v2403_v59 }
 0x9f8   : > { %2468 = vmax.xlane.f32.xlu1 %v2411_v47  ;;  %v5821_v40 = vpop.f32.mrb[36].mxu1 }
 0x9f9   : > { %v2415_v48 = vpop.f32.mrb[37].mxu1  ;;  %v2424_v37 = vadd.f32 %v8062_v52, %v5821_v40 }
 0x9fa   : > { %2466 = vmax.xlane.f32.xlu0 %v2408_v51  ;;  %v5822_v6 = vpop.f32.mrb[38].mxu1  ;;  %v8070_v62 = vadd.f32 %v8062_v52, %v2415_v48 }
 0x9fb   : > { %v2427_v5 = vadd.f32 %v8062_v52, %v5822_v6  ;;  %v2418_v38 = vpop.f32.mrb[39].mxu1 }
 0x9fc   : > { %v2419_v21 = vadd.f32 %v8062_v52, %v2418_v38 }
 0x9fd   : > { %2476 = vmax.xlane.f32.xlu1 %v2427_v5 }
 0x9fe   : > { %2470 = vmax.xlane.f32.xlu0 %v8070_v62 }
 0xa00   : > { %v5825_v22 = vpop.f32.mrb[40].mxu1 }
 0xa01   : > { %2472 = vmax.xlane.f32.xlu1 %v2419_v21  ;;  %v2431_v14 = vpop.f32.mrb[41].mxu1  ;;  %v8084_v13 = vadd.f32 %v8062_v52, %v5825_v22 }
 0xa02   : > { %2474 = vmax.xlane.f32.xlu0 %v2424_v37  ;;  %v5826_v11 = vpop.f32.mrb[42].mxu1  ;;  %v8077_v15 = vadd.f32 %v8062_v52, %v2431_v14 }
 0xa03   : > { %v2443_v4 = vadd.f32 %v8062_v52, %v5826_v11  ;;  %v2434_v33 = vpop.f32.mrb[43].mxu1 }
 0xa04   : > { %v8081_v56 = vadd.f32 %v8062_v52, %v2434_v33 }
 0xa05   : > { %2484 = vmax.xlane.f32.xlu1 %v2443_v4 }
 0xa06   : > { %2478 = vmax.xlane.f32.xlu0 %v8077_v15 }
 0xa08   : > { %v5829_v17 = vpop.f32.mrb[44].mxu1 }
 0xa09   : > { %2480 = vmax.xlane.f32.xlu1 %v8081_v56  ;;  %v2447_v49 = vpop.f32.mrb[45].mxu1  ;;  %v8100_v14 = vadd.f32 %v8062_v52, %v5829_v17 }
 0xa0a   : > { %2482 = vmax.xlane.f32.xlu0 %v8084_v13  ;;  %v5830_v40 = vpop.f32.mrb[46].mxu1  ;;  %v8092_v38 = vadd.f32 %v8062_v52, %v2447_v49 }
 0xa0b   : > { %v8089_v48 = vadd.f32 %v8062_v52, %v5830_v40  ;;  %v2450_v6 = vpop.f32.mrb[47].mxu1 }
 0xa0c   : > { %v8097_v22 = vadd.f32 %v8062_v52, %v2450_v6 }
 0xa0d   : > { %2492 = vmax.xlane.f32.xlu1 %v8089_v48 }
 0xa0e   : > { %2486 = vmax.xlane.f32.xlu0 %v8092_v38 }
 0xa11   : > { %2488 = vmax.xlane.f32.xlu1 %v8097_v22 }
 0xa12   : > { %2490 = vmax.xlane.f32.xlu0 %v8100_v14 }
 0xa81   : > { %v2463_v11 = vpop.xlane.xlu1 %2462 }
 0xa82   : > { %v2494_v45 = vsub.f32 %v2400_v2, %v2463_v11 }
 0xa83   : > { %v2465_v33 = vpop.xlane.xlu0 %2464 }
 0xa84   : > { %v2495_v55 = vsub.f32 %v2403_v59, %v2465_v33  ;;  %v2510_v52 = vmul.f32 1.442695, %v2494_v45 }
 0xa85   : > { %v2469_v40 = vpop.xlane.xlu1 %2468 }
 0xa86   : > { %v2497_v49 = vsub.f32 %v2411_v47, %v2469_v40  ;;  %v2512_v3 = vmul.f32 1.442695, %v2495_v55 }
 0xa87   : > { %v2467_v18 = vpop.xlane.xlu0 %2466 }
 0xa88   : > { %v2516_v50 = vmul.f32 1.442695, %v2497_v49  ;;  %v2496_v54 = vsub.f32 %v2408_v51, %v2467_v18 }
 0xa8a   : > { %6419 = vpow2.f32 %v2516_v50  ;;  %v2514_v6 = vmul.f32 1.442695, %v2496_v54  ;;  %v2477_v7 = vpop.xlane.xlu1 %2476 }
 0xa8b   : > { %v2501_v30 = vsub.f32 %v2427_v5, %v2477_v7  ;;  %v2471_v17 = vpop.xlane.xlu0 %2470 }
 0xa8c   : > { %6421 = vpow2.f32 %v2514_v6  ;;  %v2498_v59 = vsub.f32 %v8070_v62, %v2471_v17 }
 0xa8d   : > { %6423 = vpow2.f32 %v2512_v3  ;;  %v2524_v57 = vmul.f32 1.442695, %v2501_v30 }
 0xa8e   : > { %v2473_v39 = vpop.xlane.xlu1 %2472  ;;  %6425 = vpow2.f32 %v2510_v52  ;;  %v2518_v7 = vmul.f32 1.442695, %v2498_v59 }
 0xa8f   : > { %v2499_v20 = vsub.f32 %v2419_v21, %v2473_v39  ;;  %v2475_v36 = vpop.xlane.xlu0 %2474  ;;  %6427 = vpow2.f32 %v2524_v57 }
 0xa90   : > { %v2500_v47 = vsub.f32 %v2424_v37, %v2475_v36 }
 0xa91   : > { %v2520_v2 = vmul.f32 1.442695, %v2499_v20 }
 0xa92   : > { %v2522_v18 = vmul.f32 1.442695, %v2500_v47  ;;  %v2485_v55 = vpop.xlane.xlu1 %2484 }
 0xa93   : > { %v2505_v50 = vsub.f32 %v2443_v4, %v2485_v55  ;;  %v2479_v54 = vpop.xlane.xlu0 %2478 }
 0xa94   : > { %v8105_v51 = vpop.eup %6419  ;;  %6429 = vpow2.f32 %v2522_v18  ;;  %v2502_v57 = vsub.f32 %v8077_v15, %v2479_v54 }
 0xa95   : > { %2548 = vadd.xlane.f32.xlu1 %v8105_v51  ;;  %6431 = vpow2.f32 %v2520_v2  ;;  %v2532_v39 = vmul.f32 1.442695, %v2505_v50 }
 0xa96   : > { %v8108_v30 = vpop.eup %6421  ;;  %v2481_v3 = vpop.xlane.xlu1 %2480  ;;  %6433 = vpow2.f32 %v2518_v7 }
 0xa97   : > { %v2503_v45 = vsub.f32 %v8081_v56, %v2481_v3  ;;  %2546 = vadd.xlane.f32.xlu0 %v8108_v30  ;;  %v2483_v36 = vpop.xlane.xlu0 %2482  ;;  %v8112_v20 = vpop.eup %6423  ;;  %6435 = vpow2.f32 %v2532_v39  ;;  %v2526_v56 = vmul.f32 1.442695, %v2502_v57 }
 0xa98   : > { %v2504_v52 = vsub.f32 %v8084_v13, %v2483_v36  ;;  %v8117_v5 = vpop.eup %6425 }
 0xa99   : > { %2544 = vadd.xlane.f32.xlu1 %v8112_v20  ;;  %v2528_v62 = vmul.f32 1.442695, %v2503_v45  ;;  %v8120_v4 = vpop.eup %6427 }
 0xa9a   : > { %v2530_v21 = vmul.f32 1.442695, %v2504_v52  ;;  %v2493_v55 = vpop.xlane.xlu1 %2492 }
 0xa9b   : > { %2542 = vadd.xlane.f32.xlu0 %v8117_v5  ;;  %v2487_v37 = vpop.xlane.xlu0 %2486  ;;  %v2509_v50 = vsub.f32 %v8089_v48, %v2493_v55 }
 0xa9c   : > { %6437 = vpow2.f32 %v2530_v21  ;;  %v2506_v33 = vsub.f32 %v8092_v38, %v2487_v37 }
 0xa9d   : > { %2556 = vadd.xlane.f32.xlu1 %v8120_v4  ;;  %6439 = vpow2.f32 %v2528_v62  ;;  %v2540_v7 = vmul.f32 1.442695, %v2509_v50 }
 0xa9e   : > { %v8123_v11 = vpop.eup %6429  ;;  %6441 = vpow2.f32 %v2526_v56  ;;  %v2534_v59 = vmul.f32 1.442695, %v2506_v33  ;;  %v2489_v54 = vpop.xlane.xlu1 %2488 }
 0xa9f   : > { %2554 = vadd.xlane.f32.xlu0 %v8123_v11  ;;  %v2491_v15 = vpop.xlane.xlu0 %2490  ;;  %v8126_v13 = vpop.eup %6431  ;;  %v2507_v39 = vsub.f32 %v8097_v22, %v2489_v54 }
 0xaa0   : > { %v2508_v40 = vsub.f32 %v8100_v14, %v2491_v15  ;;  %v8131_v49 = vpop.eup %6433 }
 0xaa1   : > { %2552 = vadd.xlane.f32.xlu1 %v8126_v13  ;;  %v8134_v17 = vpop.eup %6435  ;;  %v2536_v3 = vmul.f32 1.442695, %v2507_v39 }
 0xaa2   : > { %v2538_v6 = vmul.f32 1.442695, %v2508_v40 }
 0xaa3   : > { %2550 = vadd.xlane.f32.xlu0 %v8131_v49 }
 0xaa4   : > { %6443 = vpow2.f32 %v2538_v6 }
 0xaa5   : > { %2564 = vadd.xlane.f32.xlu1 %v8134_v17  ;;  %6445 = vpow2.f32 %v2534_v59 }
 0xaa6   : > { %v8137_v47 = vpop.eup %6437  ;;  %6447 = vpow2.f32 %v2540_v7 }
 0xaa7   : > { %2562 = vadd.xlane.f32.xlu0 %v8137_v47  ;;  %v8140_v38 = vpop.eup %6439  ;;  %6449 = vpow2.f32 %v2536_v3 }
 0xaa8   : > { %v8143_v14 = vpop.eup %6441 }
 0xaa9   : > { %2560 = vadd.xlane.f32.xlu1 %v8140_v38 }
 0xaab   : > { %2558 = vadd.xlane.f32.xlu0 %v8143_v14 }
 0xaae   : > { %v8146_v2 = vpop.eup %6443 }
 0xaaf   : > { %2570 = vadd.xlane.f32.xlu0 %v8146_v2  ;;  %v8149_v18 = vpop.eup %6445 }
 0xab0   : > { %v8162_v45 = vpop.eup %6447 }
 0xab1   : > { %v8166_v48 = vpop.eup %6449 }
 0xab3   : > { %2566 = vadd.xlane.f32.xlu0 %v8149_v18 }
 0xaba   : > { %2694 = vrot.lane.b32.xlu1 %v7002_v26, %s6855_s23 }
 0xabe   : > { %2696 = vrot.lane.b32.xlu1 %v7020_v44, %s6855_s23 }
 0xac9   : > { %2692 = vrot.lane.b32.xlu0 %v7004_v28, %s6855_s23 }
 0xacd   : > { %2698 = vrot.lane.b32.xlu0 %v7018_v42, %s6855_s23 }
 0xad1   : > { %2702 = vrot.lane.b32.xlu0 %v7032_v58, %s6855_s23 }
 0xad5   : > { %2706 = vrot.lane.b32.xlu0 %v9483_v10, %s6855_s23 }
 0xad9   : > { %2853 = vrot.lane.b32.xlu0 %v7002_v26, %s6856_s24 }
 0xadd   : > { %2857 = vrot.lane.b32.xlu0 %v7018_v42, %s6856_s24 }
 0xae1   : > { %2861 = vrot.lane.b32.xlu0 %v7032_v58, %s6856_s24 }
 0xae2   : > { %2572 = vadd.xlane.f32.xlu1 %v8162_v45 }
 0xae5   : > { %2865 = vrot.lane.b32.xlu0 %v9483_v10, %s6856_s24 }
 0xae6   : > { %2568 = vadd.xlane.f32.xlu1 %v8166_v48 }
 0xae9   : > { %2837 = vrot.lane.b32.xlu0 %v7002_v26, %s6857_s26 }
 0xaed   : > { %2841 = vrot.lane.b32.xlu0 %v7018_v42, %s6857_s26 }
 0xaf1   : > { %2845 = vrot.lane.b32.xlu0 %v7032_v58, %s6857_s26 }
 0xaf5   : > { %2849 = vrot.lane.b32.xlu0 %v9483_v10, %s6857_s26 }
 0xaf7   : > { %2700 = vrot.lane.b32.xlu1 %v9485_v16, %s6855_s23 }
 0xafb   : > { %2704 = vrot.lane.b32.xlu1 %v9486_v25, %s6855_s23  ;;  %s6861_s23 = smov 44  }
 0xaff   : > { %2851 = vrot.lane.b32.xlu1 %v7004_v28, %s6856_s24 }
 0xb03   : > { %2855 = vrot.lane.b32.xlu1 %v7020_v44, %s6856_s24 }
 0xb07   : > { %2859 = vrot.lane.b32.xlu1 %v9485_v16, %s6856_s24 }
 0xb0b   : > { %2863 = vrot.lane.b32.xlu1 %v9486_v25, %s6856_s24  ;;  %s6862_s24 = smov 72  }
 0xb0f   : > { %2835 = vrot.lane.b32.xlu1 %v7004_v28, %s6857_s26 }
 0xb13   : > { %2839 = vrot.lane.b32.xlu1 %v7020_v44, %s6857_s26 }
 0xb17   : > { %2843 = vrot.lane.b32.xlu1 %v9485_v16, %s6857_s26 }
 0xb1b   : > { %2847 = vrot.lane.b32.xlu1 %v9486_v25, %s6857_s26  ;;  %s6863_s26 = smov 104  }
 0xb22   : > { %v2549_v22 = vpop.xlane.xlu1 %2548 }
 0xb23   : > { %6451 = vrcp.f32 %v2549_v22 }
 0xb24   : > { %v2547_v36 = vpop.xlane.xlu0 %2546 }
 0xb25   : > { %6453 = vrcp.f32 %v2547_v36 }
 0xb26   : > { %v2545_v57 = vpop.xlane.xlu1 %2544 }
 0xb27   : > { %6455 = vrcp.f32 %v2545_v57 }
 0xb28   : > { %v2543_v52 = vpop.xlane.xlu0 %2542 }
 0xb29   : > { %6457 = vrcp.f32 %v2543_v52 }
 0xb2a   : > { %v2557_v62 = vpop.xlane.xlu1 %2556 }
 0xb2b   : > { %6459 = vrcp.f32 %v2557_v62 }
 0xb2c   : > { %v2555_v21 = vpop.xlane.xlu0 %2554 }
 0xb2d   : > { %v6452_v37 = vpop.eup %6451  ;;  %6461 = vrcp.f32 %v2555_v21 }
 0xb2e   : > { %v8185_v56 = vmul.f32 %v6452_v37, %v8105_v51  ;;  %v2553_v15 = vpop.xlane.xlu1 %2552 }
 0xb2f   : > { %v6454_v33 = vpop.eup %6453  ;;  %6463 = vrcp.f32 %v2553_v15 }
 0xb30   : > { %v8189_v40 = vadd.f32 %v8185_v56, %v7896_v24  ;;  %v8192_v6 = vmul.f32 %v6454_v33, %v8108_v30  ;;  %v2551_v59 = vpop.xlane.xlu0 %2550 }
 0xb31   : > { %v6456_v55 = vpop.eup %6455  ;;  %6465 = vrcp.f32 %v2551_v59 }
 0xb32   : > { %v8196_v50 = vadd.f32 %v8192_v6, %v7869_v53  ;;  %v2591_v51 = vmul.f32 %v6456_v55, %v8112_v20  ;;  %v2565_v54 = vpop.xlane.xlu1 %2564 }
 0xb33   : > { %v6458_v7 = vpop.eup %6457  ;;  %6467 = vrcp.f32 %v2565_v54 }
 0xb34   : > { %v8200_v39 = vadd.f32 %v2591_v51, %v7912_v0  ;;  %v2590_v24 = vmul.f32 %v6458_v7, %v8117_v5  ;;  %v2563_v3 = vpop.xlane.xlu0 %2562 }
 0xb35   : > { %v6460_v30 = vpop.eup %6459  ;;  %6469 = vrcp.f32 %v2563_v3 }
 0xb36   : > { %v8204_v22 = vadd.f32 %v2590_v24, %v7883_v61  ;;  %v2597_v36 = vmul.f32 %v6460_v30, %v8120_v4  ;;  %v2561_v53 = vpop.xlane.xlu1 %2560 }
 0xb37   : > { %v6462_v57 = vpop.eup %6461  ;;  %6471 = vrcp.f32 %v2561_v53 }
 0xb38   : > { %v8208_v20 = vadd.f32 %v2597_v36, %v7928_v32  ;;  %v2596_v52 = vmul.f32 %v6462_v57, %v8123_v11  ;;  %v2559_v0 = vpop.xlane.xlu0 %2558 }
 0xb39   : > { %v6464_v62 = vpop.eup %6463  ;;  %6473 = vrcp.f32 %v2559_v0 }
 0xb3a   : > { %v8212_v5 = vadd.f32 %v2596_v52, %v7899_v9  ;;  %v2595_v21 = vmul.f32 %v6464_v62, %v8126_v13 }
 0xb3b   : > { %v6466_v61 = vpop.eup %6465 }
 0xb3c   : > { %v8216_v37 = vadd.f32 %v2595_v21, %v7939_v60  ;;  %v2594_v4 = vmul.f32 %v6466_v61, %v8131_v49  ;;  %v2571_v15 = vpop.xlane.xlu0 %2570  ;;  %v9516_v60 = vld [vmem:[#allocation9_spill] sm:$0xff] }
 0xb3d   : > { %v6468_v33 = vpop.eup %6467  ;;  %6475 = vrcp.f32 %v2571_v15  ;;  %v2656_v15 = vmul.f32 %v8192_v6, %v7083_v23 }
 0xb3e   : > { %v8220_v32 = vadd.f32 %v2594_v4, %v7915_v43  ;;  %v2601_v11 = vmul.f32 %v6468_v33, %v8134_v17 }
 0xb3f   : > { %v6470_v59 = vpop.eup %6469 }
 0xb40   : > { %v8224_v9 = vadd.f32 %v2601_v11, %v7957_v63  ;;  %v2600_v13 = vmul.f32 %v6470_v59, %v8137_v47  ;;  %v2567_v55 = vpop.xlane.xlu0 %2566  ;;  %v2695_v47 = vpop.permute.xlu1 %2694 }
 0xb41   : > { %v6472_v54 = vpop.eup %6471  ;;  %6477 = vrcp.f32 %v2567_v55 }
 0xb42   : > { %v8228_v7 = vadd.f32 %v2600_v13, %v9516_v60  ;;  %v2599_v49 = vmul.f32 %v6472_v54, %v8140_v38  ;;  %v2659_v54 = vmul.f32 %v2595_v21, %v7093_v31 }
 0xb43   : > { %v6474_v3 = vpop.eup %6473 }
 0xb44   : > { %v8232_v43 = vadd.f32 %v2599_v49, %v7973_v41  ;;  %v2598_v17 = vmul.f32 %v6474_v3, %v8143_v14  ;;  %v2693_v30 = vpop.permute.xlu0 %2692  ;;  %v2697_v0 = vpop.permute.xlu1 %2696  ;;  %v2660_v3 = vmul.f32 %v2596_v52, %v7098_v35 }
 0xb45   : > { %5832 = vmatpush3.bf16.msra.mxu0 %v2693_v30  ;;  %v9517_v30 = vld [vmem:[#allocation13_spill] sm:$0xff] }
 0xb46   : > { %v8236_v63 = vadd.f32 %v2598_v17, %v7941_v46  ;;  %5833 = vmatprep.subr.bf16.mxu0 %v9473_v12 }
 0xb47   : > { %v6476_v53 = vpop.eup %6475 }
 0xb48   : > { %v2604_v57 = vmul.f32 %v6476_v53, %v8146_v2  ;;  %v2699_v62 = vpop.permute.xlu0 %2698  ;;  %v2654_v2 = vmul.f32 %v2590_v24, %v9503_v8  ;;  %v9518_v53 = vld [vmem:[#allocation14_spill] sm:$0xff] }
 0xb49   : > { %5834 = vmatpush3.bf16.msra.mxu0 %v2695_v47 }
 0xb4a   : > { %v8241_v38 = vadd.f32 %v2604_v57, %v7961_v1  ;;  %5835 = vmatprep.subr.bf16.mxu0 %v9473_v12  ;;  %v2655_v1 = vmul.f32 %v2591_v51, %v7185_v19  ;;  %v2661_v51 = vmul.f32 %v2597_v36, %v9517_v30  ;;  %v9521_v36 = vld [vmem:[#allocation16_spill] sm:$0xff] }
 0xb4b   : > { %v6478_v41 = vpop.eup %6477 }
 0xb4c   : > { %v2602_v14 = vmul.f32 %v6478_v41, %v8149_v18  ;;  %v2670_v61 = vadd.f32 %v2655_v1, %v2654_v2  ;;  %v2657_v18 = vmul.f32 %v8185_v56, %v7087_v27  ;;  %v2662_v41 = vmul.f32 %v2598_v17, %v9518_v53  ;;  %v9520_v1 = vld [vmem:[#allocation15_spill] sm:$0xff] }
 0xb4d   : > { %5836 = vmatpush3.bf16.msra.mxu0 %v2697_v0 }
 0xb4e   : > { %v8246_v46 = vadd.f32 %v2602_v14, %v7977_v34  ;;  %5837 = vmatprep.subr.bf16.mxu0 %v9473_v12  ;;  %v2671_v33 = vadd.f32 %v2670_v61, %v2656_v15  ;;  %v2658_v34 = vmul.f32 %v2594_v4, %v7089_v29  ;;  %v2664_v61 = vmul.f32 %v2600_v13, %v9520_v1 }
 0xb50   : > { %v2672_v59 = vadd.f32 %v2671_v33, %v2657_v18  ;;  %v2665_v33 = vmul.f32 %v2601_v11, %v9521_v36  ;;  %v2703_v18 = vpop.permute.xlu0 %2702 }
 0xb51   : > { %5838 = vmatpush3.bf16.msra.mxu0 %v2699_v62  ;;  %v9519_v62 = vld [vmem:[#allocation17_spill] sm:$0xff] }
 0xb52   : > { %5839 = vmatprep.subr.bf16.mxu0 %v9473_v12  ;;  %v2673_v55 = vadd.f32 %v2672_v59, %v2658_v34  ;;  %v2663_v56 = vmul.f32 %v2599_v49, %v9519_v62  ;;  %v9522_v59 = vld [vmem:[#allocation18_spill] sm:$0xff] }
 0xb53   : > { %v2666_v49 = vmul.f32 %v2602_v14, %v9522_v59 }
 0xb54   : > { %v2674_v60 = vadd.f32 %v2673_v55, %v2659_v54  ;;  %v9523_v55 = vld [vmem:[#allocation39_spill] sm:$0xff] }
 0xb56   : > { %v2675_v24 = vadd.f32 %v2674_v60, %v2660_v3 }
 0xb58   : > { %v2676_v47 = vadd.f32 %v2675_v24, %v2661_v51  ;;  %v9525_v51 = vld [vmem:[#allocation8_spill] sm:$0xff] }
 0xb5a   : > { %v2677_v0 = vadd.f32 %v2676_v47, %v2662_v41  ;;  %v9527_v47 = vld [vmem:[#allocation29_spill] sm:$0xff]  ;;  %v9528_v41 = vld [vmem:[#allocation32_spill] sm:$0xff] }
 0xb5b   : > { %v2668_v14 = vmul.f32 %v2604_v57, %v9528_v41  ;;  %v5290_v57 = vld [vmem:[%s9378_s5 + $0xc] sm:$0xf] }
 0xb5c   : > { %v2678_v4 = vadd.f32 %v2677_v0, %v2663_v56  ;;  %v9529_v56 = vld [vmem:[#allocation31_spill] sm:$0xff] }
 0xb5e   : > { %v2679_v15 = vadd.f32 %v2678_v4, %v2664_v61 }
 0xb60   : > { %v2680_v34 = vadd.f32 %v2679_v15, %v2665_v33 }
 0xb62   : > { %v2681_v24 = vadd.f32 %v2680_v34, %v2666_v49 }
 0xb6f   : > { %v2573_v6 = vpop.xlane.xlu1 %2572 }
 0xb70   : > { %6479 = vrcp.f32 %v2573_v6  ;;  %v2707_v6 = vpop.permute.xlu0 %2706 }
 0xb73   : > { %v2569_v2 = vpop.xlane.xlu1 %2568 }
 0xb74   : > { %6481 = vrcp.f32 %v2569_v2 }
 0xb77   : > { %v2701_v21 = vpop.permute.xlu1 %2700 }
 0xb78   : > { %5840 = vmatpush3.bf16.msra.mxu0 %v2701_v21 }
 0xb79   : > { %5841 = vmatprep.subr.bf16.mxu0 %v9473_v12 }
 0xb7a   : > { %v6480_v52 = vpop.eup %6479 }
 0xb7b   : > { %v2605_v17 = vmul.f32 %v6480_v52, %v8162_v45  ;;  %v2705_v3 = vpop.permute.xlu1 %2704 }
 0xb7c   : > { %5842 = vmatpush3.bf16.msra.mxu0 %v2703_v18 }
 0xb7d   : > { %v8268_v54 = vadd.f32 %v2605_v17, %v9523_v55  ;;  %5843 = vmatprep.subr.bf16.mxu0 %v9473_v12  ;;  %v2669_v2 = vmul.f32 %v2605_v17, %v9529_v56 }
 0xb7e   : > { %v6482_v13 = vpop.eup %6481 }
 0xb7f   : > { %9524 = vst [vmem:[#allocation20_spill] sm:$0xff] %v8268_v54  ;;  %v2603_v60 = vmul.f32 %v6482_v13, %v8166_v48  ;;  %v2852_v49 = vpop.permute.xlu1 %2851 }
 0xb80   : > { %5844 = vmatpush3.bf16.msra.mxu0 %v2705_v3 }
 0xb81   : > { %v8273_v11 = vadd.f32 %v2603_v60, %v9525_v51  ;;  %v2667_v45 = vmul.f32 %v2603_v60, %v9527_v47  ;;  %5845 = vmatprep.subr.bf16.mxu0 %v9473_v12  ;;  %v2892_v51 = vsel %vm700_vm1, %v2852_v49, 0 }
 0xb83   : > { %9526 = vst [vmem:[#allocation22_spill] sm:$0xff] %v8273_v11  ;;  %v2682_v0 = vadd.f32 %v2681_v24, %v2667_v45  ;;  %v2856_v17 = vpop.permute.xlu1 %2855  ;;  %v2854_v45 = vpop.permute.xlu0 %2853 }
 0xb84   : > { %5846 = vmatpush3.bf16.msra.mxu0 %v2707_v6 }
 0xb85   : > { %v2683_v4 = vadd.f32 %v2682_v0, %v2668_v14  ;;  %5851 = vmatprep.subr.mxu0 %v9473_v12  ;;  %v2895_v0 = vsel %vm700_vm1, %v2854_v45, 0 }
 0xb87   : > { %v2684_v48 = vadd.f32 %v2683_v4, %v2669_v2  ;;  %v2860_v55 = vpop.permute.xlu1 %2859  ;;  %v2898_v2 = vsel %vm700_vm1, %v2856_v17, 0  ;;  %v2858_v4 = vpop.permute.xlu0 %2857 }
 0xb89   : > { %v2685_v61 = vrot.slane %v2684_v48, 4 }
 0xb8b   : > { %v2686_v21 = vadd.f32 %v2685_v61, %v2684_v48  ;;  %v2864_v13 = vpop.permute.xlu1 %2863  ;;  %v2901_v48 = vsel %vm700_vm1, %v2858_v4, 0  ;;  %v2904_v61 = vsel %vm700_vm1, %v2860_v55, 0 }
 0xb8d   : > { %v2687_v15 = vrot.slane %v2686_v21, 2 }
 0xb8f   : > { %v2688_v52 = vadd.f32 %v2687_v15, %v2686_v21  ;;  %v2836_v3 = vpop.permute.xlu1 %2835  ;;  %v2862_v21 = vpop.permute.xlu0 %2861 }
 0xb90   : > { %v2907_v15 = vsel %vm700_vm1, %v2862_v21, 0 }
 0xb91   : > { %v2689_v33 = vrot.slane %v2688_v52, 1 }
 0xb93   : > { %v2690_v18 = vadd.f32 %v2689_v33, %v2688_v52  ;;  %v2910_v52 = vsel %vm700_vm1, %v2864_v13, 0  ;;  %v2866_v33 = vpop.permute.xlu0 %2865 }
 0xb95   : > { %v2691_v34 = vpack.c.bf16 %v2690_v18, %v2690_v18  ;;  %v2913_v18 = vsel %vm700_vm1, %v2866_v33, 0 }
 0xb97   : > { %5848 = vmatmul.mubr.bf16.vlgmr.msra.gmra.mrb[52].mxu0 %v2691_v34  ;;  %v2838_v34 = vpop.permute.xlu0 %2837 }
 0xb98   : > { %5852 = vmatpush3.msk.msra.mxu0 %vm1585_vm3, %v5290_v57  ;;  %5853 = vmatprep.mubr.msk.f32.mxu0 %vm6848_vm2, %v9473_v12  ;;  %v2840_v57 = vpop.permute.xlu1 %2839 }
 0xb99   : > { %6116 = vmatprep.subr.msk.bf16.mxu0 %vm700_vm1, %v2852_v49 }
 0xb9b   : > { %v2842_v49 = vpop.permute.xlu0 %2841 }
 0xc6a   : > { %v2750_v60 = vpop.f32.mrb[52].mxu0 }
 0xc6b   : > { %v5849_v24 = vpop.f32.mrb[53].mxu0  ;;  %5854 = vmatmul.mubr.msk.f32.vlgmr.msra.gmra.mrb[56].mxu0 %vm700_vm1, %v2750_v60 }
 0xc6c   : > { %5857 = vmatpush3.bf16.xpose.msra.mxu0 %v2892_v51  ;;  %v2753_v14 = vpop.f32.mrb[54].mxu0  ;;  %5872 = vmatprep.mubr.msk.bf16.mxu0 %vm700_vm1, %v2836_v3  ;;  %v9530_v24 = vld [vmem:[#allocation10_spill] sm:$0xff] }
 0xc6d   : > { %6117 = vmatprep.subr.msk.bf16.mxu0 %vm700_vm1, %v2854_v45  ;;  %v5850_v6 = vpop.f32.mrb[55].mxu0 }
 0xc74   : > { %5859 = vmatpush3.bf16.xpose.msra.mxu0 %v2895_v0  ;;  %v9532_v0 = vld [vmem:[#allocation21_spill] sm:$0xff] }
 0xc75   : > { %6118 = vmatprep.subr.msk.bf16.mxu0 %vm700_vm1, %v2856_v17  ;;  %v2844_v17 = vpop.permute.xlu1 %2843 }
 0xc7c   : > { %5861 = vmatpush3.bf16.xpose.msra.mxu0 %v2898_v2 }
 0xc7d   : > { %6119 = vmatprep.subr.msk.bf16.mxu0 %vm700_vm1, %v2858_v4 }
 0xc84   : > { %5863 = vmatpush3.bf16.xpose.msra.mxu0 %v2901_v48 }
 0xc85   : > { %6120 = vmatprep.subr.msk.bf16.mxu0 %vm700_vm1, %v2860_v55  ;;  %v2846_v55 = vpop.permute.xlu0 %2845 }
 0xc89   : > { %v2850_v60 = vpop.permute.xlu0 %2849 }
 0xc8c   : > { %5865 = vmatpush3.bf16.xpose.msra.mxu0 %v2904_v61 }
 0xc8d   : > { %6121 = vmatprep.subr.msk.bf16.mxu0 %vm700_vm1, %v2862_v21 }
 0xc94   : > { %5867 = vmatpush3.bf16.xpose.msra.mxu0 %v2907_v15 }
 0xc95   : > { %6122 = vmatprep.subr.msk.bf16.mxu0 %vm700_vm1, %v2864_v13  ;;  %v2848_v13 = vpop.permute.xlu1 %2847 }
 0xc9c   : > { %5869 = vmatpush3.bf16.xpose.msra.mxu0 %v2910_v52 }
 0xc9d   : > { %6123 = vmatprep.subr.msk.bf16.mxu0 %vm700_vm1, %v2866_v33 }
 0xca4   : > { %5871 = vmatpush3.bf16.xpose.msra.mxu0 %v2913_v18 }
 0xca5   : > { %5945 = vmatprep.subr.bf16.mxu0 %v9473_v12 }
 0xcab   : > { %5873 = vmatmul.mubr.msk.bf16.vlgmr.msra.gmra.mrb[60].mxu0 %vm700_vm1, %v2838_v34 }
 0xcac   : > { %5876 = vmatprep.mubr.msk.bf16.mxu0 %vm700_vm1, %v2840_v57 }
 0xcb3   : > { %5877 = vmatmul.mubr.msk.bf16.gmra.mrb[64].mxu0 %vm700_vm1, %v2842_v49 }
 0xcb4   : > { %5880 = vmatprep.mubr.msk.bf16.mxu0 %vm700_vm1, %v2844_v17 }
 0xcbb   : > { %5881 = vmatmul.mubr.msk.bf16.gmra.mrb[68].mxu0 %vm700_vm1, %v2846_v55 }
 0xcbc   : > { %5884 = vmatprep.mubr.msk.bf16.mxu0 %vm700_vm1, %v2848_v13 }
 0xcc3   : > { %5885 = vmatmul.mubr.msk.bf16.gmra.mrb[72].mxu0 %vm700_vm1, %v2850_v60 }
 0xcc4   : > { %5961 = vmatprep.mubr.msk.bf16.mxu0 %vm6848_vm2, %v9473_v12 }
 0xd3e   : > { %v2830_v3 = vpop.f32.mrb[56].mxu0 }
 0xd3f   : > { %v8315_v51 = vadd.f32 %v2830_v3, %v9530_v24  ;;  %v5855_v45 = vpop.f32.mrb[57].mxu0 }
 0xd41   : > { %9531 = vst [vmem:[#allocation25_spill] sm:$0xff] %v8315_v51 }
 0xd7e   : > { %v5874_v14 = vpop.f32.mrb[60].mxu0 }
 0xd7f   : > { %v2949_v6 = vpop.f32.mrb[61].mxu0  ;;  %v2958_v15 = vadd.f32 %v9532_v0, %v5874_v14 }
 0xd80   : > { %v2950_v2 = vadd.f32 %v9532_v0, %v2949_v6  ;;  %v5875_v4 = vpop.f32.mrb[62].mxu0 }
 0xd81   : > { %v2952_v48 = vpop.f32.mrb[63].mxu0  ;;  %v2961_v21 = vadd.f32 %v9532_v0, %v5875_v4 }
 0xd82   : > { %v2953_v61 = vadd.f32 %v9532_v0, %v2952_v48  ;;  %3012 = vmax.xlane.f32.xlu1 %v2950_v2 }
 0xd84   : > { %3014 = vmax.xlane.f32.xlu0 %v2953_v61 }
 0xd86   : > { %3018 = vmax.xlane.f32.xlu1 %v2961_v21  ;;  %v5878_v52 = vpop.f32.mrb[64].mxu0 }
 0xd87   : > { %v2965_v33 = vpop.f32.mrb[65].mxu0  ;;  %v2974_v55 = vadd.f32 %v9532_v0, %v5878_v52 }
 0xd88   : > { %3016 = vmax.xlane.f32.xlu0 %v2958_v15  ;;  %v5879_v18 = vpop.f32.mrb[66].mxu0  ;;  %v8323_v49 = vadd.f32 %v9532_v0, %v2965_v33 }
 0xd89   : > { %v2977_v34 = vadd.f32 %v9532_v0, %v5879_v18  ;;  %v2968_v57 = vpop.f32.mrb[67].mxu0 }
 0xd8a   : > { %v2969_v17 = vadd.f32 %v9532_v0, %v2968_v57 }
 0xd8b   : > { %3026 = vmax.xlane.f32.xlu1 %v2977_v34 }
 0xd8c   : > { %3020 = vmax.xlane.f32.xlu0 %v8323_v49 }
 0xd8e   : > { %v5882_v13 = vpop.f32.mrb[68].mxu0 }
 0xd8f   : > { %3022 = vmax.xlane.f32.xlu1 %v2969_v17  ;;  %v2981_v60 = vpop.f32.mrb[69].mxu0  ;;  %v8337_v4 = vadd.f32 %v9532_v0, %v5882_v13 }
 0xd90   : > { %3024 = vmax.xlane.f32.xlu0 %v2974_v55  ;;  %v5883_v3 = vpop.f32.mrb[70].mxu0  ;;  %v8330_v14 = vadd.f32 %v9532_v0, %v2981_v60 }
 0xd91   : > { %v2993_v24 = vadd.f32 %v9532_v0, %v5883_v3  ;;  %v2984_v45 = vpop.f32.mrb[71].mxu0 }
 0xd92   : > { %v8334_v6 = vadd.f32 %v9532_v0, %v2984_v45 }
 0xd93   : > { %3034 = vmax.xlane.f32.xlu1 %v2993_v24 }
 0xd94   : > { %3028 = vmax.xlane.f32.xlu0 %v8330_v14 }
 0xd96   : > { %v5886_v48 = vpop.f32.mrb[72].mxu0 }
 0xd97   : > { %3030 = vmax.xlane.f32.xlu1 %v8334_v6  ;;  %v2997_v52 = vpop.f32.mrb[73].mxu0  ;;  %v8353_v3 = vadd.f32 %v9532_v0, %v5886_v48 }
 0xd98   : > { %3032 = vmax.xlane.f32.xlu0 %v8337_v4  ;;  %v5887_v33 = vpop.f32.mrb[74].mxu0  ;;  %v8345_v60 = vadd.f32 %v9532_v0, %v2997_v52 }
 0xd99   : > { %v8342_v18 = vadd.f32 %v9532_v0, %v5887_v33  ;;  %v3000_v57 = vpop.f32.mrb[75].mxu0 }
 0xd9a   : > { %v8350_v13 = vadd.f32 %v9532_v0, %v3000_v57 }
 0xd9b   : > { %3042 = vmax.xlane.f32.xlu1 %v8342_v18 }
 0xd9c   : > { %3036 = vmax.xlane.f32.xlu0 %v8345_v60 }
 0xd9f   : > { %3038 = vmax.xlane.f32.xlu1 %v8350_v13 }
 0xda0   : > { %3040 = vmax.xlane.f32.xlu0 %v8353_v3 }
 0xe0f   : > { %v3013_v45 = vpop.xlane.xlu1 %3012 }
 0xe10   : > { %v3044_v47 = vsub.f32 %v2950_v2, %v3013_v45 }
 0xe11   : > { %v3015_v33 = vpop.xlane.xlu0 %3014 }
 0xe12   : > { %v3045_v56 = vsub.f32 %v2953_v61, %v3015_v33  ;;  %v3060_v48 = vmul.f32 1.442695, %v3044_v47 }
 0xe13   : > { %v3019_v51 = vpop.xlane.xlu1 %3018 }
 0xe14   : > { %v3047_v52 = vsub.f32 %v2961_v21, %v3019_v51  ;;  %v3062_v59 = vmul.f32 1.442695, %v3045_v56 }
 0xe15   : > { %v3017_v41 = vpop.xlane.xlu0 %3016 }
 0xe16   : > { %v3066_v11 = vmul.f32 1.442695, %v3047_v52  ;;  %v3046_v54 = vsub.f32 %v2958_v15, %v3017_v41 }
 0xe18   : > { %6483 = vpow2.f32 %v3066_v11  ;;  %v3064_v57 = vmul.f32 1.442695, %v3046_v54  ;;  %v3027_v36 = vpop.xlane.xlu1 %3026 }
 0xe19   : > { %v3051_v1 = vsub.f32 %v2977_v34, %v3027_v36  ;;  %v3021_v0 = vpop.xlane.xlu0 %3020 }
 0xe1a   : > { %6485 = vpow2.f32 %v3064_v57  ;;  %v3048_v51 = vsub.f32 %v8323_v49, %v3021_v0 }
 0xe1b   : > { %6487 = vpow2.f32 %v3062_v59  ;;  %v3074_v62 = vmul.f32 1.442695, %v3051_v1 }
 0xe1c   : > { %v3023_v53 = vpop.xlane.xlu1 %3022  ;;  %6489 = vpow2.f32 %v3060_v48  ;;  %v3068_v36 = vmul.f32 1.442695, %v3048_v51 }
 0xe1d   : > { %v3049_v30 = vsub.f32 %v2969_v17, %v3023_v53  ;;  %v3025_v35 = vpop.xlane.xlu0 %3024  ;;  %6491 = vpow2.f32 %v3074_v62 }
 0xe1e   : > { %v3050_v61 = vsub.f32 %v2974_v55, %v3025_v35 }
 0xe1f   : > { %v3070_v2 = vmul.f32 1.442695, %v3049_v30 }
 0xe20   : > { %v3072_v41 = vmul.f32 1.442695, %v3050_v61  ;;  %v3035_v56 = vpop.xlane.xlu1 %3034 }
 0xe21   : > { %v3055_v11 = vsub.f32 %v2993_v24, %v3035_v56  ;;  %v3029_v54 = vpop.xlane.xlu0 %3028 }
 0xe22   : > { %v8358_v21 = vpop.eup %6483  ;;  %6493 = vpow2.f32 %v3072_v41  ;;  %v3052_v62 = vsub.f32 %v8330_v14, %v3029_v54 }
 0xe23   : > { %3098 = vadd.xlane.f32.xlu1 %v8358_v21  ;;  %6495 = vpow2.f32 %v3070_v2  ;;  %v3082_v53 = vmul.f32 1.442695, %v3055_v11 }
 0xe24   : > { %v8361_v1 = vpop.eup %6485  ;;  %v3031_v59 = vpop.xlane.xlu1 %3030  ;;  %6497 = vpow2.f32 %v3068_v36 }
 0xe25   : > { %v3053_v47 = vsub.f32 %v8334_v6, %v3031_v59  ;;  %3096 = vadd.xlane.f32.xlu0 %v8361_v1  ;;  %v3033_v35 = vpop.xlane.xlu0 %3032  ;;  %v8365_v30 = vpop.eup %6487  ;;  %6499 = vpow2.f32 %v3082_v53  ;;  %v3076_v6 = vmul.f32 1.442695, %v3052_v62 }
 0xe26   : > { %v3054_v15 = vsub.f32 %v8337_v4, %v3033_v35  ;;  %v8370_v34 = vpop.eup %6489 }
 0xe27   : > { %3094 = vadd.xlane.f32.xlu1 %v8365_v30  ;;  %v3078_v49 = vmul.f32 1.442695, %v3053_v47  ;;  %v8373_v24 = vpop.eup %6491 }
 0xe28   : > { %v3080_v17 = vmul.f32 1.442695, %v3054_v15  ;;  %v3043_v56 = vpop.xlane.xlu1 %3042 }
 0xe29   : > { %3092 = vadd.xlane.f32.xlu0 %v8370_v34  ;;  %v3037_v55 = vpop.xlane.xlu0 %3036  ;;  %v3059_v11 = vsub.f32 %v8342_v18, %v3043_v56 }
 0xe2a   : > { %6501 = vpow2.f32 %v3080_v17  ;;  %v3056_v33 = vsub.f32 %v8345_v60, %v3037_v55 }
 0xe2b   : > { %3106 = vadd.xlane.f32.xlu1 %v8373_v24  ;;  %6503 = vpow2.f32 %v3078_v49  ;;  %v3090_v36 = vmul.f32 1.442695, %v3059_v11 }
 0xe2c   : > { %v8376_v45 = vpop.eup %6493  ;;  %6505 = vpow2.f32 %v3076_v6  ;;  %v3084_v51 = vmul.f32 1.442695, %v3056_v33  ;;  %v3039_v54 = vpop.xlane.xlu1 %3038 }
 0xe2d   : > { %3104 = vadd.xlane.f32.xlu0 %v8376_v45  ;;  %v3041_v14 = vpop.xlane.xlu0 %3040  ;;  %v8379_v4 = vpop.eup %6495  ;;  %v3057_v53 = vsub.f32 %v8350_v13, %v3039_v54 }
 0xe2e   : > { %v3058_v52 = vsub.f32 %v8353_v3, %v3041_v14  ;;  %v8384_v57 = vpop.eup %6497 }
 0xe2f   : > { %3102 = vadd.xlane.f32.xlu1 %v8379_v4  ;;  %v8387_v48 = vpop.eup %6499  ;;  %v3086_v59 = vmul.f32 1.442695, %v3057_v53 }
 0xe30   : > { %v3088_v0 = vmul.f32 1.442695, %v3058_v52 }
 0xe31   : > { %3100 = vadd.xlane.f32.xlu0 %v8384_v57 }
 0xe32   : > { %6507 = vpow2.f32 %v3088_v0 }
 0xe33   : > { %3114 = vadd.xlane.f32.xlu1 %v8387_v48  ;;  %6509 = vpow2.f32 %v3084_v51 }
 0xe34   : > { %v8390_v61 = vpop.eup %6501  ;;  %6511 = vpow2.f32 %v3090_v36 }
 0xe35   : > { %3112 = vadd.xlane.f32.xlu0 %v8390_v61  ;;  %v8393_v60 = vpop.eup %6503  ;;  %6513 = vpow2.f32 %v3086_v59 }
 0xe36   : > { %v8396_v3 = vpop.eup %6505 }
 0xe37   : > { %3110 = vadd.xlane.f32.xlu1 %v8393_v60 }
 0xe39   : > { %3108 = vadd.xlane.f32.xlu0 %v8396_v3 }
 0xe3c   : > { %v8399_v2 = vpop.eup %6507 }
 0xe3d   : > { %3120 = vadd.xlane.f32.xlu0 %v8399_v2  ;;  %v8402_v41 = vpop.eup %6509 }
 0xe3e   : > { %v8415_v47 = vpop.eup %6511 }
 0xe3f   : > { %v8419_v18 = vpop.eup %6513 }
 0xe41   : > { %3116 = vadd.xlane.f32.xlu0 %v8402_v41 }
 0xe48   : > { %3244 = vrot.lane.b32.xlu1 %v7002_v26, %s6858_s29 }
 0xe4c   : > { %3246 = vrot.lane.b32.xlu1 %v7020_v44, %s6858_s29 }
 0xe57   : > { %3242 = vrot.lane.b32.xlu0 %v7004_v28, %s6858_s29 }
 0xe5b   : > { %3248 = vrot.lane.b32.xlu0 %v7018_v42, %s6858_s29 }
 0xe5f   : > { %3252 = vrot.lane.b32.xlu0 %v7032_v58, %s6858_s29 }
 0xe63   : > { %3256 = vrot.lane.b32.xlu0 %v9483_v10, %s6858_s29 }
 0xe67   : > { %3403 = vrot.lane.b32.xlu0 %v7002_v26, %s6859_s16 }
 0xe6b   : > { %3407 = vrot.lane.b32.xlu0 %v7018_v42, %s6859_s16 }
 0xe6f   : > { %3411 = vrot.lane.b32.xlu0 %v7032_v58, %s6859_s16 }
 0xe70   : > { %3122 = vadd.xlane.f32.xlu1 %v8415_v47 }
 0xe73   : > { %3415 = vrot.lane.b32.xlu0 %v9483_v10, %s6859_s16 }
 0xe74   : > { %3118 = vadd.xlane.f32.xlu1 %v8419_v18 }
 0xe77   : > { %3387 = vrot.lane.b32.xlu0 %v7002_v26, %s6860_s17 }
 0xe7b   : > { %3391 = vrot.lane.b32.xlu0 %v7018_v42, %s6860_s17 }
 0xe7f   : > { %3395 = vrot.lane.b32.xlu0 %v7032_v58, %s6860_s17 }
 0xe83   : > { %3399 = vrot.lane.b32.xlu0 %v9483_v10, %s6860_s17 }
 0xe85   : > { %3250 = vrot.lane.b32.xlu1 %v9485_v16, %s6858_s29 }
 0xe89   : > { %3254 = vrot.lane.b32.xlu1 %v9486_v25, %s6858_s29  ;;  %s6864_s29 = smov 40  }
 0xe8d   : > { %3401 = vrot.lane.b32.xlu1 %v7004_v28, %s6859_s16 }
 0xe91   : > { %3405 = vrot.lane.b32.xlu1 %v7020_v44, %s6859_s16 }
 0xe95   : > { %3409 = vrot.lane.b32.xlu1 %v9485_v16, %s6859_s16 }
 0xe99   : > { %3413 = vrot.lane.b32.xlu1 %v9486_v25, %s6859_s16  ;;  %s6865_s16 = smov 68  }
 0xe9d   : > { %3385 = vrot.lane.b32.xlu1 %v7004_v28, %s6860_s17 }
 0xea1   : > { %3389 = vrot.lane.b32.xlu1 %v7020_v44, %s6860_s17 }
 0xea5   : > { %3393 = vrot.lane.b32.xlu1 %v9485_v16, %s6860_s17 }
 0xea9   : > { %3397 = vrot.lane.b32.xlu1 %v9486_v25, %s6860_s17  ;;  %s6866_s17 = smov 100  }
 0xeb0   : > { %v3099_v13 = vpop.xlane.xlu1 %3098 }
 0xeb1   : > { %6515 = vrcp.f32 %v3099_v13 }
 0xeb2   : > { %v3097_v35 = vpop.xlane.xlu0 %3096 }
 0xeb3   : > { %6517 = vrcp.f32 %v3097_v35 }
 0xeb4   : > { %v3095_v62 = vpop.xlane.xlu1 %3094 }
 0xeb5   : > { %6519 = vrcp.f32 %v3095_v62 }
 0xeb6   : > { %v3093_v15 = vpop.xlane.xlu0 %3092 }
 0xeb7   : > { %6521 = vrcp.f32 %v3093_v15 }
 0xeb8   : > { %v3107_v49 = vpop.xlane.xlu1 %3106 }
 0xeb9   : > { %6523 = vrcp.f32 %v3107_v49 }
 0xeba   : > { %v3105_v17 = vpop.xlane.xlu0 %3104 }
 0xebb   : > { %v6516_v55 = vpop.eup %6515  ;;  %6525 = vrcp.f32 %v3105_v17 }
 0xebc   : > { %v8438_v6 = vmul.f32 %v6516_v55, %v8358_v21  ;;  %v3103_v14 = vpop.xlane.xlu1 %3102 }
 0xebd   : > { %v6518_v33 = vpop.eup %6517  ;;  %6527 = vrcp.f32 %v3103_v14 }
 0xebe   : > { %v8442_v52 = vadd.f32 %v8438_v6, %v8189_v40  ;;  %v8445_v0 = vmul.f32 %v6518_v33, %v8361_v1  ;;  %v3101_v51 = vpop.xlane.xlu0 %3100 }
 0xebf   : > { %v6520_v56 = vpop.eup %6519  ;;  %6529 = vrcp.f32 %v3101_v51 }
 0xec0   : > { %v8449_v11 = vadd.f32 %v8445_v0, %v8196_v50  ;;  %v3141_v21 = vmul.f32 %v6520_v56, %v8365_v30  ;;  %v3115_v54 = vpop.xlane.xlu1 %3114 }
 0xec1   : > { %v6522_v36 = vpop.eup %6521  ;;  %6531 = vrcp.f32 %v3115_v54 }
 0xec2   : > { %v8453_v53 = vadd.f32 %v3141_v21, %v8200_v39  ;;  %v3140_v40 = vmul.f32 %v6522_v36, %v8370_v34  ;;  %v3113_v59 = vpop.xlane.xlu0 %3112 }
 0xec3   : > { %v6524_v1 = vpop.eup %6523  ;;  %6533 = vrcp.f32 %v3113_v59 }
 0xec4   : > { %v8457_v13 = vadd.f32 %v3140_v40, %v8204_v22  ;;  %v3147_v35 = vmul.f32 %v6524_v1, %v8373_v24  ;;  %v3111_v50 = vpop.xlane.xlu1 %3110 }
 0xec5   : > { %v6526_v62 = vpop.eup %6525  ;;  %6535 = vrcp.f32 %v3111_v50 }
 0xec6   : > { %v8461_v30 = vadd.f32 %v3147_v35, %v8208_v20  ;;  %v3146_v15 = vmul.f32 %v6526_v62, %v8376_v45  ;;  %v3109_v39 = vpop.xlane.xlu0 %3108 }
 0xec7   : > { %v6528_v49 = vpop.eup %6527  ;;  %6537 = vrcp.f32 %v3109_v39 }
 0xec8   : > { %v8465_v34 = vadd.f32 %v3146_v15, %v8212_v5  ;;  %v3145_v17 = vmul.f32 %v6528_v49, %v8379_v4  ;;  %v3206_v49 = vmul.f32 %v8445_v0, %v7083_v23 }
 0xec9   : > { %v6530_v22 = vpop.eup %6529 }
 0xeca   : > { %v8469_v55 = vadd.f32 %v3145_v17, %v8216_v37  ;;  %v3144_v24 = vmul.f32 %v6530_v22, %v8384_v57  ;;  %v3121_v14 = vpop.xlane.xlu0 %3120 }
 0xecb   : > { %v6532_v33 = vpop.eup %6531  ;;  %6539 = vrcp.f32 %v3121_v14 }
 0xecc   : > { %v8473_v20 = vadd.f32 %v3144_v24, %v8220_v32  ;;  %v3151_v45 = vmul.f32 %v6532_v33, %v8387_v48 }
 0xecd   : > { %v6534_v51 = vpop.eup %6533 }
 0xece   : > { %v8477_v5 = vadd.f32 %v3151_v45, %v8224_v9  ;;  %v3150_v4 = vmul.f32 %v6534_v51, %v8390_v61  ;;  %v3117_v56 = vpop.xlane.xlu0 %3116  ;;  %v3245_v61 = vpop.permute.xlu1 %3244  ;;  %v3209_v51 = vmul.f32 %v3145_v17, %v7093_v31 }
 0xecf   : > { %v6536_v54 = vpop.eup %6535  ;;  %6541 = vrcp.f32 %v3117_v56 }
 0xed0   : > { %v8481_v37 = vadd.f32 %v3150_v4, %v8228_v7  ;;  %v3149_v57 = vmul.f32 %v6536_v54, %v8393_v60  ;;  %v9533_v54 = vld [vmem:[#allocation12_spill] sm:$0xff] }
 0xed1   : > { %v6538_v36 = vpop.eup %6537 }
 0xed2   : > { %v8485_v32 = vadd.f32 %v3149_v57, %v8232_v43  ;;  %v3148_v48 = vmul.f32 %v6538_v36, %v8396_v3  ;;  %v3243_v59 = vpop.permute.xlu0 %3242  ;;  %v3247_v50 = vpop.permute.xlu1 %3246  ;;  %v3210_v36 = vmul.f32 %v3146_v15, %v9533_v54 }
 0xed3   : > { %5889 = vmatpush3.bf16.msra.mxu1 %v3243_v59  ;;  %v9534_v59 = vld [vmem:[#allocation13_spill] sm:$0xff] }
 0xed4   : > { %v8489_v9 = vadd.f32 %v3148_v48, %v8236_v63  ;;  %5890 = vmatprep.subr.bf16.mxu1 %v9473_v12 }
 0xed5   : > { %v6540_v1 = vpop.eup %6539 }
 0xed6   : > { %v3154_v7 = vmul.f32 %v6540_v1, %v8399_v2  ;;  %v3249_v62 = vpop.permute.xlu0 %3248  ;;  %v3204_v2 = vmul.f32 %v3140_v40, %v9503_v8  ;;  %v9535_v1 = vld [vmem:[#allocation14_spill] sm:$0xff] }
 0xed7   : > { %5891 = vmatpush3.bf16.msra.mxu1 %v3245_v61 }
 0xed8   : > { %v8494_v60 = vadd.f32 %v3154_v7, %v8241_v38  ;;  %5892 = vmatprep.subr.bf16.mxu1 %v9473_v12  ;;  %v3205_v38 = vmul.f32 %v3141_v21, %v7185_v19  ;;  %v3211_v21 = vmul.f32 %v3147_v35, %v9534_v59  ;;  %v9538_v35 = vld [vmem:[#allocation16_spill] sm:$0xff] }
 0xed9   : > { %v6542_v43 = vpop.eup %6541 }
 0xeda   : > { %v3152_v3 = vmul.f32 %v6542_v43, %v8402_v41  ;;  %v3220_v39 = vadd.f32 %v3205_v38, %v3204_v2  ;;  %v3207_v41 = vmul.f32 %v8438_v6, %v7087_v27  ;;  %v3212_v43 = vmul.f32 %v3148_v48, %v9535_v1  ;;  %v9537_v38 = vld [vmem:[#allocation15_spill] sm:$0xff] }
 0xedb   : > { %5893 = vmatpush3.bf16.msra.mxu1 %v3247_v50 }
 0xedc   : > { %v8499_v63 = vadd.f32 %v3152_v3, %v8246_v46  ;;  %5894 = vmatprep.subr.bf16.mxu1 %v9473_v12  ;;  %v3221_v22 = vadd.f32 %v3220_v39, %v3206_v49  ;;  %v3208_v46 = vmul.f32 %v3144_v24, %v7089_v29  ;;  %v3214_v39 = vmul.f32 %v3150_v4, %v9537_v38 }
 0xede   : > { %v3222_v14 = vadd.f32 %v3221_v22, %v3207_v41  ;;  %v3215_v22 = vmul.f32 %v3151_v45, %v9538_v35  ;;  %v3253_v41 = vpop.permute.xlu0 %3252 }
 0xedf   : > { %5895 = vmatpush3.bf16.msra.mxu1 %v3249_v62  ;;  %v9536_v62 = vld [vmem:[#allocation17_spill] sm:$0xff] }
 0xee0   : > { %5896 = vmatprep.subr.bf16.mxu1 %v9473_v12  ;;  %v3223_v33 = vadd.f32 %v3222_v14, %v3208_v46  ;;  %v3213_v6 = vmul.f32 %v3149_v57, %v9536_v62  ;;  %v9539_v14 = vld [vmem:[#allocation18_spill] sm:$0xff] }
 0xee1   : > { %v3216_v57 = vmul.f32 %v3152_v3, %v9539_v14 }
 0xee2   : > { %v3224_v56 = vadd.f32 %v3223_v33, %v3209_v51  ;;  %v9540_v33 = vld [vmem:[#allocation20_spill] sm:$0xff] }
 0xee4   : > { %v3225_v40 = vadd.f32 %v3224_v56, %v3210_v36 }
 0xee6   : > { %v3226_v61 = vadd.f32 %v3225_v40, %v3211_v21  ;;  %v9542_v21 = vld [vmem:[#allocation22_spill] sm:$0xff] }
 0xee8   : > { %v3227_v50 = vadd.f32 %v3226_v61, %v3212_v43  ;;  %v9544_v61 = vld [vmem:[#allocation29_spill] sm:$0xff]  ;;  %v9545_v43 = vld [vmem:[#allocation32_spill] sm:$0xff] }
 0xee9   : > { %v3218_v3 = vmul.f32 %v3154_v7, %v9545_v43  ;;  %v5301_v7 = vld [vmem:[%s9378_s5 + $0x10] sm:$0xf] }
 0xeea   : > { %v3228_v24 = vadd.f32 %v3227_v50, %v3213_v6  ;;  %v9546_v6 = vld [vmem:[#allocation31_spill] sm:$0xff] }
 0xeec   : > { %v3229_v49 = vadd.f32 %v3228_v24, %v3214_v39 }
 0xeee   : > { %v3230_v46 = vadd.f32 %v3229_v49, %v3215_v22 }
 0xef0   : > { %v3231_v40 = vadd.f32 %v3230_v46, %v3216_v57 }
 0xefd   : > { %v3123_v0 = vpop.xlane.xlu1 %3122 }
 0xefe   : > { %6543 = vrcp.f32 %v3123_v0  ;;  %v3257_v0 = vpop.permute.xlu0 %3256 }
 0xf01   : > { %v3119_v2 = vpop.xlane.xlu1 %3118 }
 0xf02   : > { %6545 = vrcp.f32 %v3119_v2 }
 0xf05   : > { %v3251_v17 = vpop.permute.xlu1 %3250 }
 0xf06   : > { %5897 = vmatpush3.bf16.msra.mxu1 %v3251_v17 }
 0xf07   : > { %5898 = vmatprep.subr.bf16.mxu1 %v9473_v12 }
 0xf08   : > { %v6544_v15 = vpop.eup %6543 }
 0xf09   : > { %v3155_v48 = vmul.f32 %v6544_v15, %v8415_v47  ;;  %v3255_v36 = vpop.permute.xlu1 %3254 }
 0xf0a   : > { %5899 = vmatpush3.bf16.msra.mxu1 %v3253_v41 }
 0xf0b   : > { %v8521_v51 = vadd.f32 %v3155_v48, %v9540_v33  ;;  %5900 = vmatprep.subr.bf16.mxu1 %v9473_v12  ;;  %v3219_v2 = vmul.f32 %v3155_v48, %v9546_v6 }
 0xf0c   : > { %v6546_v4 = vpop.eup %6545 }
 0xf0d   : > { %9541 = vst [vmem:[#allocation19_spill] sm:$0xff] %v8521_v51  ;;  %v3153_v56 = vmul.f32 %v6546_v4, %v8419_v18  ;;  %v3402_v57 = vpop.permute.xlu1 %3401 }
 0xf0e   : > { %5901 = vmatpush3.bf16.msra.mxu1 %v3255_v36 }
 0xf0f   : > { %v8526_v45 = vadd.f32 %v3153_v56, %v9542_v21  ;;  %v3217_v47 = vmul.f32 %v3153_v56, %v9544_v61  ;;  %5902 = vmatprep.subr.bf16.mxu1 %v9473_v12  ;;  %v3442_v21 = vsel %vm700_vm1, %v3402_v57, 0 }
 0xf11   : > { %9543 = vst [vmem:[#allocation23_spill] sm:$0xff] %v8526_v45  ;;  %v3232_v50 = vadd.f32 %v3231_v40, %v3217_v47  ;;  %v3406_v48 = vpop.permute.xlu1 %3405  ;;  %v3404_v47 = vpop.permute.xlu0 %3403 }
 0xf12   : > { %5903 = vmatpush3.bf16.msra.mxu1 %v3257_v0 }
 0xf13   : > { %v3233_v24 = vadd.f32 %v3232_v50, %v3218_v3  ;;  %5908 = vmatprep.subr.mxu1 %v9473_v12  ;;  %v3445_v50 = vsel %vm700_vm1, %v3404_v47, 0 }
 0xf15   : > { %v3234_v18 = vadd.f32 %v3233_v24, %v3219_v2  ;;  %v3410_v33 = vpop.permute.xlu1 %3409  ;;  %v3448_v2 = vsel %vm700_vm1, %v3406_v48, 0  ;;  %v3408_v24 = vpop.permute.xlu0 %3407 }
 0xf17   : > { %v3235_v39 = vrot.slane %v3234_v18, 4 }
 0xf19   : > { %v3236_v17 = vadd.f32 %v3235_v39, %v3234_v18  ;;  %v3414_v4 = vpop.permute.xlu1 %3413  ;;  %v3451_v18 = vsel %vm700_vm1, %v3408_v24, 0  ;;  %v3454_v39 = vsel %vm700_vm1, %v3410_v33, 0 }
 0xf1b   : > { %v3237_v49 = vrot.slane %v3236_v17, 2 }
 0xf1d   : > { %v3238_v15 = vadd.f32 %v3237_v49, %v3236_v17  ;;  %v3386_v36 = vpop.permute.xlu1 %3385  ;;  %v3412_v17 = vpop.permute.xlu0 %3411 }
 0xf1e   : > { %v3457_v49 = vsel %vm700_vm1, %v3412_v17, 0 }
 0xf1f   : > { %v3239_v22 = vrot.slane %v3238_v15, 1 }
 0xf21   : > { %v3240_v41 = vadd.f32 %v3239_v22, %v3238_v15  ;;  %v3460_v15 = vsel %vm700_vm1, %v3414_v4, 0  ;;  %v3416_v22 = vpop.permute.xlu0 %3415 }
 0xf23   : > { %v3241_v46 = vpack.c.bf16 %v3240_v41, %v3240_v41  ;;  %v3463_v41 = vsel %vm700_vm1, %v3416_v22, 0 }
 0xf25   : > { %5905 = vmatmul.mubr.bf16.vlgmr.msra.gmra.mrb[48].mxu1 %v3241_v46  ;;  %v3388_v46 = vpop.permute.xlu0 %3387 }
 0xf26   : > { %5909 = vmatpush3.msk.msra.mxu1 %vm1585_vm3, %v5301_v7  ;;  %5910 = vmatprep.mubr.msk.f32.mxu1 %vm6848_vm2, %v9473_v12  ;;  %v3390_v7 = vpop.permute.xlu1 %3389 }
 0xf27   : > { %6124 = vmatprep.subr.msk.bf16.mxu1 %vm700_vm1, %v3402_v57 }
 0xf29   : > { %v3392_v57 = vpop.permute.xlu0 %3391 }
 0xff8   : > { %v3300_v56 = vpop.f32.mrb[48].mxu1 }
 0xff9   : > { %v5906_v40 = vpop.f32.mrb[49].mxu1  ;;  %5911 = vmatmul.mubr.msk.f32.vlgmr.msra.gmra.mrb[30].mxu1 %vm700_vm1, %v3300_v56 }
 0xffa   : > { %5914 = vmatpush3.bf16.xpose.msra.mxu1 %v3442_v21  ;;  %v3303_v3 = vpop.f32.mrb[50].mxu1  ;;  %5929 = vmatprep.mubr.msk.bf16.mxu1 %vm700_vm1, %v3386_v36  ;;  %v9547_v40 = vld [vmem:[#allocation25_spill] sm:$0xff] }
 0xffb   : > { %6125 = vmatprep.subr.msk.bf16.mxu1 %vm700_vm1, %v3404_v47  ;;  %v5907_v0 = vpop.f32.mrb[51].mxu1 }
0x1002   : > { %5916 = vmatpush3.bf16.xpose.msra.mxu1 %v3445_v50  ;;  %v8571_v50 = vld [vmem:[%s7126_s14] ss:$0 sm:$0xff] }
0x1003   : > { %6126 = vmatprep.subr.msk.bf16.mxu1 %vm700_vm1, %v3406_v48  ;;  %v3394_v48 = vpop.permute.xlu1 %3393  ;;  %9549 = vst [vmem:[#allocation30_spill] sm:$0xff] %v8571_v50 }
0x100a   : > { %5918 = vmatpush3.bf16.xpose.msra.mxu1 %v3448_v2 }
0x100b   : > { %6127 = vmatprep.subr.msk.bf16.mxu1 %vm700_vm1, %v3408_v24 }
0x1012   : > { %5920 = vmatpush3.bf16.xpose.msra.mxu1 %v3451_v18 }
0x1013   : > { %6128 = vmatprep.subr.msk.bf16.mxu1 %vm700_vm1, %v3410_v33  ;;  %v3396_v33 = vpop.permute.xlu0 %3395 }
0x1017   : > { %v3400_v56 = vpop.permute.xlu0 %3399 }
0x101a   : > { %5922 = vmatpush3.bf16.xpose.msra.mxu1 %v3454_v39 }
0x101b   : > { %6129 = vmatprep.subr.msk.bf16.mxu1 %vm700_vm1, %v3412_v17 }
0x1022   : > { %5924 = vmatpush3.bf16.xpose.msra.mxu1 %v3457_v49 }
0x1023   : > { %6130 = vmatprep.subr.msk.bf16.mxu1 %vm700_vm1, %v3414_v4  ;;  %v3398_v4 = vpop.permute.xlu1 %3397 }
0x102a   : > { %5926 = vmatpush3.bf16.xpose.msra.mxu1 %v3460_v15 }
0x102b   : > { %6131 = vmatprep.subr.msk.bf16.mxu1 %vm700_vm1, %v3416_v22 }
0x1032   : > { %5928 = vmatpush3.bf16.xpose.msra.mxu1 %v3463_v41 }
0x1033   : > { %6002 = vmatprep.subr.bf16.mxu1 %v9473_v12 }
0x1039   : > { %5930 = vmatmul.mubr.msk.bf16.vlgmr.msra.gmra.mrb[52].mxu1 %vm700_vm1, %v3388_v46 }
0x103a   : > { %5933 = vmatprep.mubr.msk.bf16.mxu1 %vm700_vm1, %v3390_v7 }
0x1041   : > { %5934 = vmatmul.mubr.msk.bf16.gmra.mrb[56].mxu1 %vm700_vm1, %v3392_v57 }
0x1042   : > { %5937 = vmatprep.mubr.msk.bf16.mxu1 %vm700_vm1, %v3394_v48 }
0x1049   : > { %5938 = vmatmul.mubr.msk.bf16.gmra.mrb[60].mxu1 %vm700_vm1, %v3396_v33 }
0x104a   : > { %5941 = vmatprep.mubr.msk.bf16.mxu1 %vm700_vm1, %v3398_v4 }
0x1051   : > { %5942 = vmatmul.mubr.msk.bf16.gmra.mrb[64].mxu1 %vm700_vm1, %v3400_v56 }
0x1052   : > { %6018 = vmatprep.mubr.msk.bf16.mxu1 %vm6848_vm2, %v9473_v12 }
0x10cc   : > { %v3380_v36 = vpop.f32.mrb[30].mxu1 }
0x10cd   : > { %v8568_v21 = vadd.f32 %v3380_v36, %v9547_v40  ;;  %v5912_v47 = vpop.f32.mrb[31].mxu1 }
0x10cf   : > { %9548 = vst [vmem:[#allocation26_spill] sm:$0xff] %v8568_v21 }
0x110c   : > { %v5931_v3 = vpop.f32.mrb[52].mxu1 }
0x110d   : > { %v3499_v0 = vpop.f32.mrb[53].mxu1  ;;  %v3508_v49 = vadd.f32 %v8571_v50, %v5931_v3 }
0x110e   : > { %v3500_v2 = vadd.f32 %v8571_v50, %v3499_v0  ;;  %v5932_v24 = vpop.f32.mrb[54].mxu1 }
0x110f   : > { %v3502_v18 = vpop.f32.mrb[55].mxu1  ;;  %v3511_v17 = vadd.f32 %v8571_v50, %v5932_v24 }
0x1110   : > { %v3503_v39 = vadd.f32 %v8571_v50, %v3502_v18  ;;  %3562 = vmax.xlane.f32.xlu1 %v3500_v2 }
0x1112   : > { %3564 = vmax.xlane.f32.xlu0 %v3503_v39 }
0x1114   : > { %3568 = vmax.xlane.f32.xlu1 %v3511_v17  ;;  %v5935_v15 = vpop.f32.mrb[56].mxu1 }
0x1115   : > { %v3515_v22 = vpop.f32.mrb[57].mxu1  ;;  %v3524_v33 = vadd.f32 %v8571_v50, %v5935_v15 }
0x1116   : > { %3566 = vmax.xlane.f32.xlu0 %v3508_v49  ;;  %v5936_v41 = vpop.f32.mrb[58].mxu1  ;;  %v8579_v57 = vadd.f32 %v8571_v50, %v3515_v22 }
0x1117   : > { %v3527_v46 = vadd.f32 %v8571_v50, %v5936_v41  ;;  %v3518_v7 = vpop.f32.mrb[59].mxu1 }
0x1118   : > { %v3519_v48 = vadd.f32 %v8571_v50, %v3518_v7 }
0x1119   : > { %3576 = vmax.xlane.f32.xlu1 %v3527_v46 }
0x111a   : > { %3570 = vmax.xlane.f32.xlu0 %v8579_v57 }
0x111c   : > { %v5939_v4 = vpop.f32.mrb[60].mxu1 }
0x111d   : > { %3572 = vmax.xlane.f32.xlu1 %v3519_v48  ;;  %v3531_v56 = vpop.f32.mrb[61].mxu1  ;;  %v8593_v24 = vadd.f32 %v8571_v50, %v5939_v4 }
0x111e   : > { %3574 = vmax.xlane.f32.xlu0 %v3524_v33  ;;  %v5940_v36 = vpop.f32.mrb[62].mxu1  ;;  %v8586_v3 = vadd.f32 %v8571_v50, %v3531_v56 }
0x111f   : > { %v3543_v40 = vadd.f32 %v8571_v50, %v5940_v36  ;;  %v3534_v47 = vpop.f32.mrb[63].mxu1 }
0x1120   : > { %v8590_v0 = vadd.f32 %v8571_v50, %v3534_v47 }
0x1121   : > { %3584 = vmax.xlane.f32.xlu1 %v3543_v40 }
0x1122   : > { %3578 = vmax.xlane.f32.xlu0 %v8586_v3 }
0x1124   : > { %v5943_v18 = vpop.f32.mrb[64].mxu1 }
0x1125   : > { %3580 = vmax.xlane.f32.xlu1 %v8590_v0  ;;  %v3547_v15 = vpop.f32.mrb[65].mxu1  ;;  %v8609_v36 = vadd.f32 %v8571_v50, %v5943_v18 }
0x1126   : > { %3582 = vmax.xlane.f32.xlu0 %v8593_v24  ;;  %v5944_v22 = vpop.f32.mrb[66].mxu1  ;;  %v8601_v56 = vadd.f32 %v8571_v50, %v3547_v15 }
0x1127   : > { %v8598_v41 = vadd.f32 %v8571_v50, %v5944_v22  ;;  %v3550_v7 = vpop.f32.mrb[67].mxu1 }
0x1128   : > { %v8606_v4 = vadd.f32 %v8571_v50, %v3550_v7 }
0x1129   : > { %3592 = vmax.xlane.f32.xlu1 %v8598_v41 }
0x112a   : > { %3586 = vmax.xlane.f32.xlu0 %v8601_v56 }
0x112d   : > { %3588 = vmax.xlane.f32.xlu1 %v8606_v4 }
0x112e   : > { %3590 = vmax.xlane.f32.xlu0 %v8609_v36 }
0x119d   : > { %v3563_v47 = vpop.xlane.xlu1 %3562 }
0x119e   : > { %v3594_v61 = vsub.f32 %v3500_v2, %v3563_v47 }
0x119f   : > { %v3565_v22 = vpop.xlane.xlu0 %3564 }
0x11a0   : > { %v3595_v6 = vsub.f32 %v3503_v39, %v3565_v22  ;;  %v3610_v50 = vmul.f32 1.442695, %v3594_v61 }
0x11a1   : > { %v3569_v21 = vpop.xlane.xlu1 %3568 }
0x11a2   : > { %v3597_v15 = vsub.f32 %v3511_v17, %v3569_v21  ;;  %v3612_v14 = vmul.f32 1.442695, %v3595_v6 }
0x11a3   : > { %v3567_v43 = vpop.xlane.xlu0 %3566 }
0x11a4   : > { %v3616_v45 = vmul.f32 1.442695, %v3597_v15  ;;  %v3596_v51 = vsub.f32 %v3508_v49, %v3567_v43 }
0x11a6   : > { %6547 = vpow2.f32 %v3616_v45  ;;  %v3614_v7 = vmul.f32 1.442695, %v3596_v51  ;;  %v3577_v35 = vpop.xlane.xlu1 %3576 }
0x11a7   : > { %v3601_v38 = vsub.f32 %v3527_v46, %v3577_v35  ;;  %v3571_v18 = vpop.xlane.xlu0 %3570 }
0x11a8   : > { %6549 = vpow2.f32 %v3614_v7  ;;  %v3598_v21 = vsub.f32 %v8579_v57, %v3571_v18 }
0x11a9   : > { %6551 = vpow2.f32 %v3612_v14  ;;  %v3624_v62 = vmul.f32 1.442695, %v3601_v38 }
0x11aa   : > { %v3573_v1 = vpop.xlane.xlu1 %3572  ;;  %6553 = vpow2.f32 %v3610_v50  ;;  %v3618_v35 = vmul.f32 1.442695, %v3598_v21 }
0x11ab   : > { %v3599_v59 = vsub.f32 %v3519_v48, %v3573_v1  ;;  %v3575_v54 = vpop.xlane.xlu0 %3574  ;;  %6555 = vpow2.f32 %v3624_v62 }
0x11ac   : > { %v3600_v39 = vsub.f32 %v3524_v33, %v3575_v54 }
0x11ad   : > { %v3620_v2 = vmul.f32 1.442695, %v3599_v59 }
0x11ae   : > { %v3622_v43 = vmul.f32 1.442695, %v3600_v39  ;;  %v3585_v6 = vpop.xlane.xlu1 %3584 }
0x11af   : > { %v3605_v45 = vsub.f32 %v3543_v40, %v3585_v6  ;;  %v3579_v51 = vpop.xlane.xlu0 %3578 }
0x11b0   : > { %v8614_v17 = vpop.eup %6547  ;;  %6557 = vpow2.f32 %v3622_v43  ;;  %v3602_v62 = vsub.f32 %v8586_v3, %v3579_v51 }
0x11b1   : > { %3648 = vadd.xlane.f32.xlu1 %v8614_v17  ;;  %6559 = vpow2.f32 %v3620_v2  ;;  %v3632_v1 = vmul.f32 1.442695, %v3605_v45 }
0x11b2   : > { %v8617_v38 = vpop.eup %6549  ;;  %v3581_v14 = vpop.xlane.xlu1 %3580  ;;  %6561 = vpow2.f32 %v3618_v35  ;;  %v3626_v40 = vmul.f32 1.442695, %v3602_v62 }
0x11b3   : > { %v3603_v61 = vsub.f32 %v8590_v0, %v3581_v14  ;;  %3646 = vadd.xlane.f32.xlu0 %v8617_v38  ;;  %v3583_v54 = vpop.xlane.xlu0 %3582  ;;  %v8621_v59 = vpop.eup %6551  ;;  %6563 = vpow2.f32 %v3632_v1 }
0x11b4   : > { %v3604_v50 = vsub.f32 %v8593_v24, %v3583_v54  ;;  %v8626_v49 = vpop.eup %6553 }
0x11b5   : > { %3644 = vadd.xlane.f32.xlu1 %v8621_v59  ;;  %v3628_v46 = vmul.f32 1.442695, %v3603_v61  ;;  %v8629_v33 = vpop.eup %6555 }
0x11b6   : > { %v3630_v57 = vmul.f32 1.442695, %v3604_v50  ;;  %v3593_v6 = vpop.xlane.xlu1 %3592 }
0x11b7   : > { %3642 = vadd.xlane.f32.xlu0 %v8626_v49  ;;  %v3587_v48 = vpop.xlane.xlu0 %3586  ;;  %v3609_v45 = vsub.f32 %v8598_v41, %v3593_v6 }
0x11b8   : > { %6565 = vpow2.f32 %v3630_v57  ;;  %v3606_v47 = vsub.f32 %v8601_v56, %v3587_v48 }
0x11b9   : > { %3656 = vadd.xlane.f32.xlu1 %v8629_v33  ;;  %6567 = vpow2.f32 %v3628_v46  ;;  %v3640_v35 = vmul.f32 1.442695, %v3609_v45 }
0x11ba   : > { %v8632_v0 = vpop.eup %6557  ;;  %6569 = vpow2.f32 %v3626_v40  ;;  %v3634_v21 = vmul.f32 1.442695, %v3606_v47  ;;  %v3589_v51 = vpop.xlane.xlu1 %3588 }
0x11bb   : > { %3654 = vadd.xlane.f32.xlu0 %v8632_v0  ;;  %v3591_v3 = vpop.xlane.xlu0 %3590  ;;  %v8635_v24 = vpop.eup %6559  ;;  %v3607_v1 = vsub.f32 %v8606_v4, %v3589_v51 }
0x11bc   : > { %v3608_v22 = vsub.f32 %v8609_v36, %v3591_v3  ;;  %v8640_v15 = vpop.eup %6561 }
0x11bd   : > { %3652 = vadd.xlane.f32.xlu1 %v8635_v24  ;;  %v8643_v18 = vpop.eup %6563  ;;  %v3636_v14 = vmul.f32 1.442695, %v3607_v1 }
0x11be   : > { %v3638_v7 = vmul.f32 1.442695, %v3608_v22 }
0x11bf   : > { %3650 = vadd.xlane.f32.xlu0 %v8640_v15 }
0x11c0   : > { %6571 = vpow2.f32 %v3638_v7 }
0x11c1   : > { %3664 = vadd.xlane.f32.xlu1 %v8643_v18  ;;  %6573 = vpow2.f32 %v3634_v21 }
0x11c2   : > { %v8646_v39 = vpop.eup %6565  ;;  %6575 = vpow2.f32 %v3640_v35 }
0x11c3   : > { %3662 = vadd.xlane.f32.xlu0 %v8646_v39  ;;  %v8649_v56 = vpop.eup %6567  ;;  %6577 = vpow2.f32 %v3636_v14 }
0x11c4   : > { %v8652_v36 = vpop.eup %6569 }
0x11c5   : > { %3660 = vadd.xlane.f32.xlu1 %v8649_v56 }
0x11c7   : > { %3658 = vadd.xlane.f32.xlu0 %v8652_v36 }
0x11ca   : > { %v8655_v2 = vpop.eup %6571 }
0x11cb   : > { %3670 = vadd.xlane.f32.xlu0 %v8655_v2  ;;  %v8658_v43 = vpop.eup %6573 }
0x11cc   : > { %v8671_v61 = vpop.eup %6575 }
0x11cd   : > { %v8675_v41 = vpop.eup %6577 }
0x11cf   : > { %3666 = vadd.xlane.f32.xlu0 %v8658_v43 }
0x11d6   : > { %3794 = vrot.lane.b32.xlu1 %v7002_v26, %s6861_s23 }
0x11da   : > { %3796 = vrot.lane.b32.xlu1 %v7020_v44, %s6861_s23 }
0x11e5   : > { %3792 = vrot.lane.b32.xlu0 %v7004_v28, %s6861_s23 }
0x11e9   : > { %3798 = vrot.lane.b32.xlu0 %v7018_v42, %s6861_s23 }
0x11ed   : > { %3802 = vrot.lane.b32.xlu0 %v7032_v58, %s6861_s23 }
0x11f1   : > { %3806 = vrot.lane.b32.xlu0 %v9483_v10, %s6861_s23 }
0x11f5   : > { %3953 = vrot.lane.b32.xlu0 %v7002_v26, %s6862_s24 }
0x11f9   : > { %3957 = vrot.lane.b32.xlu0 %v7018_v42, %s6862_s24 }
0x11fd   : > { %3961 = vrot.lane.b32.xlu0 %v7032_v58, %s6862_s24 }
0x11fe   : > { %3672 = vadd.xlane.f32.xlu1 %v8671_v61 }
0x1201   : > { %3965 = vrot.lane.b32.xlu0 %v9483_v10, %s6862_s24 }
0x1202   : > { %3668 = vadd.xlane.f32.xlu1 %v8675_v41 }
0x1205   : > { %3937 = vrot.lane.b32.xlu0 %v7002_v26, %s6863_s26 }
0x1209   : > { %3941 = vrot.lane.b32.xlu0 %v7018_v42, %s6863_s26 }
0x120d   : > { %3945 = vrot.lane.b32.xlu0 %v7032_v58, %s6863_s26 }
0x1211   : > { %3949 = vrot.lane.b32.xlu0 %v9483_v10, %s6863_s26 }
0x1213   : > { %3800 = vrot.lane.b32.xlu1 %v9485_v16, %s6861_s23 }
0x1217   : > { %3804 = vrot.lane.b32.xlu1 %v9486_v25, %s6861_s23  ;;  %s5342_s23 = sshll.u32 %s6976_s25, 7 }
0x1218   : > { %s9177_s27 = scalar_lea.vmem %s9382_s9, %s5342_s23 }
0x121b   : > { %3951 = vrot.lane.b32.xlu1 %v7004_v28, %s6862_s24 }
0x121f   : > { %3955 = vrot.lane.b32.xlu1 %v7020_v44, %s6862_s24 }
0x1223   : > { %3959 = vrot.lane.b32.xlu1 %v9485_v16, %s6862_s24 }
0x1227   : > { %3963 = vrot.lane.b32.xlu1 %v9486_v25, %s6862_s24  ;;  %s9303_s24 = scalar_lea.hbm %s9380_s7, %s9438_s22 }
0x122b   : > { %3935 = vrot.lane.b32.xlu1 %v7004_v28, %s6863_s26 }
0x122f   : > { %3939 = vrot.lane.b32.xlu1 %v7020_v44, %s6863_s26 }
0x1233   : > { %3943 = vrot.lane.b32.xlu1 %v9485_v16, %s6863_s26 }
0x1237   : > { %3947 = vrot.lane.b32.xlu1 %v9486_v25, %s6863_s26 }
0x123e   : > { %v3649_v4 = vpop.xlane.xlu1 %3648 }
0x123f   : > { %6579 = vrcp.f32 %v3649_v4 }
0x1240   : > { %v3647_v54 = vpop.xlane.xlu0 %3646 }
0x1241   : > { %6581 = vrcp.f32 %v3647_v54 }
0x1242   : > { %v3645_v62 = vpop.xlane.xlu1 %3644 }
0x1243   : > { %6583 = vrcp.f32 %v3645_v62 }
0x1244   : > { %v3643_v50 = vpop.xlane.xlu0 %3642 }
0x1245   : > { %6585 = vrcp.f32 %v3643_v50 }
0x1246   : > { %v3657_v46 = vpop.xlane.xlu1 %3656 }
0x1247   : > { %6587 = vrcp.f32 %v3657_v46 }
0x1248   : > { %v3655_v57 = vpop.xlane.xlu0 %3654 }
0x1249   : > { %v6580_v48 = vpop.eup %6579  ;;  %6589 = vrcp.f32 %v3655_v57 }
0x124a   : > { %v8694_v40 = vmul.f32 %v6580_v48, %v8614_v17  ;;  %v3653_v3 = vpop.xlane.xlu1 %3652 }
0x124b   : > { %v6582_v47 = vpop.eup %6581  ;;  %6591 = vrcp.f32 %v3653_v3 }
0x124c   : > { %v8698_v22 = vadd.f32 %v8694_v40, %v8442_v52  ;;  %v8701_v7 = vmul.f32 %v6582_v47, %v8617_v38  ;;  %v3651_v21 = vpop.xlane.xlu0 %3650 }
0x124d   : > { %v6584_v6 = vpop.eup %6583  ;;  %6593 = vrcp.f32 %v3651_v21 }
0x124e   : > { %v8705_v45 = vadd.f32 %v8701_v7, %v8449_v11  ;;  %v3691_v17 = vmul.f32 %v6584_v6, %v8621_v59  ;;  %v3665_v51 = vpop.xlane.xlu1 %3664 }
0x124f   : > { %v6586_v35 = vpop.eup %6585  ;;  %6595 = vrcp.f32 %v3665_v51 }
0x1250   : > { %v8709_v1 = vadd.f32 %v3691_v17, %v8453_v53  ;;  %v3690_v52 = vmul.f32 %v6586_v35, %v8626_v49  ;;  %v3663_v14 = vpop.xlane.xlu0 %3662 }
0x1251   : > { %v6588_v38 = vpop.eup %6587  ;;  %6597 = vrcp.f32 %v3663_v14 }
0x1252   : > { %v8713_v4 = vadd.f32 %v3690_v52, %v8457_v13  ;;  %v3697_v54 = vmul.f32 %v6588_v38, %v8629_v33  ;;  %v3661_v11 = vpop.xlane.xlu1 %3660 }
0x1253   : > { %v6590_v62 = vpop.eup %6589  ;;  %6599 = vrcp.f32 %v3661_v11 }
0x1254   : > { %v8717_v59 = vadd.f32 %v3697_v54, %v8461_v30  ;;  %v3696_v50 = vmul.f32 %v6590_v62, %v8632_v0  ;;  %v3659_v53 = vpop.xlane.xlu0 %3658 }
0x1255   : > { %v6592_v46 = vpop.eup %6591  ;;  %6601 = vrcp.f32 %v3659_v53 }
0x1256   : > { %v8721_v49 = vadd.f32 %v3696_v50, %v8465_v34  ;;  %v3695_v57 = vmul.f32 %v6592_v46, %v8635_v24  ;;  %v3756_v46 = vmul.f32 %v8701_v7, %v7083_v23 }
0x1257   : > { %v6594_v13 = vpop.eup %6593 }
0x1258   : > { %v8725_v48 = vadd.f32 %v3695_v57, %v8469_v55  ;;  %v3694_v33 = vmul.f32 %v6594_v13, %v8640_v15  ;;  %v3671_v3 = vpop.xlane.xlu0 %3670 }
0x1259   : > { %v6596_v47 = vpop.eup %6595  ;;  %6603 = vrcp.f32 %v3671_v3 }
0x125a   : > { %v8729_v30 = vadd.f32 %v3694_v33, %v8473_v20  ;;  %v3701_v0 = vmul.f32 %v6596_v47, %v8643_v18 }
0x125b   : > { %v6598_v21 = vpop.eup %6597 }
0x125c   : > { %v8733_v34 = vadd.f32 %v3701_v0, %v8477_v5  ;;  %v3700_v24 = vmul.f32 %v6598_v21, %v8646_v39  ;;  %v3667_v6 = vpop.xlane.xlu0 %3666  ;;  %v3795_v39 = vpop.permute.xlu1 %3794  ;;  %v3759_v21 = vmul.f32 %v3695_v57, %v7093_v31 }
0x125d   : > { %v6600_v51 = vpop.eup %6599  ;;  %6605 = vrcp.f32 %v3667_v6 }
0x125e   : > { %v8737_v55 = vadd.f32 %v3700_v24, %v8481_v37  ;;  %v3699_v15 = vmul.f32 %v6600_v51, %v8649_v56  ;;  %v9550_v51 = vld [vmem:[#allocation12_spill] sm:$0xff] }
0x125f   : > { %v6602_v35 = vpop.eup %6601 }
0x1260   : > { %v8741_v20 = vadd.f32 %v3699_v15, %v8485_v32  ;;  %v3698_v18 = vmul.f32 %v6602_v35, %v8652_v36  ;;  %v3793_v14 = vpop.permute.xlu0 %3792  ;;  %v3797_v11 = vpop.permute.xlu1 %3796  ;;  %v3760_v35 = vmul.f32 %v3696_v50, %v9550_v51 }
0x1261   : > { %5946 = vmatpush3.bf16.msra.mxu0 %v3793_v14  ;;  %v9551_v14 = vld [vmem:[#allocation13_spill] sm:$0xff] }
0x1262   : > { %v8745_v5 = vadd.f32 %v3698_v18, %v8489_v9  ;;  %5947 = vmatprep.subr.bf16.mxu0 %v9473_v12 }
0x1263   : > { %v6604_v38 = vpop.eup %6603 }
0x1264   : > { %v3704_v37 = vmul.f32 %v6604_v38, %v8655_v2  ;;  %v3799_v62 = vpop.permute.xlu0 %3798  ;;  %v3754_v2 = vmul.f32 %v3690_v52, %v9503_v8  ;;  %v9552_v38 = vld [vmem:[#allocation14_spill] sm:$0xff] }
0x1265   : > { %5948 = vmatpush3.bf16.msra.mxu0 %v3795_v39 }
0x1266   : > { %v8750_v56 = vadd.f32 %v3704_v37, %v8494_v60  ;;  %5949 = vmatprep.subr.bf16.mxu0 %v9473_v12  ;;  %v3755_v60 = vmul.f32 %v3691_v17, %v7185_v19  ;;  %v3761_v17 = vmul.f32 %v3697_v54, %v9551_v14  ;;  %v9555_v54 = vld [vmem:[#allocation16_spill] sm:$0xff] }
0x1267   : > { %v6606_v32 = vpop.eup %6605 }
0x1268   : > { %v3702_v36 = vmul.f32 %v6606_v32, %v8658_v43  ;;  %v3770_v53 = vadd.f32 %v3755_v60, %v3754_v2  ;;  %v3757_v43 = vmul.f32 %v8694_v40, %v7087_v27  ;;  %v3762_v32 = vmul.f32 %v3698_v18, %v9552_v38  ;;  %v9554_v60 = vld [vmem:[#allocation15_spill] sm:$0xff] }
0x1269   : > { %5950 = vmatpush3.bf16.msra.mxu0 %v3797_v11 }
0x126a   : > { %v8755_v9 = vadd.f32 %v3702_v36, %v8499_v63  ;;  %5951 = vmatprep.subr.bf16.mxu0 %v9473_v12  ;;  %v3771_v13 = vadd.f32 %v3770_v53, %v3756_v46  ;;  %v3758_v63 = vmul.f32 %v3694_v33, %v7089_v29  ;;  %v3764_v53 = vmul.f32 %v3700_v24, %v9554_v60 }
0x126c   : > { %v3772_v3 = vadd.f32 %v3771_v13, %v3757_v43  ;;  %v3765_v13 = vmul.f32 %v3701_v0, %v9555_v54  ;;  %v3803_v43 = vpop.permute.xlu0 %3802 }
0x126d   : > { %5952 = vmatpush3.bf16.msra.mxu0 %v3799_v62  ;;  %v9553_v62 = vld [vmem:[#allocation17_spill] sm:$0xff] }
0x126e   : > { %5953 = vmatprep.subr.bf16.mxu0 %v9473_v12  ;;  %v3773_v47 = vadd.f32 %v3772_v3, %v3758_v63  ;;  %v3763_v40 = vmul.f32 %v3699_v15, %v9553_v62  ;;  %v9556_v3 = vld [vmem:[#allocation18_spill] sm:$0xff] }
0x126f   : > { %v3766_v15 = vmul.f32 %v3702_v36, %v9556_v3 }
0x1270   : > { %v3774_v6 = vadd.f32 %v3773_v47, %v3759_v21  ;;  %v9557_v47 = vld [vmem:[#allocation19_spill] sm:$0xff] }
0x1272   : > { %v3775_v52 = vadd.f32 %v3774_v6, %v3760_v35 }
0x1274   : > { %v3776_v39 = vadd.f32 %v3775_v52, %v3761_v17  ;;  %v9559_v17 = vld [vmem:[#allocation23_spill] sm:$0xff] }
0x1276   : > { %v3777_v11 = vadd.f32 %v3776_v39, %v3762_v32  ;;  %v9561_v39 = vld [vmem:[#allocation29_spill] sm:$0xff]  ;;  %v9562_v32 = vld [vmem:[#allocation32_spill] sm:$0xff] }
0x1277   : > { %v3768_v36 = vmul.f32 %v3704_v37, %v9562_v32  ;;  %v5312_v37 = vld [vmem:[%s9378_s5 + $0x14] sm:$0xf] }
0x1278   : > { %v3778_v33 = vadd.f32 %v3777_v11, %v3763_v40  ;;  %v9563_v40 = vld [vmem:[#allocation31_spill] sm:$0xff] }
0x127a   : > { %v3779_v46 = vadd.f32 %v3778_v33, %v3764_v53 }
0x127c   : > { %v3780_v63 = vadd.f32 %v3779_v46, %v3765_v13 }
0x127e   : > { %v3781_v52 = vadd.f32 %v3780_v63, %v3766_v15 }
0x128b   : > { %v3673_v7 = vpop.xlane.xlu1 %3672 }
0x128c   : > { %6607 = vrcp.f32 %v3673_v7  ;;  %v3807_v7 = vpop.permute.xlu0 %3806 }
0x128f   : > { %v3669_v2 = vpop.xlane.xlu1 %3668 }
0x1290   : > { %6609 = vrcp.f32 %v3669_v2 }
0x1293   : > { %v3801_v57 = vpop.permute.xlu1 %3800 }
0x1294   : > { %5954 = vmatpush3.bf16.msra.mxu0 %v3801_v57 }
0x1295   : > { %5955 = vmatprep.subr.bf16.mxu0 %v9473_v12 }
0x1296   : > { %v6608_v50 = vpop.eup %6607 }
0x1297   : > { %v3705_v18 = vmul.f32 %v6608_v50, %v8671_v61  ;;  %v3805_v35 = vpop.permute.xlu1 %3804 }
0x1298   : > { %5956 = vmatpush3.bf16.msra.mxu0 %v3803_v43 }
0x1299   : > { %v8777_v21 = vadd.f32 %v3705_v18, %v9557_v47  ;;  %5957 = vmatprep.subr.bf16.mxu0 %v9473_v12  ;;  %v3769_v2 = vmul.f32 %v3705_v18, %v9563_v40 }
0x129a   : > { %v6610_v24 = vpop.eup %6609 }
0x129b   : > { %9558 = vst [vmem:[#allocation24_spill] sm:$0xff] %v8777_v21  ;;  %v3703_v6 = vmul.f32 %v6610_v24, %v8675_v41  ;;  %v3952_v15 = vpop.permute.xlu1 %3951 }
0x129c   : > { %5958 = vmatpush3.bf16.msra.mxu0 %v3805_v35 }
0x129d   : > { %v8782_v0 = vadd.f32 %v3703_v6, %v9559_v17  ;;  %v3767_v61 = vmul.f32 %v3703_v6, %v9561_v39  ;;  %5959 = vmatprep.subr.bf16.mxu0 %v9473_v12  ;;  %v3992_v17 = vsel %vm700_vm1, %v3952_v15, 0 }
0x129f   : > { %9560 = vst [vmem:[#allocation27_spill] sm:$0xff] %v8782_v0  ;;  %v3782_v11 = vadd.f32 %v3781_v52, %v3767_v61  ;;  %v3956_v18 = vpop.permute.xlu1 %3955  ;;  %v3954_v61 = vpop.permute.xlu0 %3953 }
0x12a0   : > { %5960 = vmatpush3.bf16.msra.mxu0 %v3807_v7 }
0x12a1   : > { %v3783_v33 = vadd.f32 %v3782_v11, %v3768_v36  ;;  %5965 = vmatprep.subr.mxu0 %v9473_v12  ;;  %v3995_v11 = vsel %vm700_vm1, %v3954_v61, 0 }
0x12a3   : > { %v3784_v41 = vadd.f32 %v3783_v33, %v3769_v2  ;;  %v3960_v47 = vpop.permute.xlu1 %3959  ;;  %v3998_v2 = vsel %vm700_vm1, %v3956_v18, 0  ;;  %v3958_v33 = vpop.permute.xlu0 %3957 }
0x12a5   : > { %v3785_v53 = vrot.slane %v3784_v41, 4 }
0x12a7   : > { %v3786_v57 = vadd.f32 %v3785_v53, %v3784_v41  ;;  %v3964_v24 = vpop.permute.xlu1 %3963  ;;  %v4001_v41 = vsel %vm700_vm1, %v3958_v33, 0  ;;  %v4004_v53 = vsel %vm700_vm1, %v3960_v47, 0 }
0x12a9   : > { %v3787_v46 = vrot.slane %v3786_v57, 2 }
0x12ab   : > { %v3788_v50 = vadd.f32 %v3787_v46, %v3786_v57  ;;  %v3936_v35 = vpop.permute.xlu1 %3935  ;;  %v3962_v57 = vpop.permute.xlu0 %3961 }
0x12ac   : > { %v4007_v46 = vsel %vm700_vm1, %v3962_v57, 0 }
0x12ad   : > { %v3789_v13 = vrot.slane %v3788_v50, 1 }
0x12af   : > { %v3790_v43 = vadd.f32 %v3789_v13, %v3788_v50  ;;  %v4010_v50 = vsel %vm700_vm1, %v3964_v24, 0  ;;  %v3966_v13 = vpop.permute.xlu0 %3965 }
0x12b1   : > { %v3791_v63 = vpack.c.bf16 %v3790_v43, %v3790_v43  ;;  %v4013_v43 = vsel %vm700_vm1, %v3966_v13, 0 }
0x12b3   : > { %5962 = vmatmul.mubr.bf16.vlgmr.msra.gmra.mrb[76].mxu0 %v3791_v63  ;;  %v3938_v63 = vpop.permute.xlu0 %3937 }
0x12b4   : > { %5966 = vmatpush3.msk.msra.mxu0 %vm1585_vm3, %v5312_v37  ;;  %5967 = vmatprep.mubr.msk.f32.mxu0 %vm6848_vm2, %v9473_v12  ;;  %v3940_v37 = vpop.permute.xlu1 %3939 }
0x12b5   : > { %6132 = vmatprep.subr.msk.bf16.mxu0 %vm700_vm1, %v3952_v15 }
0x12b7   : > { %v3942_v15 = vpop.permute.xlu0 %3941 }
0x1386   : > { %v3850_v6 = vpop.f32.mrb[76].mxu0 }
0x1387   : > { %v5963_v52 = vpop.f32.mrb[77].mxu0  ;;  %5968 = vmatmul.mubr.msk.f32.vlgmr.msra.gmra.mrb[58].mxu0 %vm700_vm1, %v3850_v6 }
0x1388   : > { %5971 = vmatpush3.bf16.xpose.msra.mxu0 %v3992_v17  ;;  %v3853_v36 = vpop.f32.mrb[78].mxu0  ;;  %5986 = vmatprep.mubr.msk.bf16.mxu0 %vm700_vm1, %v3936_v35  ;;  %v9564_v52 = vld [vmem:[#allocation26_spill] sm:$0xff] }
0x1389   : > { %6133 = vmatprep.subr.msk.bf16.mxu0 %vm700_vm1, %v3954_v61  ;;  %v5964_v7 = vpop.f32.mrb[79].mxu0 }
0x1390   : > { %5973 = vmatpush3.bf16.xpose.msra.mxu0 %v3995_v11  ;;  %v9566_v11 = vld [vmem:[#allocation30_spill] sm:$0xff] }
0x1391   : > { %6134 = vmatprep.subr.msk.bf16.mxu0 %vm700_vm1, %v3956_v18  ;;  %v3944_v18 = vpop.permute.xlu1 %3943 }
0x1398   : > { %5975 = vmatpush3.bf16.xpose.msra.mxu0 %v3998_v2 }
0x1399   : > { %6135 = vmatprep.subr.msk.bf16.mxu0 %vm700_vm1, %v3958_v33 }
0x13a0   : > { %5977 = vmatpush3.bf16.xpose.msra.mxu0 %v4001_v41 }
0x13a1   : > { %6136 = vmatprep.subr.msk.bf16.mxu0 %vm700_vm1, %v3960_v47  ;;  %v3946_v47 = vpop.permute.xlu0 %3945 }
0x13a5   : > { %v3950_v6 = vpop.permute.xlu0 %3949 }
0x13a8   : > { %5979 = vmatpush3.bf16.xpose.msra.mxu0 %v4004_v53 }
0x13a9   : > { %6137 = vmatprep.subr.msk.bf16.mxu0 %vm700_vm1, %v3962_v57 }
0x13b0   : > { %5981 = vmatpush3.bf16.xpose.msra.mxu0 %v4007_v46 }
0x13b1   : > { %6138 = vmatprep.subr.msk.bf16.mxu0 %vm700_vm1, %v3964_v24  ;;  %v3948_v24 = vpop.permute.xlu1 %3947 }
0x13b8   : > { %5983 = vmatpush3.bf16.xpose.msra.mxu0 %v4010_v50 }
0x13b9   : > { %6139 = vmatprep.subr.msk.bf16.mxu0 %vm700_vm1, %v3966_v13 }
0x13c0   : > { %5985 = vmatpush3.bf16.xpose.msra.mxu0 %v4013_v43 }
0x13c1   : > { %6059 = vmatprep.subr.bf16.mxu0 %v9473_v12 }
0x13c7   : > { %5987 = vmatmul.mubr.msk.bf16.vlgmr.msra.gmra.mrb[80].mxu0 %vm700_vm1, %v3938_v63 }
0x13c8   : > { %5990 = vmatprep.mubr.msk.bf16.mxu0 %vm700_vm1, %v3940_v37 }
0x13cf   : > { %5991 = vmatmul.mubr.msk.bf16.gmra.mrb[84].mxu0 %vm700_vm1, %v3942_v15 }
0x13d0   : > { %5994 = vmatprep.mubr.msk.bf16.mxu0 %vm700_vm1, %v3944_v18 }
0x13d7   : > { %5995 = vmatmul.mubr.msk.bf16.gmra.mrb[88].mxu0 %vm700_vm1, %v3946_v47 }
0x13d8   : > { %5998 = vmatprep.mubr.msk.bf16.mxu0 %vm700_vm1, %v3948_v24 }
0x13df   : > { %5999 = vmatmul.mubr.msk.bf16.gmra.mrb[92].mxu0 %vm700_vm1, %v3950_v6 }
0x13e0   : > { %6075 = vmatprep.mubr.msk.bf16.mxu0 %vm6848_vm2, %v9473_v12 }
0x145a   : > { %v3930_v35 = vpop.f32.mrb[58].mxu0 }
0x145b   : > { %v8824_v17 = vadd.f32 %v3930_v35, %v9564_v52  ;;  %v5969_v61 = vpop.f32.mrb[59].mxu0 }
0x145d   : > { %9565 = vst [vmem:[#allocation33_spill] sm:$0xff] %v8824_v17 }
0x149a   : > { %v5988_v36 = vpop.f32.mrb[80].mxu0 }
0x149b   : > { %v4049_v7 = vpop.f32.mrb[81].mxu0  ;;  %v4058_v46 = vadd.f32 %v9566_v11, %v5988_v36 }
0x149c   : > { %v4050_v2 = vadd.f32 %v9566_v11, %v4049_v7  ;;  %v5989_v33 = vpop.f32.mrb[82].mxu0 }
0x149d   : > { %v4052_v41 = vpop.f32.mrb[83].mxu0  ;;  %v4061_v57 = vadd.f32 %v9566_v11, %v5989_v33 }
0x149e   : > { %v4053_v53 = vadd.f32 %v9566_v11, %v4052_v41  ;;  %4112 = vmax.xlane.f32.xlu1 %v4050_v2 }
0x14a0   : > { %4114 = vmax.xlane.f32.xlu0 %v4053_v53 }
0x14a2   : > { %4118 = vmax.xlane.f32.xlu1 %v4061_v57  ;;  %v5992_v50 = vpop.f32.mrb[84].mxu0 }
0x14a3   : > { %v4065_v13 = vpop.f32.mrb[85].mxu0  ;;  %v4074_v47 = vadd.f32 %v9566_v11, %v5992_v50 }
0x14a4   : > { %4116 = vmax.xlane.f32.xlu0 %v4058_v46  ;;  %v5993_v43 = vpop.f32.mrb[86].mxu0  ;;  %v8832_v15 = vadd.f32 %v9566_v11, %v4065_v13 }
0x14a5   : > { %v4077_v63 = vadd.f32 %v9566_v11, %v5993_v43  ;;  %v4068_v37 = vpop.f32.mrb[87].mxu0 }
0x14a6   : > { %v4069_v18 = vadd.f32 %v9566_v11, %v4068_v37 }
0x14a7   : > { %4126 = vmax.xlane.f32.xlu1 %v4077_v63 }
0x14a8   : > { %4120 = vmax.xlane.f32.xlu0 %v8832_v15 }
0x14aa   : > { %v5996_v24 = vpop.f32.mrb[88].mxu0 }
0x14ab   : > { %4122 = vmax.xlane.f32.xlu1 %v4069_v18  ;;  %v4081_v6 = vpop.f32.mrb[89].mxu0  ;;  %v8846_v33 = vadd.f32 %v9566_v11, %v5996_v24 }
0x14ac   : > { %4124 = vmax.xlane.f32.xlu0 %v4074_v47  ;;  %v5997_v35 = vpop.f32.mrb[90].mxu0  ;;  %v8839_v36 = vadd.f32 %v9566_v11, %v4081_v6 }
0x14ad   : > { %v4093_v52 = vadd.f32 %v9566_v11, %v5997_v35  ;;  %v4084_v61 = vpop.f32.mrb[91].mxu0 }
0x14ae   : > { %v8843_v7 = vadd.f32 %v9566_v11, %v4084_v61 }
0x14af   : > { %4134 = vmax.xlane.f32.xlu1 %v4093_v52 }
0x14b0   : > { %4128 = vmax.xlane.f32.xlu0 %v8839_v36 }
0x14b2   : > { %v6000_v41 = vpop.f32.mrb[92].mxu0 }
0x14b3   : > { %4130 = vmax.xlane.f32.xlu1 %v8843_v7  ;;  %v4097_v50 = vpop.f32.mrb[93].mxu0  ;;  %v8862_v35 = vadd.f32 %v9566_v11, %v6000_v41 }
0x14b4   : > { %4132 = vmax.xlane.f32.xlu0 %v8846_v33  ;;  %v6001_v13 = vpop.f32.mrb[94].mxu0  ;;  %v8854_v6 = vadd.f32 %v9566_v11, %v4097_v50 }
0x14b5   : > { %v8851_v43 = vadd.f32 %v9566_v11, %v6001_v13  ;;  %v4100_v37 = vpop.f32.mrb[95].mxu0 }
0x14b6   : > { %v8859_v24 = vadd.f32 %v9566_v11, %v4100_v37 }
0x14b7   : > { %4142 = vmax.xlane.f32.xlu1 %v8851_v43 }
0x14b8   : > { %4136 = vmax.xlane.f32.xlu0 %v8854_v6 }
0x14bb   : > { %4138 = vmax.xlane.f32.xlu1 %v8859_v24 }
0x14bc   : > { %4140 = vmax.xlane.f32.xlu0 %v8862_v35 }
0x152b   : > { %v4113_v61 = vpop.xlane.xlu1 %4112 }
0x152c   : > { %v4144_v39 = vsub.f32 %v4050_v2, %v4113_v61 }
0x152d   : > { %v4115_v13 = vpop.xlane.xlu0 %4114 }
0x152e   : > { %v4145_v40 = vsub.f32 %v4053_v53, %v4115_v13  ;;  %v4160_v41 = vmul.f32 1.442695, %v4144_v39 }
0x152f   : > { %v4119_v17 = vpop.xlane.xlu1 %4118 }
0x1530   : > { %v4147_v50 = vsub.f32 %v4061_v57, %v4119_v17  ;;  %v4162_v3 = vmul.f32 1.442695, %v4145_v40 }
0x1531   : > { %v4117_v32 = vpop.xlane.xlu0 %4116 }
0x1532   : > { %v4166_v0 = vmul.f32 1.442695, %v4147_v50  ;;  %v4146_v21 = vsub.f32 %v4058_v46, %v4117_v32 }
0x1534   : > { %6611 = vpow2.f32 %v4166_v0  ;;  %v4164_v37 = vmul.f32 1.442695, %v4146_v21  ;;  %v4127_v54 = vpop.xlane.xlu1 %4126 }
0x1535   : > { %v4151_v60 = vsub.f32 %v4077_v63, %v4127_v54  ;;  %v4121_v11 = vpop.xlane.xlu0 %4120 }
0x1536   : > { %6613 = vpow2.f32 %v4164_v37  ;;  %v4148_v17 = vsub.f32 %v8832_v15, %v4121_v11 }
0x1537   : > { %6615 = vpow2.f32 %v4162_v3  ;;  %v4174_v62 = vmul.f32 1.442695, %v4151_v60 }
0x1538   : > { %v4123_v38 = vpop.xlane.xlu1 %4122  ;;  %6617 = vpow2.f32 %v4160_v41  ;;  %v4168_v54 = vmul.f32 1.442695, %v4148_v17 }
0x1539   : > { %v4149_v14 = vsub.f32 %v4069_v18, %v4123_v38  ;;  %v4125_v51 = vpop.xlane.xlu0 %4124  ;;  %6619 = vpow2.f32 %v4174_v62 }
0x153a   : > { %v4150_v53 = vsub.f32 %v4074_v47, %v4125_v51 }
0x153b   : > { %v4170_v2 = vmul.f32 1.442695, %v4149_v14 }
0x153c   : > { %v4172_v32 = vmul.f32 1.442695, %v4150_v53  ;;  %v4135_v40 = vpop.xlane.xlu1 %4134 }
0x153d   : > { %v4155_v0 = vsub.f32 %v4093_v52, %v4135_v40  ;;  %v4129_v21 = vpop.xlane.xlu0 %4128 }
0x153e   : > { %v8867_v57 = vpop.eup %6611  ;;  %6621 = vpow2.f32 %v4172_v32  ;;  %v4152_v62 = vsub.f32 %v8839_v36, %v4129_v21 }
0x153f   : > { %4198 = vadd.xlane.f32.xlu1 %v8867_v57  ;;  %6623 = vpow2.f32 %v4170_v2  ;;  %v4182_v38 = vmul.f32 1.442695, %v4155_v0 }
0x1540   : > { %v8870_v60 = vpop.eup %6613  ;;  %v4131_v3 = vpop.xlane.xlu1 %4130  ;;  %6625 = vpow2.f32 %v4168_v54 }
0x1541   : > { %v4153_v39 = vsub.f32 %v8843_v7, %v4131_v3  ;;  %4196 = vadd.xlane.f32.xlu0 %v8870_v60  ;;  %v4133_v51 = vpop.xlane.xlu0 %4132  ;;  %v8874_v14 = vpop.eup %6615  ;;  %6627 = vpow2.f32 %v4182_v38  ;;  %v4176_v7 = vmul.f32 1.442695, %v4152_v62 }
0x1542   : > { %v4154_v46 = vsub.f32 %v8846_v33, %v4133_v51  ;;  %v8879_v63 = vpop.eup %6617 }
0x1543   : > { %4194 = vadd.xlane.f32.xlu1 %v8874_v14  ;;  %v4178_v15 = vmul.f32 1.442695, %v4153_v39  ;;  %v8882_v52 = vpop.eup %6619 }
0x1544   : > { %v4180_v18 = vmul.f32 1.442695, %v4154_v46  ;;  %v4143_v40 = vpop.xlane.xlu1 %4142 }
0x1545   : > { %4192 = vadd.xlane.f32.xlu0 %v8879_v63  ;;  %v4137_v47 = vpop.xlane.xlu0 %4136  ;;  %v4159_v0 = vsub.f32 %v8851_v43, %v4143_v40 }
0x1546   : > { %6629 = vpow2.f32 %v4180_v18  ;;  %v4156_v13 = vsub.f32 %v8854_v6, %v4137_v47 }
0x1547   : > { %4206 = vadd.xlane.f32.xlu1 %v8882_v52  ;;  %6631 = vpow2.f32 %v4178_v15  ;;  %v4190_v54 = vmul.f32 1.442695, %v4159_v0 }
0x1548   : > { %v8885_v61 = vpop.eup %6621  ;;  %6633 = vpow2.f32 %v4176_v7  ;;  %v4184_v17 = vmul.f32 1.442695, %v4156_v13  ;;  %v4139_v21 = vpop.xlane.xlu1 %4138 }
0x1549   : > { %4204 = vadd.xlane.f32.xlu0 %v8885_v61  ;;  %v4141_v36 = vpop.xlane.xlu0 %4140  ;;  %v8888_v33 = vpop.eup %6623  ;;  %v4157_v38 = vsub.f32 %v8859_v24, %v4139_v21 }
0x154a   : > { %v4158_v50 = vsub.f32 %v8862_v35, %v4141_v36  ;;  %v8893_v37 = vpop.eup %6625 }
0x154b   : > { %4202 = vadd.xlane.f32.xlu1 %v8888_v33  ;;  %v8896_v41 = vpop.eup %6627  ;;  %v4186_v3 = vmul.f32 1.442695, %v4157_v38 }
0x154c   : > { %v4188_v11 = vmul.f32 1.442695, %v4158_v50 }
0x154d   : > { %4200 = vadd.xlane.f32.xlu0 %v8893_v37 }
0x154e   : > { %6635 = vpow2.f32 %v4188_v11 }
0x154f   : > { %4214 = vadd.xlane.f32.xlu1 %v8896_v41  ;;  %6637 = vpow2.f32 %v4184_v17 }
0x1550   : > { %v8899_v53 = vpop.eup %6629  ;;  %6639 = vpow2.f32 %v4190_v54 }
0x1551   : > { %4212 = vadd.xlane.f32.xlu0 %v8899_v53  ;;  %v8902_v6 = vpop.eup %6631  ;;  %6641 = vpow2.f32 %v4186_v3 }
0x1552   : > { %v8905_v35 = vpop.eup %6633 }
0x1553   : > { %4210 = vadd.xlane.f32.xlu1 %v8902_v6 }
0x1555   : > { %4208 = vadd.xlane.f32.xlu0 %v8905_v35 }
0x1558   : > { %v8908_v2 = vpop.eup %6635 }
0x1559   : > { %4220 = vadd.xlane.f32.xlu0 %v8908_v2  ;;  %v8911_v32 = vpop.eup %6637 }
0x155a   : > { %v8924_v39 = vpop.eup %6639 }
0x155b   : > { %v8928_v43 = vpop.eup %6641 }
0x155d   : > { %4216 = vadd.xlane.f32.xlu0 %v8911_v32 }
0x1564   : > { %4344 = vrot.lane.b32.xlu1 %v7002_v26, %s6864_s29 }
0x1568   : > { %4346 = vrot.lane.b32.xlu1 %v7020_v44, %s6864_s29 }
0x1573   : > { %4342 = vrot.lane.b32.xlu0 %v7004_v28, %s6864_s29 }
0x1577   : > { %4348 = vrot.lane.b32.xlu0 %v7018_v42, %s6864_s29 }
0x157b   : > { %4352 = vrot.lane.b32.xlu0 %v7032_v58, %s6864_s29 }
0x157f   : > { %4356 = vrot.lane.b32.xlu0 %v9483_v10, %s6864_s29 }
0x1583   : > { %4503 = vrot.lane.b32.xlu0 %v7002_v26, %s6865_s16 }
0x1587   : > { %4507 = vrot.lane.b32.xlu0 %v7018_v42, %s6865_s16 }
0x158b   : > { %4511 = vrot.lane.b32.xlu0 %v7032_v58, %s6865_s16 }
0x158c   : > { %4222 = vadd.xlane.f32.xlu1 %v8924_v39 }
0x158f   : > { %4515 = vrot.lane.b32.xlu0 %v9483_v10, %s6865_s16 }
0x1590   : > { %4218 = vadd.xlane.f32.xlu1 %v8928_v43 }
0x1593   : > { %4487 = vrot.lane.b32.xlu0 %v7002_v26, %s6866_s17 }
0x1597   : > { %4491 = vrot.lane.b32.xlu0 %v7018_v42, %s6866_s17 }
0x159b   : > { %4495 = vrot.lane.b32.xlu0 %v7032_v58, %s6866_s17 }
0x159f   : > { %4499 = vrot.lane.b32.xlu0 %v9483_v10, %s6866_s17 }
0x15a1   : > { %4350 = vrot.lane.b32.xlu1 %v9485_v16, %s6864_s29 }
0x15a5   : > { %4354 = vrot.lane.b32.xlu1 %v9486_v25, %s6864_s29  ;;  %s9287_s29 = sand.u32 1, %s6833_s10  }
0x15a6   : > { %s339_s21 = scalar_lea.vmem [#allocation2], %s9287_s29 }
0x15a7   : > { %s5089_s26 = sshll.u32 %s339_s21, 4  ;;  %s5090_s26 = int_to_ptr.vmem [resolvable:$true] %s5089_s26 }
0x15a8   : > { %s6747_s25 = scalar_lea.vmem %s5090_s26, 16 }
0x15a9   : > { %4501 = vrot.lane.b32.xlu1 %v7004_v28, %s6865_s16  ;;  %p6748_p11 = scmp.ne.s32.totalorder %s5090_s26, %s6747_s25 }
0x15ab   : > { %p6749_p12 = pnand %p6748_p11, %p6958_p5 }
0x15ad   : > { %4505 = vrot.lane.b32.xlu1 %v7020_v44, %s6865_s16  ;;  %p6750_p13 = pneg %p6749_p12 }
0x15b1   : > { %4509 = vrot.lane.b32.xlu1 %v9485_v16, %s6865_s16 }
0x15b5   : > { %4513 = vrot.lane.b32.xlu1 %v9486_v25, %s6865_s16  ;;  %s6751_s16 = sshll.u32 %s6868_s28, 4  ;;  %s6752_s16 = int_to_ptr.vmem [resolvable:$false] %s6751_s16 }
0x15b6   : > { %p6754_p0 = scmp.lt.s32.totalorder %s5090_s26, %s6752_s16 }
0x15b9   : > { %4485 = vrot.lane.b32.xlu1 %v7004_v28, %s6866_s17 }
0x15bd   : > { %4489 = vrot.lane.b32.xlu1 %v7020_v44, %s6866_s17 }
0x15c1   : > { %4493 = vrot.lane.b32.xlu1 %v9485_v16, %s6866_s17 }
0x15c5   : > { %4497 = vrot.lane.b32.xlu1 %v9486_v25, %s6866_s17  ;;  %s6753_s17 = scalar_lea.vmem %s6752_s16, 32 }
0x15c6   : > { %p6755_p1 = scmp.lt.s32.totalorder %s6753_s17, %s6747_s25 }
0x15c8   : > { %p6756_p2 = por %p6755_p1, %p6754_p0 }
0x15ca   : > { %p6757_p3 = pnand %p6756_p2, %p6750_p13 }
0x15cc   : > { %v4199_v24 = vpop.xlane.xlu1 %4198 }
0x15cd   : > { %6643 = vrcp.f32 %v4199_v24 }
0x15ce   : > { %v4197_v51 = vpop.xlane.xlu0 %4196 }
0x15cf   : > { %6645 = vrcp.f32 %v4197_v51 }
0x15d0   : > { %v4195_v62 = vpop.xlane.xlu1 %4194 }
0x15d1   : > { %6647 = vrcp.f32 %v4195_v62 }
0x15d2   : > { %v4193_v46 = vpop.xlane.xlu0 %4192 }
0x15d3   : > { %6649 = vrcp.f32 %v4193_v46 }
0x15d4   : > { %v4207_v15 = vpop.xlane.xlu1 %4206 }
0x15d5   : > { %6651 = vrcp.f32 %v4207_v15 }
0x15d6   : > { %v4205_v18 = vpop.xlane.xlu0 %4204 }
0x15d7   : > { %v6644_v47 = vpop.eup %6643  ;;  %6653 = vrcp.f32 %v4205_v18 }
0x15d8   : > { %v8947_v7 = vmul.f32 %v6644_v47, %v8867_v57  ;;  %v4203_v36 = vpop.xlane.xlu1 %4202 }
0x15d9   : > { %v6646_v13 = vpop.eup %6645  ;;  %6655 = vrcp.f32 %v4203_v36 }
0x15da   : > { %v8951_v50 = vadd.f32 %v8947_v7, %v8698_v22  ;;  %v8954_v11 = vmul.f32 %v6646_v13, %v8870_v60  ;;  %v4201_v17 = vpop.xlane.xlu0 %4200 }
0x15db   : > { %v6648_v40 = vpop.eup %6647  ;;  %6657 = vrcp.f32 %v4201_v17 }
0x15dc   : > { %v8958_v0 = vadd.f32 %v8954_v11, %v8705_v45  ;;  %v4241_v57 = vmul.f32 %v6648_v40, %v8874_v14  ;;  %v4215_v21 = vpop.xlane.xlu1 %4214 }
0x15dd   : > { %v6650_v54 = vpop.eup %6649  ;;  %6659 = vrcp.f32 %v4215_v21 }
0x15de   : > { %v8962_v38 = vadd.f32 %v4241_v57, %v8709_v1  ;;  %v4240_v22 = vmul.f32 %v6650_v54, %v8879_v63  ;;  %v4213_v3 = vpop.xlane.xlu0 %4212 }
0x15df   : > { %v6652_v60 = vpop.eup %6651  ;;  %6661 = vrcp.f32 %v4213_v3 }
0x15e0   : > { %v8966_v24 = vadd.f32 %v4240_v22, %v8713_v4  ;;  %v4247_v51 = vmul.f32 %v6652_v60, %v8882_v52  ;;  %v4211_v45 = vpop.xlane.xlu1 %4210 }
0x15e1   : > { %v6654_v62 = vpop.eup %6653  ;;  %6663 = vrcp.f32 %v4211_v45 }
0x15e2   : > { %v8970_v14 = vadd.f32 %v4247_v51, %v8717_v59  ;;  %v4246_v46 = vmul.f32 %v6654_v62, %v8885_v61  ;;  %v4209_v1 = vpop.xlane.xlu0 %4208 }
0x15e3   : > { %v6656_v15 = vpop.eup %6655  ;;  %6665 = vrcp.f32 %v4209_v1 }
0x15e4   : > { %v8974_v63 = vadd.f32 %v4246_v46, %v8721_v49  ;;  %v4245_v18 = vmul.f32 %v6656_v15, %v8888_v33  ;;  %v4306_v15 = vmul.f32 %v8954_v11, %v7083_v23 }
0x15e5   : > { %v6658_v4 = vpop.eup %6657 }
0x15e6   : > { %v8978_v47 = vadd.f32 %v4245_v18, %v8725_v48  ;;  %v4244_v52 = vmul.f32 %v6658_v4, %v8893_v37  ;;  %v4221_v36 = vpop.xlane.xlu0 %4220 }
0x15e7   : > { %v6660_v13 = vpop.eup %6659  ;;  %6667 = vrcp.f32 %v4221_v36 }
0x15e8   : > { %v8982_v59 = vadd.f32 %v4244_v52, %v8729_v30  ;;  %v4251_v61 = vmul.f32 %v6660_v13, %v8896_v41 }
0x15e9   : > { %v6662_v17 = vpop.eup %6661 }
0x15ea   : > { %v8986_v49 = vadd.f32 %v4251_v61, %v8733_v34  ;;  %v4250_v33 = vmul.f32 %v6662_v17, %v8899_v53  ;;  %v4217_v40 = vpop.xlane.xlu0 %4216  ;;  %v4345_v53 = vpop.permute.xlu1 %4344  ;;  %v4309_v17 = vmul.f32 %v4245_v18, %v7093_v31 }
0x15eb   : > { %v6664_v21 = vpop.eup %6663  ;;  %6669 = vrcp.f32 %v4217_v40 }
0x15ec   : > { %v8990_v48 = vadd.f32 %v4250_v33, %v8737_v55  ;;  %v4249_v37 = vmul.f32 %v6664_v21, %v8902_v6  ;;  %v9567_v21 = vld [vmem:[#allocation12_spill] sm:$0xff] }
0x15ed   : > { %v6666_v54 = vpop.eup %6665 }
0x15ee   : > { %v8994_v30 = vadd.f32 %v4249_v37, %v8741_v20  ;;  %v4248_v41 = vmul.f32 %v6666_v54, %v8905_v35  ;;  %v4343_v3 = vpop.permute.xlu0 %4342  ;;  %v4347_v45 = vpop.permute.xlu1 %4346  ;;  %v4310_v54 = vmul.f32 %v4246_v46, %v9567_v21 }
0x15ef   : > { %6003 = vmatpush3.bf16.msra.mxu1 %v4343_v3  ;;  %v9568_v3 = vld [vmem:[#allocation13_spill] sm:$0xff] }
0x15f0   : > { %v8998_v34 = vadd.f32 %v4248_v41, %v8745_v5  ;;  %6004 = vmatprep.subr.bf16.mxu1 %v9473_v12 }
0x15f1   : > { %v6668_v60 = vpop.eup %6667 }
0x15f2   : > { %v4254_v55 = vmul.f32 %v6668_v60, %v8908_v2  ;;  %v4349_v62 = vpop.permute.xlu0 %4348  ;;  %v4304_v2 = vmul.f32 %v4240_v22, %v9503_v8  ;;  %v9569_v60 = vld [vmem:[#allocation14_spill] sm:$0xff] }
0x15f3   : > { %6005 = vmatpush3.bf16.msra.mxu1 %v4345_v53 }
0x15f4   : > { %v9003_v6 = vadd.f32 %v4254_v55, %v8750_v56  ;;  %6006 = vmatprep.subr.bf16.mxu1 %v9473_v12  ;;  %v4305_v56 = vmul.f32 %v4241_v57, %v7185_v19  ;;  %v4311_v57 = vmul.f32 %v4247_v51, %v9568_v3  ;;  %v9572_v51 = vld [vmem:[#allocation16_spill] sm:$0xff] }
0x15f5   : > { %v6670_v20 = vpop.eup %6669 }
0x15f6   : > { %v4252_v35 = vmul.f32 %v6670_v20, %v8911_v32  ;;  %v4320_v1 = vadd.f32 %v4305_v56, %v4304_v2  ;;  %v4307_v32 = vmul.f32 %v8947_v7, %v7087_v27  ;;  %v4312_v20 = vmul.f32 %v4248_v41, %v9569_v60  ;;  %v9571_v56 = vld [vmem:[#allocation15_spill] sm:$0xff] }
0x15f7   : > { %6007 = vmatpush3.bf16.msra.mxu1 %v4347_v45 }
0x15f8   : > { %v9008_v5 = vadd.f32 %v4252_v35, %v8755_v9  ;;  %6008 = vmatprep.subr.bf16.mxu1 %v9473_v12  ;;  %v4321_v4 = vadd.f32 %v4320_v1, %v4306_v15  ;;  %v4308_v9 = vmul.f32 %v4244_v52, %v7089_v29  ;;  %v4314_v1 = vmul.f32 %v4250_v33, %v9571_v56 }
0x15fa   : > { %v4322_v36 = vadd.f32 %v4321_v4, %v4307_v32  ;;  %v4315_v4 = vmul.f32 %v4251_v61, %v9572_v51  ;;  %v4353_v32 = vpop.permute.xlu0 %4352 }
0x15fb   : > { %6009 = vmatpush3.bf16.msra.mxu1 %v4349_v62  ;;  %v9570_v62 = vld [vmem:[#allocation17_spill] sm:$0xff] }
0x15fc   : > { %6010 = vmatprep.subr.bf16.mxu1 %v9473_v12  ;;  %v4323_v13 = vadd.f32 %v4322_v36, %v4308_v9  ;;  %v4313_v7 = vmul.f32 %v4249_v37, %v9570_v62  ;;  %v9573_v36 = vld [vmem:[#allocation18_spill] sm:$0xff] }
0x15fd   : > { %v4316_v37 = vmul.f32 %v4252_v35, %v9573_v36 }
0x15fe   : > { %v4324_v40 = vadd.f32 %v4323_v13, %v4309_v17  ;;  %v9574_v13 = vld [vmem:[#allocation24_spill] sm:$0xff] }
0x1600   : > { %v4325_v22 = vadd.f32 %v4324_v40, %v4310_v54 }
0x1602   : > { %v4326_v53 = vadd.f32 %v4325_v22, %v4311_v57  ;;  %v9576_v57 = vld [vmem:[#allocation27_spill] sm:$0xff] }
0x1604   : > { %v4327_v45 = vadd.f32 %v4326_v53, %v4312_v20  ;;  %v9578_v53 = vld [vmem:[#allocation29_spill] sm:$0xff]  ;;  %v9579_v20 = vld [vmem:[#allocation32_spill] sm:$0xff] }
0x1605   : > { %v4318_v35 = vmul.f32 %v4254_v55, %v9579_v20  ;;  %v5323_v55 = vld [vmem:[%s9378_s5 + $0x18] sm:$0xf] }
0x1606   : > { %v4328_v52 = vadd.f32 %v4327_v45, %v4313_v7  ;;  %v9580_v7 = vld [vmem:[#allocation31_spill] sm:$0xff] }
0x1608   : > { %v4329_v15 = vadd.f32 %v4328_v52, %v4314_v1 }
0x160a   : > { %v4330_v9 = vadd.f32 %v4329_v15, %v4315_v4 }
0x160c   : > { %v4331_v22 = vadd.f32 %v4330_v9, %v4316_v37 }
0x1619   : > { %v4223_v11 = vpop.xlane.xlu1 %4222 }
0x161a   : > { %6671 = vrcp.f32 %v4223_v11  ;;  %v4357_v11 = vpop.permute.xlu0 %4356 }
0x161d   : > { %v4219_v2 = vpop.xlane.xlu1 %4218 }
0x161e   : > { %6673 = vrcp.f32 %v4219_v2 }
0x1621   : > { %v4351_v18 = vpop.permute.xlu1 %4350 }
0x1622   : > { %6011 = vmatpush3.bf16.msra.mxu1 %v4351_v18 }
0x1623   : > { %6012 = vmatprep.subr.bf16.mxu1 %v9473_v12 }
0x1624   : > { %v6672_v46 = vpop.eup %6671 }
0x1625   : > { %v4255_v41 = vmul.f32 %v6672_v46, %v8924_v39  ;;  %v4355_v54 = vpop.permute.xlu1 %4354 }
0x1626   : > { %6013 = vmatpush3.bf16.msra.mxu1 %v4353_v32 }
0x1627   : > { %v9030_v17 = vadd.f32 %v4255_v41, %v9574_v13  ;;  %6014 = vmatprep.subr.bf16.mxu1 %v9473_v12  ;;  %v4319_v2 = vmul.f32 %v4255_v41, %v9580_v7 }
0x1628   : > { %v6674_v33 = vpop.eup %6673 }
0x1629   : > { %9575 = vst [vmem:[#allocation35_spill] sm:$0xff] %v9030_v17  ;;  %v4253_v40 = vmul.f32 %v6674_v33, %v8928_v43  ;;  %v4502_v37 = vpop.permute.xlu1 %4501 }
0x162a   : > { %6015 = vmatpush3.bf16.msra.mxu1 %v4355_v54  ;;  %v4542_v54 = vsel %vm700_vm1, %v4502_v37, 0 }
0x162b   : > { %v9035_v61 = vadd.f32 %v4253_v40, %v9576_v57  ;;  %v4317_v39 = vmul.f32 %v4253_v40, %v9578_v53  ;;  %6016 = vmatprep.subr.bf16.mxu1 %v9473_v12 }
0x162d   : > { %9577 = vst [vmem:[#allocation28_spill] sm:$0xff] %v9035_v61  ;;  %v4332_v45 = vadd.f32 %v4331_v22, %v4317_v39  ;;  %v4506_v41 = vpop.permute.xlu1 %4505  ;;  %v4504_v39 = vpop.permute.xlu0 %4503 }
0x162e   : > { %6017 = vmatpush3.bf16.msra.mxu1 %v4357_v11 }
0x162f   : > { %v4333_v52 = vadd.f32 %v4332_v45, %v4318_v35  ;;  %6022 = vmatprep.subr.mxu1 %v9473_v12  ;;  %v4545_v45 = vsel %vm700_vm1, %v4504_v39, 0 }
0x1631   : > { %v4334_v43 = vadd.f32 %v4333_v52, %v4319_v2  ;;  %v4510_v13 = vpop.permute.xlu1 %4509  ;;  %v4548_v2 = vsel %vm700_vm1, %v4506_v41, 0  ;;  %v4508_v52 = vpop.permute.xlu0 %4507 }
0x1633   : > { %v4335_v1 = vrot.slane %v4334_v43, 4 }
0x1635   : > { %v4336_v18 = vadd.f32 %v4335_v1, %v4334_v43  ;;  %v4514_v33 = vpop.permute.xlu1 %4513  ;;  %v4551_v43 = vsel %vm700_vm1, %v4508_v52, 0  ;;  %v4554_v1 = vsel %vm700_vm1, %v4510_v13, 0 }
0x1637   : > { %v4337_v15 = vrot.slane %v4336_v18, 2 }
0x1639   : > { %v4338_v46 = vadd.f32 %v4337_v15, %v4336_v18  ;;  %v4486_v22 = vpop.permute.xlu1 %4485  ;;  %v4512_v18 = vpop.permute.xlu0 %4511 }
0x163a   : > { %v4557_v15 = vsel %vm700_vm1, %v4512_v18, 0 }
0x163b   : > { %v4339_v4 = vrot.slane %v4338_v46, 1 }
0x163d   : > { %v4340_v32 = vadd.f32 %v4339_v4, %v4338_v46  ;;  %v4560_v46 = vsel %vm700_vm1, %v4514_v33, 0  ;;  %v4516_v4 = vpop.permute.xlu0 %4515 }
0x163f   : > { %v4341_v9 = vpack.c.bf16 %v4340_v32, %v4340_v32  ;;  %v4563_v32 = vsel %vm700_vm1, %v4516_v4, 0 }
0x1641   : > { %6019 = vmatmul.mubr.bf16.vlgmr.msra.gmra.mrb[68].mxu1 %v4341_v9  ;;  %v4488_v9 = vpop.permute.xlu0 %4487 }
0x1642   : > { %6023 = vmatpush3.msk.msra.mxu1 %vm1585_vm3, %v5323_v55  ;;  %6024 = vmatprep.mubr.msk.f32.mxu1 %vm6848_vm2, %v9473_v12  ;;  %v4490_v55 = vpop.permute.xlu1 %4489 }
0x1643   : > { %6140 = vmatprep.subr.msk.bf16.mxu1 %vm700_vm1, %v4502_v37 }
0x1645   : > { %v4492_v37 = vpop.permute.xlu0 %4491 }
0x1714   : > { %v4400_v40 = vpop.f32.mrb[68].mxu1 }
0x1715   : > { %v6020_v57 = vpop.f32.mrb[69].mxu1  ;;  %6025 = vmatmul.mubr.msk.f32.vlgmr.msra.gmra.mrb[72].mxu1 %vm700_vm1, %v4400_v40 }
0x1716   : > { %6028 = vmatpush3.bf16.xpose.msra.mxu1 %v4542_v54  ;;  %v4403_v35 = vpop.f32.mrb[70].mxu1  ;;  %6043 = vmatprep.mubr.msk.bf16.mxu1 %vm700_vm1, %v4486_v22  ;;  %v9581_v22 = vld [vmem:[#allocation33_spill] sm:$0xff] }
0x1717   : > { %6141 = vmatprep.subr.msk.bf16.mxu1 %vm700_vm1, %v4504_v39  ;;  %v6021_v11 = vpop.f32.mrb[71].mxu1 }
0x171e   : > { %6030 = vmatpush3.bf16.xpose.msra.mxu1 %v4545_v45  ;;  %v6746_v45 = vld [vmem:[%s7126_s14] ss:$0 sm:$0xff]  ;;  %s6867_s14 = smov 36  }
0x171f   : > { %6142 = vmatprep.subr.msk.bf16.mxu1 %vm700_vm1, %v4506_v41  ;;  %v4494_v41 = vpop.permute.xlu1 %4493 }
0x1726   : > { %6032 = vmatpush3.bf16.xpose.msra.mxu1 %v4548_v2 }
0x1727   : > { %6143 = vmatprep.subr.msk.bf16.mxu1 %vm700_vm1, %v4508_v52 }
0x172e   : > { %6034 = vmatpush3.bf16.xpose.msra.mxu1 %v4551_v43 }
0x172f   : > { %6144 = vmatprep.subr.msk.bf16.mxu1 %vm700_vm1, %v4510_v13  ;;  %v4496_v13 = vpop.permute.xlu0 %4495 }
0x1733   : > { %v4500_v40 = vpop.permute.xlu0 %4499 }
0x1736   : > { %6036 = vmatpush3.bf16.xpose.msra.mxu1 %v4554_v1 }
0x1737   : > { %6145 = vmatprep.subr.msk.bf16.mxu1 %vm700_vm1, %v4512_v18 }
0x173e   : > { %6038 = vmatpush3.bf16.xpose.msra.mxu1 %v4557_v15 }
0x173f   : > { %6146 = vmatprep.subr.msk.bf16.mxu1 %vm700_vm1, %v4514_v33  ;;  %v4498_v33 = vpop.permute.xlu1 %4497 }
0x1746   : > { %6040 = vmatpush3.bf16.xpose.msra.mxu1 %v4560_v46 }
0x1747   : > { %6147 = vmatprep.subr.msk.bf16.mxu1 %vm700_vm1, %v4516_v4 }
0x174e   : > { %6042 = vmatpush3.bf16.xpose.msra.mxu1 %v4563_v32 }
0x1755   : > { %6044 = vmatmul.mubr.msk.bf16.vlgmr.msra.gmra.mrb[76].mxu1 %vm700_vm1, %v4488_v9 }
0x1756   : > { %6047 = vmatprep.mubr.msk.bf16.mxu1 %vm700_vm1, %v4490_v55 }
0x175d   : > { %6048 = vmatmul.mubr.msk.bf16.gmra.mrb[80].mxu1 %vm700_vm1, %v4492_v37 }
0x175e   : > { %6051 = vmatprep.mubr.msk.bf16.mxu1 %vm700_vm1, %v4494_v41 }
0x1765   : > { %6052 = vmatmul.mubr.msk.bf16.gmra.mrb[84].mxu1 %vm700_vm1, %v4496_v13 }
0x1766   : > { %6055 = vmatprep.mubr.msk.bf16.mxu1 %vm700_vm1, %v4498_v33 }
0x176d   : > { %6056 = vmatmul.mubr.msk.bf16.gmra.mrb[88].mxu1 %vm700_vm1, %v4500_v40 }
0x17e8   : > { %v4480_v54 = vpop.f32.mrb[72].mxu1 }
0x17e9   : > { %v9074_v57 = vadd.f32 %v4480_v54, %v9581_v22  ;;  %v6026_v39 = vpop.f32.mrb[73].mxu1 }
0x17eb   : > { %9582 = vst [vmem:[#allocation34_spill] sm:$0xff] %v9074_v57 }
0x1828   : > { %v6045_v35 = vpop.f32.mrb[76].mxu1 }
0x1829   : > { %v4599_v11 = vpop.f32.mrb[77].mxu1  ;;  %v4608_v15 = vadd.f32 %v6746_v45, %v6045_v35 }
0x182a   : > { %v4600_v2 = vadd.f32 %v6746_v45, %v4599_v11  ;;  %v6046_v52 = vpop.f32.mrb[78].mxu1 }
0x182b   : > { %v4602_v43 = vpop.f32.mrb[79].mxu1  ;;  %v4611_v18 = vadd.f32 %v6746_v45, %v6046_v52 }
0x182c   : > { %v4603_v1 = vadd.f32 %v6746_v45, %v4602_v43  ;;  %4662 = vmax.xlane.f32.xlu1 %v4600_v2 }
0x182e   : > { %4664 = vmax.xlane.f32.xlu0 %v4603_v1 }
0x1830   : > { %4668 = vmax.xlane.f32.xlu1 %v4611_v18  ;;  %v6049_v46 = vpop.f32.mrb[80].mxu1 }
0x1831   : > { %v4615_v4 = vpop.f32.mrb[81].mxu1  ;;  %v4624_v13 = vadd.f32 %v6746_v45, %v6049_v46 }
0x1832   : > { %4666 = vmax.xlane.f32.xlu0 %v4608_v15  ;;  %v6050_v32 = vpop.f32.mrb[82].mxu1  ;;  %v9077_v37 = vadd.f32 %v6746_v45, %v4615_v4 }
0x1833   : > { %v4627_v9 = vadd.f32 %v6746_v45, %v6050_v32  ;;  %v4618_v55 = vpop.f32.mrb[83].mxu1 }
0x1834   : > { %v4619_v41 = vadd.f32 %v6746_v45, %v4618_v55 }
0x1835   : > { %4676 = vmax.xlane.f32.xlu1 %v4627_v9 }
0x1836   : > { %4670 = vmax.xlane.f32.xlu0 %v9077_v37 }
0x1838   : > { %v6053_v33 = vpop.f32.mrb[84].mxu1 }
0x1839   : > { %4672 = vmax.xlane.f32.xlu1 %v4619_v41  ;;  %v4631_v40 = vpop.f32.mrb[85].mxu1  ;;  %v9085_v52 = vadd.f32 %v6746_v45, %v6053_v33 }
0x183a   : > { %4674 = vmax.xlane.f32.xlu0 %v4624_v13  ;;  %v6054_v54 = vpop.f32.mrb[86].mxu1  ;;  %v9080_v35 = vadd.f32 %v6746_v45, %v4631_v40 }
0x183b   : > { %v4643_v22 = vadd.f32 %v6746_v45, %v6054_v54  ;;  %v4634_v39 = vpop.f32.mrb[87].mxu1 }
0x183c   : > { %v9083_v11 = vadd.f32 %v6746_v45, %v4634_v39 }
0x183d   : > { %4684 = vmax.xlane.f32.xlu1 %v4643_v22 }
0x183e   : > { %4678 = vmax.xlane.f32.xlu0 %v9080_v35 }
0x1840   : > { %v6057_v43 = vpop.f32.mrb[88].mxu1 }
0x1841   : > { %4680 = vmax.xlane.f32.xlu1 %v9083_v11  ;;  %v4647_v46 = vpop.f32.mrb[89].mxu1  ;;  %v9097_v33 = vadd.f32 %v6746_v45, %v6057_v43 }
0x1842   : > { %4682 = vmax.xlane.f32.xlu0 %v9085_v52  ;;  %v6058_v4 = vpop.f32.mrb[90].mxu1  ;;  %v9091_v54 = vadd.f32 %v6746_v45, %v4647_v46 }
0x1843   : > { %v9089_v32 = vadd.f32 %v6746_v45, %v6058_v4  ;;  %v4650_v55 = vpop.f32.mrb[91].mxu1 }
0x1844   : > { %v9095_v40 = vadd.f32 %v6746_v45, %v4650_v55 }
0x1845   : > { %4692 = vmax.xlane.f32.xlu1 %v9089_v32 }
0x1846   : > { %4686 = vmax.xlane.f32.xlu0 %v9091_v54 }
0x1849   : > { %4688 = vmax.xlane.f32.xlu1 %v9095_v40 }
0x184a   : > { %4690 = vmax.xlane.f32.xlu0 %v9097_v33 }
0x18b9   : > { %v4663_v39 = vpop.xlane.xlu1 %4662 }
0x18ba   : > { %v4694_v46 = vsub.f32 %v4600_v2, %v4663_v39 }
0x18bb   : > { %v4665_v57 = vpop.xlane.xlu0 %4664 }
0x18bc   : > { %v4695_v4 = vsub.f32 %v4603_v1, %v4665_v57  ;;  %v4710_v43 = vmul.f32 1.442695, %v4694_v46 }
0x18bd   : > { %v4669_v7 = vpop.xlane.xlu1 %4668 }
0x18be   : > { %v4697_v20 = vsub.f32 %v4611_v18, %v4669_v7  ;;  %v4712_v36 = vmul.f32 1.442695, %v4695_v4 }
0x18bf   : > { %v4667_v53 = vpop.xlane.xlu0 %4666 }
0x18c0   : > { %v4716_v61 = vmul.f32 1.442695, %v4697_v20  ;;  %v4696_v17 = vsub.f32 %v4608_v15, %v4667_v53 }
0x18c2   : > { %6675 = vpow2.f32 %v4716_v61  ;;  %v4714_v51 = vmul.f32 1.442695, %v4696_v17  ;;  %v4677_v55 = vpop.xlane.xlu1 %4676 }
0x18c3   : > { %v4701_v56 = vsub.f32 %v4627_v9, %v4677_v55  ;;  %v4671_v45 = vpop.xlane.xlu0 %4670 }
0x18c4   : > { %6677 = vpow2.f32 %v4714_v51  ;;  %v4698_v7 = vsub.f32 %v9077_v37, %v4671_v45 }
0x18c5   : > { %6679 = vpow2.f32 %v4712_v36  ;;  %v4724_v62 = vmul.f32 1.442695, %v4701_v56 }
0x18c6   : > { %v4673_v60 = vpop.xlane.xlu1 %4672  ;;  %6681 = vpow2.f32 %v4710_v43  ;;  %v4718_v18 = vmul.f32 1.442695, %v4698_v7 }
0x18c7   : > { %v4699_v3 = vsub.f32 %v4619_v41, %v4673_v60  ;;  %v4675_v21 = vpop.xlane.xlu0 %4674  ;;  %6683 = vpow2.f32 %v4724_v62 }
0x18c8   : > { %v4700_v57 = vsub.f32 %v4624_v13, %v4675_v21 }
0x18c9   : > { %v4720_v20 = vmul.f32 1.442695, %v4699_v3 }
0x18ca   : > { %v4722_v53 = vmul.f32 1.442695, %v4700_v57  ;;  %v4685_v2 = vpop.xlane.xlu1 %4684 }
0x18cb   : > { %v4705_v61 = vsub.f32 %v4643_v22, %v4685_v2  ;;  %v4679_v17 = vpop.xlane.xlu0 %4678 }
0x18cc   : > { %v9102_v1 = vpop.eup %6675  ;;  %6685 = vpow2.f32 %v4722_v53  ;;  %v4702_v62 = vsub.f32 %v9080_v35, %v4679_v17 }
0x18cd   : > { %4748 = vadd.xlane.f32.xlu1 %v9102_v1  ;;  %6687 = vpow2.f32 %v4720_v20  ;;  %v4732_v60 = vmul.f32 1.442695, %v4705_v61 }
0x18ce   : > { %v9105_v56 = vpop.eup %6677  ;;  %v4681_v51 = vpop.xlane.xlu1 %4680  ;;  %6689 = vpow2.f32 %v4718_v18 }
0x18cf   : > { %v4703_v36 = vsub.f32 %v9083_v11, %v4681_v51  ;;  %4746 = vadd.xlane.f32.xlu0 %v9105_v56  ;;  %v4683_v21 = vpop.xlane.xlu0 %4682  ;;  %v9109_v3 = vpop.eup %6679  ;;  %6691 = vpow2.f32 %v4732_v60  ;;  %v4726_v11 = vmul.f32 1.442695, %v4702_v62 }
0x18d0   : > { %v4704_v15 = vsub.f32 %v9085_v52, %v4683_v21  ;;  %v9114_v9 = vpop.eup %6681 }
0x18d1   : > { %4744 = vadd.xlane.f32.xlu1 %v9109_v3  ;;  %v4728_v37 = vmul.f32 1.442695, %v4703_v36  ;;  %v9117_v22 = vpop.eup %6683 }
0x18d2   : > { %v4730_v41 = vmul.f32 1.442695, %v4704_v15  ;;  %v4693_v2 = vpop.xlane.xlu1 %4692 }
0x18d3   : > { %4742 = vadd.xlane.f32.xlu0 %v9114_v9  ;;  %v4687_v13 = vpop.xlane.xlu0 %4686  ;;  %v4709_v61 = vsub.f32 %v9089_v32, %v4693_v2 }
0x18d4   : > { %6693 = vpow2.f32 %v4730_v41  ;;  %v4706_v4 = vsub.f32 %v9091_v54, %v4687_v13 }
0x18d5   : > { %4756 = vadd.xlane.f32.xlu1 %v9117_v22  ;;  %6695 = vpow2.f32 %v4728_v37  ;;  %v4740_v18 = vmul.f32 1.442695, %v4709_v61 }
0x18d6   : > { %v9120_v39 = vpop.eup %6685  ;;  %6697 = vpow2.f32 %v4726_v11  ;;  %v4734_v7 = vmul.f32 1.442695, %v4706_v4  ;;  %v4689_v17 = vpop.xlane.xlu1 %4688 }
0x18d7   : > { %4754 = vadd.xlane.f32.xlu0 %v9120_v39  ;;  %v4691_v35 = vpop.xlane.xlu0 %4690  ;;  %v9123_v52 = vpop.eup %6687  ;;  %v4707_v60 = vsub.f32 %v9095_v40, %v4689_v17 }
0x18d8   : > { %v4708_v46 = vsub.f32 %v9097_v33, %v4691_v35  ;;  %v9128_v55 = vpop.eup %6689 }
0x18d9   : > { %4752 = vadd.xlane.f32.xlu1 %v9123_v52  ;;  %v9131_v43 = vpop.eup %6691  ;;  %v4736_v51 = vmul.f32 1.442695, %v4707_v60 }
0x18da   : > { %v4738_v45 = vmul.f32 1.442695, %v4708_v46 }
0x18db   : > { %4750 = vadd.xlane.f32.xlu0 %v9128_v55 }
0x18dc   : > { %6699 = vpow2.f32 %v4738_v45 }
0x18dd   : > { %4764 = vadd.xlane.f32.xlu1 %v9131_v43  ;;  %6701 = vpow2.f32 %v4734_v7 }
0x18de   : > { %v9134_v57 = vpop.eup %6693  ;;  %6703 = vpow2.f32 %v4740_v18 }
0x18df   : > { %4762 = vadd.xlane.f32.xlu0 %v9134_v57  ;;  %v9137_v54 = vpop.eup %6695  ;;  %6705 = vpow2.f32 %v4736_v51 }
0x18e0   : > { %v9140_v33 = vpop.eup %6697 }
0x18e1   : > { %4760 = vadd.xlane.f32.xlu1 %v9137_v54 }
0x18e3   : > { %4758 = vadd.xlane.f32.xlu0 %v9140_v33 }
0x18e6   : > { %v9143_v20 = vpop.eup %6699 }
0x18e7   : > { %4770 = vadd.xlane.f32.xlu0 %v9143_v20  ;;  %v9146_v53 = vpop.eup %6701 }
0x18eb   : > { %4766 = vadd.xlane.f32.xlu0 %v9146_v53 }
0x18f2   : > { %4910 = vrot.lane.b32.xlu1 %v7002_v26, %s6867_s14  ;;  %v9157_v26 = vpop.eup %6703 }
0x18f6   : > { %4912 = vrot.lane.b32.xlu1 %v7020_v44, %s6867_s14 }
0x1901   : > { %4908 = vrot.lane.b32.xlu0 %v7004_v28, %s6867_s14  ;;  %v9160_v28 = vpop.eup %6705 }
0x1905   : > { %4914 = vrot.lane.b32.xlu0 %v7018_v42, %s6867_s14 }
0x1909   : > { %4918 = vrot.lane.b32.xlu0 %v7032_v58, %s6867_s14 }
0x190d   : > { %4922 = vrot.lane.b32.xlu0 %v9483_v10, %s6867_s14 }
0x191a   : > { %4772 = vadd.xlane.f32.xlu1 %v9157_v26 }
0x191e   : > { %4768 = vadd.xlane.f32.xlu1 %v9160_v28 }
0x192f   : > { %4916 = vrot.lane.b32.xlu1 %v9485_v16, %s6867_s14 }
0x1933   : > { %4920 = vrot.lane.b32.xlu1 %v9486_v25, %s6867_s14 }
0x195a   : > { %v4749_v42 = vpop.xlane.xlu1 %4748 }
0x195b   : > { %6707 = vrcp.f32 %v4749_v42 }
0x195c   : > { %v4747_v44 = vpop.xlane.xlu0 %4746 }
0x195d   : > { %6709 = vrcp.f32 %v4747_v44 }
0x195e   : > { %v4745_v58 = vpop.xlane.xlu1 %4744 }
0x195f   : > { %6711 = vrcp.f32 %v4745_v58 }
0x1960   : > { %v4743_v10 = vpop.xlane.xlu0 %4742 }
0x1961   : > { %6713 = vrcp.f32 %v4743_v10 }
0x1962   : > { %v4757_v32 = vpop.xlane.xlu1 %4756 }
0x1963   : > { %6715 = vrcp.f32 %v4757_v32 }
0x1964   : > { %v4755_v40 = vpop.xlane.xlu0 %4754 }
0x1965   : > { %v6708_v36 = vpop.eup %6707  ;;  %6717 = vrcp.f32 %v4755_v40 }
0x1966   : > { %v9167_v21 = vmul.f32 %v6708_v36, %v9102_v1  ;;  %v4753_v16 = vpop.xlane.xlu1 %4752 }
0x1967   : > { %v6710_v62 = vpop.eup %6709  ;;  %6719 = vrcp.f32 %v4753_v16 }
0x1968   : > { %v4825_v25 = vadd.f32 %v9167_v21, %v8951_v50  ;;  %v9172_v15 = vmul.f32 %v6710_v62, %v9105_v56  ;;  %v4751_v37 = vpop.xlane.xlu0 %4750 }
0x1969   : > { %v6712_v41 = vpop.eup %6711  ;;  %6721 = vrcp.f32 %v4751_v37 }
0x196a   : > { %v4841_v1 = vmul.f32 0.125, %v4825_v25  ;;  %v4824_v13 = vadd.f32 %v9172_v15, %v8958_v0  ;;  %v9182_v11 = vmul.f32 %v6712_v41, %v9109_v3  ;;  %v4765_v50 = vpop.xlane.xlu1 %4764 }
0x196b   : > { %v6714_v56 = vpop.eup %6713  ;;  %6723 = vrcp.f32 %v4765_v50 }
0x196c   : > { %4857 = vst [vmem:[%s9177_s27 + $0x18] sm:$0xff] %v4841_v1  ;;  %v4840_v35 = vmul.f32 0.125, %v4824_v13  ;;  %v4823_v4 = vadd.f32 %v9182_v11, %v8962_v38  ;;  %v9188_v46 = vmul.f32 %v6714_v56, %v9114_v9  ;;  %v4763_v45 = vpop.xlane.xlu0 %4762 }
0x196d   : > { %v6716_v7 = vpop.eup %6715  ;;  %6725 = vrcp.f32 %v4763_v45 }
0x196e   : > { %4856 = vst [vmem:[%s9177_s27 + $0x10] sm:$0xff] %v4840_v35  ;;  %v4839_v0 = vmul.f32 0.125, %v4823_v4  ;;  %v4822_v3 = vadd.f32 %v9188_v46, %v8966_v24  ;;  %v9194_v2 = vmul.f32 %v6716_v7, %v9117_v22  ;;  %v4761_v61 = vpop.xlane.xlu1 %4760 }
0x196f   : > { %v6718_v17 = vpop.eup %6717  ;;  %6727 = vrcp.f32 %v4761_v61  ;;  %v4871_v61 = vmul.f32 %v9182_v11, %v7185_v19  ;;  %v9584_v11 = vld [vmem:[#allocation13_spill] sm:$0xff] }
0x1970   : > { %4855 = vst [vmem:[%s9177_s27 + $0x8] sm:$0xff] %v4839_v0  ;;  %v4838_v38 = vmul.f32 0.125, %v4822_v3  ;;  %v4829_v9 = vadd.f32 %v9194_v2, %v8970_v14  ;;  %v4759_v18 = vpop.xlane.xlu0 %4758  ;;  %v9200_v51 = vmul.f32 %v6718_v17, %v9120_v39 }
0x1971   : > { %v6720_v60 = vpop.eup %6719  ;;  %6729 = vrcp.f32 %v4759_v18 }
0x1972   : > { %4854 = vst [vmem:[%s9177_s27] sm:$0xff] %v4838_v38  ;;  %v4845_v24 = vmul.f32 0.125, %v4829_v9  ;;  %v9204_v22 = vmul.f32 %v6720_v60, %v9123_v52  ;;  %v4828_v44 = vadd.f32 %v9200_v51, %v8974_v63  ;;  %v4911_v35 = vpop.permute.xlu1 %4910 }
0x1973   : > { %v6722_v42 = vpop.eup %6721 }
0x1974   : > { %4861 = vst [vmem:[%s9177_s27 + $0x38] sm:$0xff] %v4845_v24  ;;  %v4827_v14 = vadd.f32 %v9204_v22, %v8978_v47  ;;  %v4794_v58 = vmul.f32 %v6722_v42, %v9128_v55  ;;  %v4771_v39 = vpop.xlane.xlu0 %4770  ;;  %v4844_v32 = vmul.f32 0.125, %v4828_v44  ;;  %v4875_v24 = vmul.f32 %v9204_v22, %v7093_v31  ;;  %v9587_v31 = vld [vmem:[#allocation15_spill] sm:$0xff] }
0x1975   : > { %v6724_v10 = vpop.eup %6723  ;;  %6731 = vrcp.f32 %v4771_v39  ;;  %v4877_v44 = vmul.f32 %v9194_v2, %v9584_v11 }
0x1976   : > { %v4843_v40 = vmul.f32 0.125, %v4827_v14  ;;  %v4826_v36 = vadd.f32 %v4794_v58, %v8982_v59  ;;  %v9214_v52 = vmul.f32 %v6724_v10, %v9131_v43  ;;  %4860 = vst [vmem:[%s9177_s27 + $0x30] sm:$0xff] %v4844_v32  ;;  %v4913_v45 = vpop.permute.xlu1 %4912  ;;  %v4874_v9 = vmul.f32 %v4794_v58, %v7089_v29  ;;  %v9586_v29 = vld [vmem:[#allocation17_spill] sm:$0xff] }
0x1977   : > { %v6726_v16 = vpop.eup %6725 }
0x1978   : > { %4859 = vst [vmem:[%s9177_s27 + $0x28] sm:$0xff] %v4843_v40  ;;  %v4842_v63 = vmul.f32 0.125, %v4826_v36  ;;  %v4833_v47 = vadd.f32 %v9214_v52, %v8986_v49  ;;  %v4767_v55 = vpop.xlane.xlu0 %4766  ;;  %v4800_v25 = vmul.f32 %v6726_v16, %v9134_v57  ;;  %v9588_v40 = vld [vmem:[#allocation16_spill] sm:$0xff] }
0x1979   : > { %v6728_v62 = vpop.eup %6727  ;;  %6733 = vrcp.f32 %v4767_v55  ;;  %v4881_v36 = vmul.f32 %v9214_v52, %v9588_v40  ;;  %v9589_v55 = vld [vmem:[#allocation18_spill] sm:$0xff]  ;;  %v9591_v52 = vld [vmem:[#allocation28_spill] sm:$0xff] }
0x197a   : > { %4858 = vst [vmem:[%s9177_s27 + $0x20] sm:$0xff] %v4842_v63  ;;  %v4849_v37 = vmul.f32 0.125, %v4833_v47  ;;  %v4799_v59 = vmul.f32 %v6728_v62, %v9137_v54  ;;  %v4832_v41 = vadd.f32 %v4800_v25, %v8990_v48  ;;  %v4880_v22 = vmul.f32 %v4800_v25, %v9587_v31 }
0x197b   : > { %v6730_v43 = vpop.eup %6729 }
0x197c   : > { %4865 = vst [vmem:[%s9177_s27 + $0x58] sm:$0xff] %v4849_v37  ;;  %v4831_v1 = vadd.f32 %v4799_v59, %v8994_v30  ;;  %v4798_v49 = vmul.f32 %v6730_v43, %v9140_v33  ;;  %v4909_v13 = vpop.permute.xlu0 %4908  ;;  %v4848_v50 = vmul.f32 0.125, %v4832_v41  ;;  %v9590_v37 = vld [vmem:[#allocation35_spill] sm:$0xff] }
0x197d   : > { %6060 = vmatpush3.bf16.msra.mxu0 %v4909_v13 }
0x197e   : > { %v4847_v57 = vmul.f32 0.125, %v4831_v1  ;;  %v4830_v56 = vadd.f32 %v4798_v49, %v8998_v34  ;;  %6061 = vmatprep.subr.bf16.mxu0 %v9473_v12  ;;  %4864 = vst [vmem:[%s9177_s27 + $0x50] sm:$0xff] %v4848_v50 }
0x197f   : > { %v6732_v54 = vpop.eup %6731 }
0x1980   : > { %4863 = vst [vmem:[%s9177_s27 + $0x48] sm:$0xff] %v4847_v57  ;;  %v4846_v48 = vmul.f32 0.125, %v4830_v56  ;;  %v9232_v4 = vmul.f32 %v6732_v54, %v9143_v20  ;;  %v4915_v3 = vpop.permute.xlu0 %4914  ;;  %v9593_v57 = vld [vmem:[#allocation32_spill] sm:$0xff] }
0x1981   : > { %6062 = vmatpush3.bf16.msra.mxu0 %v4911_v35 }
0x1982   : > { %4862 = vst [vmem:[%s9177_s27 + $0x40] sm:$0xff] %v4846_v48  ;;  %v4836_v30 = vadd.f32 %v9232_v4, %v9003_v6  ;;  %6063 = vmatprep.subr.bf16.mxu0 %v9473_v12  ;;  %v4870_v6 = vmul.f32 %v9188_v46, %v9503_v8  ;;  %v9583_v8 = vld [vmem:[#allocation12_spill] sm:$0xff]  ;;  %v4884_v56 = vmul.f32 %v9232_v4, %v9593_v57  ;;  %v5334_v4 = vld [vmem:[%s9378_s5 + $0x1c] sm:$0xf] }
0x1983   : > { %v6734_v34 = vpop.eup %6733  ;;  %v4876_v46 = vmul.f32 %v9200_v51, %v9583_v8 }
0x1984   : > { %v4852_v33 = vmul.f32 0.125, %v4836_v30  ;;  %v4802_v7 = vmul.f32 %v6734_v34, %v9146_v53  ;;  %v4886_v17 = vadd.f32 %v4871_v61, %v4870_v6  ;;  %v4872_v53 = vmul.f32 %v9172_v15, %v7083_v23  ;;  %v9585_v15 = vld [vmem:[#allocation14_spill] sm:$0xff]  ;;  %v4919_v16 = vpop.permute.xlu0 %4918  ;;  %v9594_v30 = vld [vmem:[#allocation31_spill] sm:$0xff] }
0x1985   : > { %6064 = vmatpush3.bf16.msra.mxu0 %v4913_v45  ;;  %v4878_v14 = vmul.f32 %v4798_v49, %v9585_v15 }
0x1986   : > { %4868 = vst [vmem:[%s9177_s27 + $0x70] sm:$0xff] %v4852_v33  ;;  %v4834_v0 = vadd.f32 %v4802_v7, %v9008_v5  ;;  %6065 = vmatprep.subr.bf16.mxu0 %v9473_v12  ;;  %v4887_v38 = vadd.f32 %v4886_v17, %v4872_v53  ;;  %v4873_v5 = vmul.f32 %v9167_v21, %v7087_v27 }
0x1987   : > { %v4879_v21 = vmul.f32 %v4799_v59, %v9586_v29  ;;  %v4882_v62 = vmul.f32 %v4802_v7, %v9589_v55 }
0x1988   : > { %v4850_v20 = vmul.f32 0.125, %v4834_v0  ;;  %v4888_v18 = vadd.f32 %v4887_v38, %v4873_v5  ;;  %v4923_v35 = vpop.permute.xlu0 %4922 }
0x1989   : > { %6066 = vmatpush3.bf16.msra.mxu0 %v4915_v3 }
0x198a   : > { %4866 = vst [vmem:[%s9177_s27 + $0x60] sm:$0xff] %v4850_v20  ;;  %6067 = vmatprep.subr.bf16.mxu0 %v9473_v12  ;;  %v4889_v60 = vadd.f32 %v4888_v18, %v4874_v9  ;;  %v5051_v18 = vld [vmem:[%s9379_s6] sm:$0x1] }
0x198c   : > { %v4890_v42 = vadd.f32 %v4889_v60, %v4875_v24  ;;  %v9595_v60 = vld [vmem:[#allocation34_spill] sm:$0xff] }
0x198e   : > { %v4891_v19 = vadd.f32 %v4890_v42, %v4876_v46 }
0x1990   : > { %v4892_v23 = vadd.f32 %v4891_v19, %v4877_v44 }
0x1992   : > { %v4893_v27 = vadd.f32 %v4892_v23, %v4878_v14 }
0x1994   : > { %v4894_v10 = vadd.f32 %v4893_v27, %v4879_v21 }
0x1996   : > { %v4895_v51 = vadd.f32 %v4894_v10, %v4880_v22 }
0x1998   : > { %v4896_v47 = vadd.f32 %v4895_v51, %v4881_v36 }
0x199a   : > { %v4897_v49 = vadd.f32 %v4896_v47, %v4882_v62 }
0x19a7   : > { %v4773_v39 = vpop.xlane.xlu1 %4772 }
0x19a8   : > { %6735 = vrcp.f32 %v4773_v39 }
0x19ab   : > { %v4769_v58 = vpop.xlane.xlu1 %4768 }
0x19ac   : > { %6737 = vrcp.f32 %v4769_v58 }
0x19af   : > { %v4917_v32 = vpop.permute.xlu1 %4916 }
0x19b0   : > { %6068 = vmatpush3.bf16.msra.mxu0 %v4917_v32 }
0x19b1   : > { %6069 = vmatprep.subr.bf16.mxu0 %v9473_v12 }
0x19b2   : > { %v6736_v2 = vpop.eup %6735 }
0x19b3   : > { %v4805_v63 = vmul.f32 %v6736_v2, %v9157_v26  ;;  %v4921_v1 = vpop.permute.xlu1 %4920  ;;  %v9592_v26 = vld [vmem:[#allocation29_spill] sm:$0xff] }
0x19b4   : > { %6070 = vmatpush3.bf16.msra.mxu0 %v4919_v16 }
0x19b5   : > { %v4837_v59 = vadd.f32 %v4805_v63, %v9590_v37  ;;  %6071 = vmatprep.subr.bf16.mxu0 %v9473_v12  ;;  %v4885_v34 = vmul.f32 %v4805_v63, %v9594_v30 }
0x19b6   : > { %v6738_v25 = vpop.eup %6737 }
0x19b7   : > { %v4853_v43 = vmul.f32 0.125, %v4837_v59  ;;  %v4803_v41 = vmul.f32 %v6738_v25, %v9160_v28 }
0x19b8   : > { %6072 = vmatpush3.bf16.msra.mxu0 %v4921_v1 }
0x19b9   : > { %4869 = vst [vmem:[%s9177_s27 + $0x78] sm:$0xff] %v4853_v43  ;;  %v4835_v13 = vadd.f32 %v4803_v41, %v9591_v52  ;;  %v4883_v50 = vmul.f32 %v4803_v41, %v9592_v26  ;;  %6073 = vmatprep.subr.bf16.mxu0 %v9473_v12 }
0x19bb   : > { %v4851_v54 = vmul.f32 0.125, %v4835_v13  ;;  %v4898_v48 = vadd.f32 %v4897_v49, %v4883_v50 }
0x19bc   : > { %6074 = vmatpush3.bf16.msra.mxu0 %v4923_v35 }
0x19bd   : > { %4867 = vst [vmem:[%s9177_s27 + $0x68] sm:$0xff] %v4851_v54  ;;  %v4899_v28 = vadd.f32 %v4898_v48, %v4884_v56  ;;  %6079 = vmatprep.subr.mxu0 %v9473_v12  ;;  %s5068_s27 = scalar_lea.sflag [#allocation3], %s9287_s29 }
0x19bf   : > { %v4900_v33 = vadd.f32 %v4899_v28, %v4885_v34 }
0x19c1   : > { %v4901_v45 = vrot.slane %v4900_v33, 4 }
0x19c3   : > { %v4902_v7 = vadd.f32 %v4901_v45, %v4900_v33 }
0x19c5   : > { %v4903_v0 = vrot.slane %v4902_v7, 2 }
0x19c7   : > { %v4904_v20 = vadd.f32 %v4903_v0, %v4902_v7 }
0x19c9   : > { %v4905_v3 = vrot.slane %v4904_v20, 1 }
0x19cb   : > { %v4906_v6 = vadd.f32 %v4905_v3, %v4904_v20 }
0x19cd   : > { %v4907_v61 = vpack.c.bf16 %v4906_v6, %v4906_v6 }
0x19cf   : > { %6076 = vmatmul.mubr.bf16.vlgmr.msra.gmra.mrb[96].mxu0 %v4907_v61 }
0x19d0   : > { %6080 = vmatpush3.msk.msra.mxu0 %vm1585_vm3, %v5334_v4  ;;  %6081 = vmatprep.mubr.msk.f32.mxu0 %vm6848_vm2, %v9473_v12 }
0x1aa2   : > { %v4966_v17 = vpop.f32.mrb[96].mxu0 }
0x1aa3   : > { %v6077_v53 = vpop.f32.mrb[97].mxu0  ;;  %6082 = vmatmul.mubr.msk.f32.vlgmr.msra.gmra.mrb[100].mxu0 %vm700_vm1, %v4966_v17 }
0x1aa4   : > { %v4969_v38 = vpop.f32.mrb[98].mxu0 }
0x1aa5   : > { %v6078_v5 = vpop.f32.mrb[99].mxu0 }
0x1b76   : > { %v5046_v9 = vpop.f32.mrb[100].mxu0 }
0x1b77   : > { %v5050_v24 = vadd.f32 %v5046_v9, %v9595_v60  ;;  %v6083_v42 = vpop.f32.mrb[101].mxu0 }
0x1b79   : > { %v5052_v12 = vadd.f32 %v5051_v18, %v5050_v24 }
0x1b7b   : > { %v5055_v8 = vsel %vm5053_vm4, %v5052_v12, -inf  ;;  %5054 = vst.msk [vmem:[%s339_s21] sm:$0x1] %vm5053_vm4, %v5052_v12 }
0x1b7c   : > { %5056 = vmax.xlane.f32.xlu1 %v5055_v8 }
0x1c09   : > { %v5057_v46 = vpop.xlane.xlu1 %5056 }
0x1c0a   : > { %v5058_v19 = vsub.f32 %v5052_v12, %v5057_v46 }
0x1c0c   : > { %v5059_v11 = vmul.f32 1.442695, %v5058_v19 }
0x1c0e   : > { %6739 = vpow2.f32 %v5059_v11 }
0x1c18   : > { %v6740_v44 = vpop.eup %6739 }
0x1c19   : > { %v5061_v23 = vsel %vm5053_vm4, %v6740_v44, 0.0 }
0x1c1a   : > { %5062 = vadd.xlane.f32.xlu0 %v5061_v23 }
0x1c1b   : > { %6760 = shalt.err (!%p6757_p3)
}
0x1c1c   : > { %s6761_s21 = scalar_lea.hbm %s9303_s24, 16  ;;  %s6765_s28 = scalar_lea.hbm %s9380_s7, 32 }
0x1c1d   : > { %p6762_p4 = scmp.ne.s32.totalorder %s9303_s24, %s6761_s21  ;;  %p6766_p9 = scmp.lt.u32.totalorder %s9303_s24, %s9380_s7 }
0x1c1e   : > { %p6767_p10 = scmp.lt.u32.totalorder %s6765_s28, %s6761_s21  ;;  %p6769_p12 = scmp.lt.u32.totalorder %s6761_s21, %s9303_s24 }
0x1c1f   : > { %p6763_p7 = pnand %p6762_p4, %p6958_p5 }
0x1c20   : > { %p6768_p11 = por %p6767_p10, %p6766_p9 }
0x1c21   : > { %p6764_p8 = pneg %p6763_p7 }
0x1c22   : > { %p6770_p13 = por %p6769_p12, %p6768_p11 }
0x1c24   : > { %p6771_p0 = pnand %p6770_p13, %p6764_p8 }
0x1c26   : > { %6774 = shalt.err (!%p6771_p0)
}
0x1c27   : > { %6148 = dma.vmem_to_hbm [thread:$0]  (%p6958_p5), %s5090_s26, 16, %s9303_s24, %s5068_s27  }
0x1c28   : > { %s345_s25 = scalar_lea.vmem [#allocation4], %s9287_s29  ;;  %s9596_s22 = sshll.u32 %s6941_s13, 4 }
0x1c29   : > { %s5102_s17 = sshll.u32 %s345_s25, 4  ;;  %s9329_s23 = scalar_lea.hbm %s9381_s8, %s9596_s22  ;;  %s9331_s17 = int_to_ptr.vmem [resolvable:$true] %s5102_s17 }
0x1c2a   : > { %s5072_s24 = scalar_lea.sflag [#allocation5], %s9287_s29  ;;  %s6775_s26 = scalar_lea.vmem %s9331_s17, 16 }
0x1c2b   : > { %p6776_p1 = scmp.ne.s32.totalorder %s9331_s17, %s6775_s26  ;;  %s6869_s27 = smov [#allocation4]  }
0x1c2c   : > { %s6779_s13 = sshll.u32 %s6869_s27, 4  ;;  %s6780_s13 = int_to_ptr.vmem [resolvable:$false] %s6779_s13 }
0x1c2d   : > { %p6777_p2 = pnand %p6776_p1, %p6958_p5  ;;  %s6781_s28 = scalar_lea.vmem %s6780_s13, 32 }
0x1c2e   : > { %p6782_p4 = scmp.lt.s32.totalorder %s9331_s17, %s6780_s13  ;;  %p6783_p7 = scmp.lt.s32.totalorder %s6781_s28, %s6775_s26 }
0x1c2f   : > { %p6778_p3 = pneg %p6777_p2 }
0x1c30   : > { %p6784_p8 = por %p6783_p7, %p6782_p4 }
0x1c32   : > { %p6785_p9 = pnand %p6784_p8, %p6778_p3 }
0x1ca7   : > { %v5063_v15 = vpop.xlane.xlu0 %5062 }
0x1ca8   : > { %6741 = vrcp.f32 %v5063_v15 }
0x1cb2   : > { %v6742_v14 = vpop.eup %6741 }
0x1cb3   : > { %v5065_v39 = vmul.f32 %v6742_v14, %v6740_v44 }
0x1cb5   : > { %5066 = vst.msk [vmem:[%s345_s25] sm:$0x1] %vm5053_vm4, %v5065_v39 }
0x1cb6   : > { %6788 = shalt.err (!%p6785_p9)
}
0x1cb7   : > { %s6789_s29 = scalar_lea.hbm %s9329_s23, 16  ;;  %s6793_s22 = scalar_lea.hbm %s9381_s8, 32 }
0x1cb8   : > { %p6790_p10 = scmp.ne.s32.totalorder %s9329_s23, %s6789_s29  ;;  %p6794_p13 = scmp.lt.u32.totalorder %s9329_s23, %s9381_s8 }
0x1cb9   : > { %p6795_p0 = scmp.lt.u32.totalorder %s6793_s22, %s6789_s29  ;;  %p6797_p2 = scmp.lt.u32.totalorder %s6789_s29, %s9329_s23 }
0x1cba   : > { %p6791_p11 = pnand %p6790_p10, %p6958_p5 }
0x1cbb   : > { %p6796_p1 = por %p6795_p0, %p6794_p13 }
0x1cbc   : > { %p6792_p12 = pneg %p6791_p11 }
0x1cbd   : > { %p6798_p3 = por %p6797_p2, %p6796_p1 }
0x1cbf   : > { %p6799_p4 = pnand %p6798_p3, %p6792_p12 }
0x1cc1   : > { %6802 = shalt.err (!%p6799_p4)
}
0x1cc2   : > { %6149 = dma.vmem_to_hbm [thread:$0]  (%p6958_p5), %s9331_s17, 16, %s9329_s23, %s5072_s24  }
0x1cc3 PF: > { %p6159_p7 = scmp.ge.s32.totalorder %s6841_s12, 2  ;;  %s5117_s26 = sand.u32 1, %s6829_s30  }
0x1cc4   : > { %s5118_s27 = scalar_lea.sflag [#allocation3], %s5117_s26 }
0x1cc5   : > { %p6153_p8 = pnand %p6159_p7, %p6962_p6 }
0x1cc7   : > { %6820 = dma.done.wait (!%p6153_p8), %s5118_s27, 16  }
0x1cc8   : > { %6822 = vsyncadd (!%p6153_p8), %s5118_s27, 4294967280  ;;  %s5126_s13 = scalar_lea.sflag [#allocation5], %s5117_s26 }
0x1cc9   : > { %6824 = dma.done.wait (!%p6153_p8), %s5126_s13, 16  }
0x1cca   : > { %6826 = vsyncadd (!%p6153_p8), %s5126_s13, 4294967280  ;;  %p23_p5 = scmp.ge.s32.totalorder %s6945_s15, 4   ;;  %s9597_s30 = smov %s6833_s10 }
0x1ccb   : > { %s9598_s10 = smov %s6837_s11  ;;  %s9599_s11 = smov %s6956_s18 }
0x1ccc   : > { %s9600_s12 = smov %s6945_s15  ;;  %25 = sbr.rel (!%p23_p5) target bundleno = 5 (0x5), region = 122 }
0x1cd3   :  { %5138 = vsyncpa [#allocation3], 1 }
0x1cd4   :  { %5140 = vsyncpa [#allocation3 + $0x1], 1 }
0x1cd5   :  { %5141 = vsyncpa [#allocation5], 1 }
0x1cd6   :  { %5143 = vsyncpa [#allocation5 + $0x1], 1 }

</bundles_post_ra>
